<compile_context>
chip_gen: v7x
topology: tpu7x:2x2x1
jax: 0.10.0
libtpu: 0.0.40
codegen_flags: <defaults>
</compile_context>

<pallas_src>
import numpy as np
import jax
import jax.numpy as jnp
from jax import lax
from jax.experimental import pallas as pl
from jax.experimental.pallas import tpu as pltpu

GUARD = 128      # zero guard lanes on each side of every flattened canvas (>= Wc + 1)
CIN0_PAD = 8     # pad the first conv's 3 input channels up to 8 (MXU friendliness)


def decode_architecture(encoding):
    """Mirror ModelFromDecoding._decode (its `m == '-'` guard is dead code)."""
    layers = [("conv", 3, 16)]
    prev = 16
    for m in encoding.split('-'):
        if m == '':
            continue
        val = float(m) if '.' in m else int(m)
        if isinstance(val, int):
            layers.append(("conv", prev, val))
            prev = val
        else:
            layers.append(("maxpool",) if val > 0.5 else ("avgpool",))
    return layers


def build_model(encoding, n, h, w, key):
    """Build static geometry, constants and parameters, return (forward_fn, consts)."""
    layers = decode_architecture(encoding)

    # ---- split the layer list into runs of consecutive convs separated by pools ----
    segs, pools_after, cur = [], [], []
    for L in layers:
        if L[0] == "conv":
            cur.append(L)
        else:
            segs.append(cur)
            pools_after.append(L[0])
            cur = []
    segs.append(cur)
    pools_after.append(None)

    consts = []                                  # pallas_call inputs 1.. (slot 0 = image)

    def add_const(a):
        consts.append(a)
        return len(consts)                       # slot index inside the kernel inputs

    canvases = []                                # scratch canvas geometry per segment
    ops = []                                     # static plan consumed by the kernel
    ch, hh, ww = 3, h, w
    dense_info = None
    input_geom = None

    for si, convs in enumerate(segs):
        k = len(convs)
        pool_kind = pools_after[si]
        if k == 0 and pool_kind is None:         # trailing empty segment
            canvases.append(None)
            continue

        margin_final = 2 if k > 0 else 1         # margin around the segment's last output
        m_in = margin_final + k                  # margin around the segment's input
        Hc, Wc = hh + 2 * m_in, ww + 2 * m_in
        assert Wc + 1 <= GUARD, "canvas wider than the guard region"
        Mc = n * Hc * Wc
        row_need = [c[2] for c in convs] + ([ch] if (si > 0 or k == 0) else [])
        canvases.append({"rows": max(row_need), "Hc": Hc, "Wc": Wc, "Mc": Mc})
        if si == 0:
            input_geom = {"m": m_in, "Hc": Hc, "Wc": Wc, "rows": CIN0_PAD}

        # ---------------- convolution blocks of this segment ----------------
        m_cur = m_in
        for pos, (_, cin, cout) in enumerate(convs):
            first = (si == 0 and pos == 0)
            cin_eff = CIN0_PAD if first else cin
            ho, wo = hh + 2, ww + 2
            m_out = m_cur - 1

            key_w, key = jax.random.split(key)
            bound = 1.0 / np.sqrt(cin * 9.0)
            w4 = jax.random.uniform(key_w, (cout, cin, 3, 3), jnp.float32, -bound, bound)
            # (cout,cin,3,3) -> (9, cout, cin) : one MXU-ready matrix per filter tap.
            wt = jnp.transpose(w4, (2, 3, 0, 1)).reshape(9, cout, cin)
            if cin_eff != cin:
                wt = jnp.pad(wt, ((0, 0), (0, 0), (0, cin_eff - cin)))
            gamma = jnp.ones((cout, 1), jnp.float32)
            beta = jnp.zeros((cout, 1), jnp.float32)

            # 0/1 mask of the valid output pixels inside this segment's canvas.
            mask = np.zeros((1, Mc), np.float32)
            for b in range(n):
                for i in range(ho):
                    base = b * Hc * Wc + (m_out + i) * Wc + m_out
                    mask[0, base:base + wo] = 1.0

            ops.append({
                "kind": "conv", "src_input": first, "canvas": si,
                "cin": cin_eff, "cout": cout, "Wc": Wc, "Mc": Mc,
                "count": float(n * ho * wo),
                "w_slot": add_const(wt.astype(jnp.bfloat16)),
                "g_slot": add_const(gamma),
                "b_slot": add_const(beta),
                "mask_slot": add_const(jnp.asarray(mask)),
            })
            hh, ww, ch = ho, wo, cout
            m_cur = m_out

        # ---------------- pool following this segment ----------------
        if pool_kind is not None:
            ho, wo = hh // 2 + 1, ww // 2 + 1
            last_layer = (si == len(segs) - 2 and len(segs[-1]) == 0)
            if last_layer:
                blk = ((ho * wo + 127) // 128) * 128
                Mdst = n * blk
            else:
                k_nxt = len(segs[si + 1])
                m_nxt = (2 if k_nxt > 0 else 1) + k_nxt
                Hc2, Wc2 = ho + 2 * m_nxt, wo + 2 * m_nxt
                Mdst = n * Hc2 * Wc2
            S = np.zeros((Mc, Mdst), np.float32)
            for b in range(n):
                for i in range(ho):
                    for j in range(wo):
                        q = b * Hc * Wc + (m_cur + 2 * i - 1) * Wc + (m_cur + 2 * j - 1)
                        if last_layer:
                            p = b * blk + i * wo + j
                        else:
                            p = b * Hc2 * Wc2 + (m_nxt + i) * Wc2 + (m_nxt + j)
                        S[q, p] = 1.0
            ops.append({
                "kind": "pool", "op": pool_kind, "canvas": si,
                "C": ch, "Wc": Wc, "Mc": Mc, "Mdst": Mdst,
                "dst_dense": last_layer,
                "dst_canvas": None if last_layer else si + 1,
                "S_slot": add_const(jnp.asarray(S)),
            })
            if last_layer:
                dense_info = {"blk": blk, "C": ch, "howo": ho * wo}
            hh, ww = ho, wo

    if len(segs[-1]) > 0:
        # Network ends with a conv block: compact its canvas into the dense FC layout.
        si = len(segs) - 1
        cv = canvases[si]
        blk = ((hh * ww + 127) // 128) * 128
        S = np.zeros((cv["Mc"], n * blk), np.float32)
        for b in range(n):
            for i in range(hh):
                for j in range(ww):
                    q = b * cv["Hc"] * cv["Wc"] + (2 + i) * cv["Wc"] + (2 + j)
                    S[q, b * blk + i * ww + j] = 1.0
        ops.append({"kind": "compact", "canvas": si, "C": ch, "Mc": cv["Mc"],
                    "Mdst": n * blk, "S_slot": add_const(jnp.asarray(S))})
        dense_info = {"blk": blk, "C": ch, "howo": hh * ww}

    # ---------------- final Linear(D -> 10) parameters ----------------
    d_fc = ch * hh * ww
    key_w, key_b = jax.random.split(key)
    bound = 1.0 / np.sqrt(float(d_fc))
    wfc = jax.random.uniform(key_w, (10, d_fc), jnp.float32, -bound, bound)
    bfc = jax.random.uniform(key_b, (10,), jnp.float32, -bound, bound)
    howo = dense_info["howo"]
    wfc3 = jnp.transpose(wfc.reshape(10, ch, howo), (1, 2, 0))   # (C_last, Ho*Wo, 10)
    wfc_slot = add_const(wfc3)
    bfc_slot = add_const(bfc.reshape(1, 10))

    plan = {"ops": ops, "canvases": canvases, "dense": dense_info,
            "input_geom": input_geom, "wfc_slot": wfc_slot, "bfc_slot": bfc_slot,
            "n_batch": n}
    return _make_forward(plan, len(consts)), consts


def _make_forward(plan, n_consts):
    ops = plan["ops"]
    canvases = plan["canvases"]
    n_batch = plan["n_batch"]
    n_inputs = 1 + n_consts
    dense_info = plan["dense"]
    blk, c_last, howo = dense_info["blk"], dense_info["C"], dense_info["howo"]

    scratch_shapes = []
    canvas_pos = {}
    for si, cv in enumerate(canvases):
        if cv is None:
            continue
        canvas_pos[si] = len(scratch_shapes)
        scratch_shapes.append(pltpu.VMEM((cv["rows"], 2 * GUARD + cv["Mc"]), jnp.float32))

    def kernel(*refs):
        in_refs = refs[:n_inputs]
        out_ref = refs[n_inputs]
        canv = refs[n_inputs + 1:]

        # Canvas margins / guards must be exactly zero: they double as the conv SAME
        # padding, the pool padding and the excluded region of the BN statistics.
        for cr in canv:
            cr[...] = jnp.zeros(cr.shape, cr.dtype)

        dense = None
        for op in ops:
            if op["kind"] == "conv":
                src = in_refs[0] if op["src_input"] else canv[canvas_pos[op["canvas"]]]
                dst = canv[canvas_pos[op["canvas"]]]
                w_ref = in_refs[op["w_slot"]]
                gamma = in_refs[op["g_slot"]][...]
                beta = in_refs[op["b_slot"]][...]
                mask = in_refs[op["mask_slot"]][...]
                cin, cout = op["cin"], op["cout"]
                Wc, Mc = op["Wc"], op["Mc"]
                acc = jnp.zeros((cout, Mc), jnp.float32)
                t = 0
                for dy in (-1, 0, 1):
                    for dx in (-1, 0, 1):
                        s = GUARD + dy * Wc + dx
                        tap = src[0:cin, s:s + Mc].astype(jnp.bfloat16)
                        acc = acc + jnp.dot(w_ref[t], tap,
                                            preferred_element_type=jnp.float32)
                        t += 1
                # BatchNorm2d (training mode): per-channel batch stats over the
                # N*Ho*Wo valid pixels. Canvas margins are exactly zero, so summing
                # the whole canvas and dividing by the valid count is exact.
                inv_cnt = 1.0 / op["count"]
                mean = jnp.sum(acc, axis=1, keepdims=True) * inv_cnt
                var = jnp.sum(acc * acc, axis=1, keepdims=True) * inv_cnt - mean * mean
                y = (acc - mean) * lax.rsqrt(var + 1e-5)
                y = y * gamma + beta
                y = jnp.maximum(y, 0.0) * mask        # ReLU, then re-zero the margins
                dst[0:cout, GUARD:GUARD + Mc] = y
            elif op["kind"] == "pool":
                cr = canv[canvas_pos[op["canvas"]]]
                c, Wc, Mc = op["C"], op["Wc"], op["Mc"]
                t00 = cr[0:c, GUARD:GUARD + Mc]
                t01 = cr[0:c, GUARD + 1:GUARD + 1 + Mc]
                t10 = cr[0:c, GUARD + Wc:GUARD + Wc + Mc]
                t11 = cr[0:c, GUARD + Wc + 1:GUARD + Wc + 1 + Mc]
                if op["op"] == "maxpool":
                    # post-ReLU values are >= 0 and every window holds >= 1 valid
                    # pixel, so zero padding is equivalent to PyTorch's -inf padding.
                    pooled = jnp.maximum(jnp.maximum(t00, t01), jnp.maximum(t10, t11))
                else:
                    pooled = (t00 + t01 + t10 + t11) * 0.25   # count_include_pad=True
                sel = in_refs[op["S_slot"]][...]
                res = jnp.dot(pooled, sel, preferred_element_type=jnp.float32)
                if op["dst_dense"]:
                    dense = res
                else:
                    dcv = canv[canvas_pos[op["dst_canvas"]]]
                    dcv[0:c, GUARD:GUARD + op["Mdst"]] = res
            else:  # "compact": network ended with a conv block
                cr = canv[canvas_pos[op["canvas"]]]
                val = cr[0:op["C"], GUARD:GUARD + op["Mc"]]
                sel = in_refs[op["S_slot"]][...]
                dense = jnp.dot(val, sel, preferred_element_type=jnp.float32)

        # ---- Linear(D, 10) + ReLU, flatten order = NCHW (matches x.view(-1, D)) ----
        wfc_ref = in_refs[plan["wfc_slot"]]          # (C_last, Ho*Wo, 10)
        bfc = in_refs[plan["bfc_slot"]][...]         # (1, 10)
        for b in range(n_batch):
            a_b = dense[:, b * blk:b * blk + howo]   # (C_last, Ho*Wo)
            acc = bfc
            for c in range(c_last):
                acc = acc + jnp.dot(a_b[c:c + 1, :], wfc_ref[c],
                                    preferred_element_type=jnp.float32)
            out_ref[b:b + 1, :] = jnp.maximum(acc, 0.0)

    vmem = pl.BlockSpec(memory_space=pltpu.MemorySpace.VMEM)
    # Single grid point on purpose: total work is < 1 MFLOP, everything fits in VMEM
    # and the BatchNorm statistics couple the whole batch.
    # TODO(synk): when scaling up, add an M-tiled grid (parallel over v7x's 2 cores)
    #             with two-pass BN statistics and an explicit vmem_limit_bytes.
    call = pl.pallas_call(
        kernel,
        out_shape=jax.ShapeDtypeStruct((n_batch, 10), jnp.float32),
        in_specs=[vmem] * n_inputs,
        out_specs=vmem,
        scratch_shapes=scratch_shapes,
    )

    geom = plan["input_geom"]

    @jax.jit
    def forward(x, consts):
        nb, c0, h0, w0 = x.shape
        m, Hc, Wc, rows = geom["m"], geom["Hc"], geom["Wc"], geom["rows"]
        # One-time layout prep of the model input: NCHW -> zero-margin canvas.
        xp = jnp.pad(x, ((0, 0), (0, rows - c0),
                         (m, Hc - h0 - m), (m, Wc - w0 - m)))
        flat = jnp.transpose(xp, (1, 0, 2, 3)).reshape(rows, nb * Hc * Wc)
        flat = jnp.pad(flat, ((0, 0), (GUARD, GUARD))).astype(jnp.bfloat16)
        return call(flat, *consts)

    return forward


if __name__ == "__main__":
    encoding = "8-0.6-4-0.4"   # conv(3,16)-conv(16,8)-maxpool-conv(8,4)-avgpool
    N, H, W = 2, 8, 8

    key = jax.random.PRNGKey(0)
    kx, kp = jax.random.split(key)
    x = jax.random.normal(kx, (N, 3, H, W), jnp.float32)

    forward, consts = build_model(encoding, N, H, W, kp)
    out = forward(x, consts)
    out = jax.block_until_ready(out)
    assert out.shape == (N, 10), out.shape
    print("KERNEL_OK")
</pallas_src>

<mosaic_0001>
module attributes {stable_mosaic.version = 11 : i64} {
  func.func @kernel(%arg0: memref<8x768xbf16, #tpu.memory_space<vmem>>, %arg1: memref<9x16x8xbf16, #tpu.memory_space<vmem>>, %arg2: memref<16x1xf32, #tpu.memory_space<vmem>>, %arg3: memref<16x1xf32, #tpu.memory_space<vmem>>, %arg4: memref<1x512xf32, #tpu.memory_space<vmem>>, %arg5: memref<9x8x16xbf16, #tpu.memory_space<vmem>>, %arg6: memref<8x1xf32, #tpu.memory_space<vmem>>, %arg7: memref<8x1xf32, #tpu.memory_space<vmem>>, %arg8: memref<1x512xf32, #tpu.memory_space<vmem>>, %arg9: memref<512x338xf32, #tpu.memory_space<vmem>>, %arg10: memref<9x4x8xbf16, #tpu.memory_space<vmem>>, %arg11: memref<4x1xf32, #tpu.memory_space<vmem>>, %arg12: memref<4x1xf32, #tpu.memory_space<vmem>>, %arg13: memref<1x338xf32, #tpu.memory_space<vmem>>, %arg14: memref<338x256xf32, #tpu.memory_space<vmem>>, %arg15: memref<4x25x10xf32, #tpu.memory_space<vmem>>, %arg16: memref<1x10xf32, #tpu.memory_space<vmem>>, %arg17: memref<2x10xf32, #tpu.memory_space<vmem>>, %arg18: memref<16x768xf32, #tpu.memory_space<vmem>>, %arg19: memref<8x594xf32, #tpu.memory_space<vmem>>) attributes {dimension_semantics = [], scalar_prefetch = 0 : i64, scratch_operands = 2 : i64, tpu.core_type = #tpu.core_type<tc>} {
    %cst = arith.constant 0.000000e+00 : f32
    %0 = vector.broadcast %cst : f32 to vector<16x768xf32>
    %c0 = arith.constant 0 : index
    %c0_0 = arith.constant 0 : index
    %1 = vector.load %arg18[%c0, %c0_0] : memref<16x768xf32, #tpu.memory_space<vmem>>, vector<16x768xf32>
    tpu.vector_store %arg18[%c0, %c0_0], %0 {strides = array<i32>} : memref<16x768xf32, #tpu.memory_space<vmem>>, vector<16x768xf32>,
    %cst_1 = arith.constant 0.000000e+00 : f32
    %2 = vector.broadcast %cst_1 : f32 to vector<8x594xf32>
    %c0_2 = arith.constant 0 : index
    %c0_3 = arith.constant 0 : index
    %3 = vector.load %arg19[%c0_2, %c0_3] : memref<8x594xf32, #tpu.memory_space<vmem>>, vector<8x594xf32>
    tpu.vector_store %arg19[%c0_2, %c0_3], %2 {strides = array<i32>} : memref<8x594xf32, #tpu.memory_space<vmem>>, vector<8x594xf32>,
    %c0_4 = arith.constant 0 : index
    %c0_5 = arith.constant 0 : index
    %4 = vector.load %arg2[%c0_4, %c0_5] : memref<16x1xf32, #tpu.memory_space<vmem>>, vector<16x1xf32>
    %c0_6 = arith.constant 0 : index
    %c0_7 = arith.constant 0 : index
    %5 = vector.load %arg3[%c0_6, %c0_7] : memref<16x1xf32, #tpu.memory_space<vmem>>, vector<16x1xf32>
    %c0_8 = arith.constant 0 : index
    %c0_9 = arith.constant 0 : index
    %6 = vector.load %arg4[%c0_8, %c0_9] : memref<1x512xf32, #tpu.memory_space<vmem>>, vector<1x512xf32>
    %cst_10 = arith.constant 0.000000e+00 : f32
    %7 = vector.broadcast %cst_10 : f32 to vector<16x512xf32>
    %c0_11 = arith.constant 0 : index
    %c111 = arith.constant 111 : index
    %8 = vector.load %arg0[%c0_11, %c111] : memref<8x768xbf16, #tpu.memory_space<vmem>>, vector<8x512xbf16>
    %c0_12 = arith.constant 0 : index
    %c0_13 = arith.constant 0 : index
    %c0_14 = arith.constant 0 : index
    %9 = vector.load %arg1[%c0_12, %c0_13, %c0_14] : memref<9x16x8xbf16, #tpu.memory_space<vmem>>, vector<1x16x8xbf16>
    %10 = vector.shape_cast %9 : vector<1x16x8xbf16> to vector<16x8xbf16>
    %cst_15 = arith.constant dense<0.000000e+00> : vector<16x512xf32>
    %11 = tpu.matmul %10, %8, %cst_15 {dimension_numbers = #tpu.dot_dimension_numbers<[1], [0], [0], [1], [0, 0, 1, 1], [], []>} : vector<16x8xbf16>, vector<8x512xbf16>, vector<16x512xf32> -> vector<16x512xf32>
    %12 = arith.addf %7, %11 : vector<16x512xf32>
    %c0_16 = arith.constant 0 : index
    %c112 = arith.constant 112 : index
    %13 = vector.load %arg0[%c0_16, %c112] : memref<8x768xbf16, #tpu.memory_space<vmem>>, vector<8x512xbf16>
    %c1 = arith.constant 1 : index
    %c0_17 = arith.constant 0 : index
    %c0_18 = arith.constant 0 : index
    %14 = vector.load %arg1[%c1, %c0_17, %c0_18] : memref<9x16x8xbf16, #tpu.memory_space<vmem>>, vector<1x16x8xbf16>
    %15 = vector.shape_cast %14 : vector<1x16x8xbf16> to vector<16x8xbf16>
    %cst_19 = arith.constant dense<0.000000e+00> : vector<16x512xf32>
    %16 = tpu.matmul %15, %13, %cst_19 {dimension_numbers = #tpu.dot_dimension_numbers<[1], [0], [0], [1], [0, 0, 1, 1], [], []>} : vector<16x8xbf16>, vector<8x512xbf16>, vector<16x512xf32> -> vector<16x512xf32>
    %17 = arith.addf %12, %16 : vector<16x512xf32>
    %c0_20 = arith.constant 0 : index
    %c113 = arith.constant 113 : index
    %18 = vector.load %arg0[%c0_20, %c113] : memref<8x768xbf16, #tpu.memory_space<vmem>>, vector<8x512xbf16>
    %c2 = arith.constant 2 : index
    %c0_21 = arith.constant 0 : index
    %c0_22 = arith.constant 0 : index
    %19 = vector.load %arg1[%c2, %c0_21, %c0_22] : memref<9x16x8xbf16, #tpu.memory_space<vmem>>, vector<1x16x8xbf16>
    %20 = vector.shape_cast %19 : vector<1x16x8xbf16> to vector<16x8xbf16>
    %cst_23 = arith.constant dense<0.000000e+00> : vector<16x512xf32>
    %21 = tpu.matmul %20, %18, %cst_23 {dimension_numbers = #tpu.dot_dimension_numbers<[1], [0], [0], [1], [0, 0, 1, 1], [], []>} : vector<16x8xbf16>, vector<8x512xbf16>, vector<16x512xf32> -> vector<16x512xf32>
    %22 = arith.addf %17, %21 : vector<16x512xf32>
    %c0_24 = arith.constant 0 : index
    %c127 = arith.constant 127 : index
    %23 = vector.load %arg0[%c0_24, %c127] : memref<8x768xbf16, #tpu.memory_space<vmem>>, vector<8x512xbf16>
    %c3 = arith.constant 3 : index
    %c0_25 = arith.constant 0 : index
    %c0_26 = arith.constant 0 : index
    %24 = vector.load %arg1[%c3, %c0_25, %c0_26] : memref<9x16x8xbf16, #tpu.memory_space<vmem>>, vector<1x16x8xbf16>
    %25 = vector.shape_cast %24 : vector<1x16x8xbf16> to vector<16x8xbf16>
    %cst_27 = arith.constant dense<0.000000e+00> : vector<16x512xf32>
    %26 = tpu.matmul %25, %23, %cst_27 {dimension_numbers = #tpu.dot_dimension_numbers<[1], [0], [0], [1], [0, 0, 1, 1], [], []>} : vector<16x8xbf16>, vector<8x512xbf16>, vector<16x512xf32> -> vector<16x512xf32>
    %27 = arith.addf %22, %26 : vector<16x512xf32>
    %c0_28 = arith.constant 0 : index
    %c128 = arith.constant 128 : index
    %28 = vector.load %arg0[%c0_28, %c128] : memref<8x768xbf16, #tpu.memory_space<vmem>>, vector<8x512xbf16>
    %c4 = arith.constant 4 : index
    %c0_29 = arith.constant 0 : index
    %c0_30 = arith.constant 0 : index
    %29 = vector.load %arg1[%c4, %c0_29, %c0_30] : memref<9x16x8xbf16, #tpu.memory_space<vmem>>, vector<1x16x8xbf16>
    %30 = vector.shape_cast %29 : vector<1x16x8xbf16> to vector<16x8xbf16>
    %cst_31 = arith.constant dense<0.000000e+00> : vector<16x512xf32>
    %31 = tpu.matmul %30, %28, %cst_31 {dimension_numbers = #tpu.dot_dimension_numbers<[1], [0], [0], [1], [0, 0, 1, 1], [], []>} : vector<16x8xbf16>, vector<8x512xbf16>, vector<16x512xf32> -> vector<16x512xf32>
    %32 = arith.addf %27, %31 : vector<16x512xf32>
    %c0_32 = arith.constant 0 : index
    %c129 = arith.constant 129 : index
    %33 = vector.load %arg0[%c0_32, %c129] : memref<8x768xbf16, #tpu.memory_space<vmem>>, vector<8x512xbf16>
    %c5 = arith.constant 5 : index
    %c0_33 = arith.constant 0 : index
    %c0_34 = arith.constant 0 : index
    %34 = vector.load %arg1[%c5, %c0_33, %c0_34] : memref<9x16x8xbf16, #tpu.memory_space<vmem>>, vector<1x16x8xbf16>
    %35 = vector.shape_cast %34 : vector<1x16x8xbf16> to vector<16x8xbf16>
    %cst_35 = arith.constant dense<0.000000e+00> : vector<16x512xf32>
    %36 = tpu.matmul %35, %33, %cst_35 {dimension_numbers = #tpu.dot_dimension_numbers<[1], [0], [0], [1], [0, 0, 1, 1], [], []>} : vector<16x8xbf16>, vector<8x512xbf16>, vector<16x512xf32> -> vector<16x512xf32>
    %37 = arith.addf %32, %36 : vector<16x512xf32>
    %c0_36 = arith.constant 0 : index
    %c143 = arith.constant 143 : index
    %38 = vector.load %arg0[%c0_36, %c143] : memref<8x768xbf16, #tpu.memory_space<vmem>>, vector<8x512xbf16>
    %c6 = arith.constant 6 : index
    %c0_37 = arith.constant 0 : index
    %c0_38 = arith.constant 0 : index
    %39 = vector.load %arg1[%c6, %c0_37, %c0_38] : memref<9x16x8xbf16, #tpu.memory_space<vmem>>, vector<1x16x8xbf16>
    %40 = vector.shape_cast %39 : vector<1x16x8xbf16> to vector<16x8xbf16>
    %cst_39 = arith.constant dense<0.000000e+00> : vector<16x512xf32>
    %41 = tpu.matmul %40, %38, %cst_39 {dimension_numbers = #tpu.dot_dimension_numbers<[1], [0], [0], [1], [0, 0, 1, 1], [], []>} : vector<16x8xbf16>, vector<8x512xbf16>, vector<16x512xf32> -> vector<16x512xf32>
    %42 = arith.addf %37, %41 : vector<16x512xf32>
    %c0_40 = arith.constant 0 : index
    %c144 = arith.constant 144 : index
    %43 = vector.load %arg0[%c0_40, %c144] : memref<8x768xbf16, #tpu.memory_space<vmem>>, vector<8x512xbf16>
    %c7 = arith.constant 7 : index
    %c0_41 = arith.constant 0 : index
    %c0_42 = arith.constant 0 : index
    %44 = vector.load %arg1[%c7, %c0_41, %c0_42] : memref<9x16x8xbf16, #tpu.memory_space<vmem>>, vector<1x16x8xbf16>
    %45 = vector.shape_cast %44 : vector<1x16x8xbf16> to vector<16x8xbf16>
    %cst_43 = arith.constant dense<0.000000e+00> : vector<16x512xf32>
    %46 = tpu.matmul %45, %43, %cst_43 {dimension_numbers = #tpu.dot_dimension_numbers<[1], [0], [0], [1], [0, 0, 1, 1], [], []>} : vector<16x8xbf16>, vector<8x512xbf16>, vector<16x512xf32> -> vector<16x512xf32>
    %47 = arith.addf %42, %46 : vector<16x512xf32>
    %c0_44 = arith.constant 0 : index
    %c145 = arith.constant 145 : index
    %48 = vector.load %arg0[%c0_44, %c145] : memref<8x768xbf16, #tpu.memory_space<vmem>>, vector<8x512xbf16>
    %c8 = arith.constant 8 : index
    %c0_45 = arith.constant 0 : index
    %c0_46 = arith.constant 0 : index
    %49 = vector.load %arg1[%c8, %c0_45, %c0_46] : memref<9x16x8xbf16, #tpu.memory_space<vmem>>, vector<1x16x8xbf16>
    %50 = vector.shape_cast %49 : vector<1x16x8xbf16> to vector<16x8xbf16>
    %cst_47 = arith.constant dense<0.000000e+00> : vector<16x512xf32>
    %51 = tpu.matmul %50, %48, %cst_47 {dimension_numbers = #tpu.dot_dimension_numbers<[1], [0], [0], [1], [0, 0, 1, 1], [], []>} : vector<16x8xbf16>, vector<8x512xbf16>, vector<16x512xf32> -> vector<16x512xf32>
    %52 = arith.addf %47, %51 : vector<16x512xf32>
    %cst_48 = arith.constant dense<0.000000e+00> : vector<16xf32>
    %53 = vector.multi_reduction <add>, %52, %cst_48 [1] : vector<16x512xf32> to vector<16xf32>
    %54 = vector.shape_cast %53 : vector<16xf32> to vector<16x1xf32>
    %cst_49 = arith.constant 5.000000e-03 : f32
    %55 = vector.broadcast %cst_49 : f32 to vector<16x1xf32>
    %56 = arith.mulf %54, %55 : vector<16x1xf32>
    %57 = arith.mulf %52, %52 : vector<16x512xf32>
    %cst_50 = arith.constant dense<0.000000e+00> : vector<16xf32>
    %58 = vector.multi_reduction <add>, %57, %cst_50 [1] : vector<16x512xf32> to vector<16xf32>
    %59 = vector.shape_cast %58 : vector<16xf32> to vector<16x1xf32>
    %cst_51 = arith.constant 5.000000e-03 : f32
    %60 = vector.broadcast %cst_51 : f32 to vector<16x1xf32>
    %61 = arith.mulf %59, %60 : vector<16x1xf32>
    %62 = arith.mulf %56, %56 : vector<16x1xf32>
    %63 = arith.subf %61, %62 : vector<16x1xf32>
    %64 = vector.broadcast %56 : vector<16x1xf32> to vector<16x512xf32>
    %65 = arith.subf %52, %64 : vector<16x512xf32>
    %cst_52 = arith.constant 9.99999974E-6 : f32
    %66 = vector.broadcast %cst_52 : f32 to vector<16x1xf32>
    %67 = arith.addf %63, %66 : vector<16x1xf32>
    %68 = math.rsqrt %67 : vector<16x1xf32>
    %69 = vector.broadcast %68 : vector<16x1xf32> to vector<16x512xf32>
    %70 = arith.mulf %65, %69 : vector<16x512xf32>
    %71 = vector.broadcast %4 : vector<16x1xf32> to vector<16x512xf32>
    %72 = arith.mulf %70, %71 : vector<16x512xf32>
    %73 = vector.broadcast %5 : vector<16x1xf32> to vector<16x512xf32>
    %74 = arith.addf %72, %73 : vector<16x512xf32>
    %cst_53 = arith.constant 0.000000e+00 : f32
    %75 = vector.broadcast %cst_53 : f32 to vector<16x512xf32>
    %76 = arith.maximumf %74, %75 : vector<16x512xf32>
    %77 = vector.broadcast %6 : vector<1x512xf32> to vector<16x512xf32>
    %78 = arith.mulf %76, %77 : vector<16x512xf32>
    %c0_54 = arith.constant 0 : index
    %c128_55 = arith.constant 128 : index
    %79 = vector.load %arg18[%c0_54, %c128_55] : memref<16x768xf32, #tpu.memory_space<vmem>>, vector<16x512xf32>
    tpu.vector_store %arg18[%c0_54, %c128_55], %78 {strides = array<i32>} : memref<16x768xf32, #tpu.memory_space<vmem>>, vector<16x512xf32>,
    %c0_56 = arith.constant 0 : index
    %c0_57 = arith.constant 0 : index
    %80 = vector.load %arg6[%c0_56, %c0_57] : memref<8x1xf32, #tpu.memory_space<vmem>>, vector<8x1xf32>
    %c0_58 = arith.constant 0 : index
    %c0_59 = arith.constant 0 : index
    %81 = vector.load %arg7[%c0_58, %c0_59] : memref<8x1xf32, #tpu.memory_space<vmem>>, vector<8x1xf32>
    %c0_60 = arith.constant 0 : index
    %c0_61 = arith.constant 0 : index
    %82 = vector.load %arg8[%c0_60, %c0_61] : memref<1x512xf32, #tpu.memory_space<vmem>>, vector<1x512xf32>
    %cst_62 = arith.constant 0.000000e+00 : f32
    %83 = vector.broadcast %cst_62 : f32 to vector<8x512xf32>
    %c0_63 = arith.constant 0 : index
    %c111_64 = arith.constant 111 : index
    %84 = vector.load %arg18[%c0_63, %c111_64] : memref<16x768xf32, #tpu.memory_space<vmem>>, vector<16x512xf32>
    %85 = arith.truncf %84 : vector<16x512xf32> to vector<16x512xbf16>
    %c0_65 = arith.constant 0 : index
    %c0_66 = arith.constant 0 : index
    %c0_67 = arith.constant 0 : index
    %86 = vector.load %arg5[%c0_65, %c0_66, %c0_67] : memref<9x8x16xbf16, #tpu.memory_space<vmem>>, vector<1x8x16xbf16>
    %87 = vector.shape_cast %86 : vector<1x8x16xbf16> to vector<8x16xbf16>
    %cst_68 = arith.constant dense<0.000000e+00> : vector<8x512xf32>
    %88 = tpu.matmul %87, %85, %cst_68 {dimension_numbers = #tpu.dot_dimension_numbers<[1], [0], [0], [1], [0, 0, 1, 1], [], []>} : vector<8x16xbf16>, vector<16x512xbf16>, vector<8x512xf32> -> vector<8x512xf32>
    %89 = arith.addf %83, %88 : vector<8x512xf32>
    %c0_69 = arith.constant 0 : index
    %c112_70 = arith.constant 112 : index
    %90 = vector.load %arg18[%c0_69, %c112_70] : memref<16x768xf32, #tpu.memory_space<vmem>>, vector<16x512xf32>
    %91 = arith.truncf %90 : vector<16x512xf32> to vector<16x512xbf16>
    %c1_71 = arith.constant 1 : index
    %c0_72 = arith.constant 0 : index
    %c0_73 = arith.constant 0 : index
    %92 = vector.load %arg5[%c1_71, %c0_72, %c0_73] : memref<9x8x16xbf16, #tpu.memory_space<vmem>>, vector<1x8x16xbf16>
    %93 = vector.shape_cast %92 : vector<1x8x16xbf16> to vector<8x16xbf16>
    %cst_74 = arith.constant dense<0.000000e+00> : vector<8x512xf32>
    %94 = tpu.matmul %93, %91, %cst_74 {dimension_numbers = #tpu.dot_dimension_numbers<[1], [0], [0], [1], [0, 0, 1, 1], [], []>} : vector<8x16xbf16>, vector<16x512xbf16>, vector<8x512xf32> -> vector<8x512xf32>
    %95 = arith.addf %89, %94 : vector<8x512xf32>
    %c0_75 = arith.constant 0 : index
    %c113_76 = arith.constant 113 : index
    %96 = vector.load %arg18[%c0_75, %c113_76] : memref<16x768xf32, #tpu.memory_space<vmem>>, vector<16x512xf32>
    %97 = arith.truncf %96 : vector<16x512xf32> to vector<16x512xbf16>
    %c2_77 = arith.constant 2 : index
    %c0_78 = arith.constant 0 : index
    %c0_79 = arith.constant 0 : index
    %98 = vector.load %arg5[%c2_77, %c0_78, %c0_79] : memref<9x8x16xbf16, #tpu.memory_space<vmem>>, vector<1x8x16xbf16>
    %99 = vector.shape_cast %98 : vector<1x8x16xbf16> to vector<8x16xbf16>
    %cst_80 = arith.constant dense<0.000000e+00> : vector<8x512xf32>
    %100 = tpu.matmul %99, %97, %cst_80 {dimension_numbers = #tpu.dot_dimension_numbers<[1], [0], [0], [1], [0, 0, 1, 1], [], []>} : vector<8x16xbf16>, vector<16x512xbf16>, vector<8x512xf32> -> vector<8x512xf32>
    %101 = arith.addf %95, %100 : vector<8x512xf32>
    %c0_81 = arith.constant 0 : index
    %c127_82 = arith.constant 127 : index
    %102 = vector.load %arg18[%c0_81, %c127_82] : memref<16x768xf32, #tpu.memory_space<vmem>>, vector<16x512xf32>
    %103 = arith.truncf %102 : vector<16x512xf32> to vector<16x512xbf16>
    %c3_83 = arith.constant 3 : index
    %c0_84 = arith.constant 0 : index
    %c0_85 = arith.constant 0 : index
    %104 = vector.load %arg5[%c3_83, %c0_84, %c0_85] : memref<9x8x16xbf16, #tpu.memory_space<vmem>>, vector<1x8x16xbf16>
    %105 = vector.shape_cast %104 : vector<1x8x16xbf16> to vector<8x16xbf16>
    %cst_86 = arith.constant dense<0.000000e+00> : vector<8x512xf32>
    %106 = tpu.matmul %105, %103, %cst_86 {dimension_numbers = #tpu.dot_dimension_numbers<[1], [0], [0], [1], [0, 0, 1, 1], [], []>} : vector<8x16xbf16>, vector<16x512xbf16>, vector<8x512xf32> -> vector<8x512xf32>
    %107 = arith.addf %101, %106 : vector<8x512xf32>
    %c0_87 = arith.constant 0 : index
    %c128_88 = arith.constant 128 : index
    %108 = vector.load %arg18[%c0_87, %c128_88] : memref<16x768xf32, #tpu.memory_space<vmem>>, vector<16x512xf32>
    %109 = arith.truncf %108 : vector<16x512xf32> to vector<16x512xbf16>
    %c4_89 = arith.constant 4 : index
    %c0_90 = arith.constant 0 : index
    %c0_91 = arith.constant 0 : index
    %110 = vector.load %arg5[%c4_89, %c0_90, %c0_91] : memref<9x8x16xbf16, #tpu.memory_space<vmem>>, vector<1x8x16xbf16>
    %111 = vector.shape_cast %110 : vector<1x8x16xbf16> to vector<8x16xbf16>
    %cst_92 = arith.constant dense<0.000000e+00> : vector<8x512xf32>
    %112 = tpu.matmul %111, %109, %cst_92 {dimension_numbers = #tpu.dot_dimension_numbers<[1], [0], [0], [1], [0, 0, 1, 1], [], []>} : vector<8x16xbf16>, vector<16x512xbf16>, vector<8x512xf32> -> vector<8x512xf32>
    %113 = arith.addf %107, %112 : vector<8x512xf32>
    %c0_93 = arith.constant 0 : index
    %c129_94 = arith.constant 129 : index
    %114 = vector.load %arg18[%c0_93, %c129_94] : memref<16x768xf32, #tpu.memory_space<vmem>>, vector<16x512xf32>
    %115 = arith.truncf %114 : vector<16x512xf32> to vector<16x512xbf16>
    %c5_95 = arith.constant 5 : index
    %c0_96 = arith.constant 0 : index
    %c0_97 = arith.constant 0 : index
    %116 = vector.load %arg5[%c5_95, %c0_96, %c0_97] : memref<9x8x16xbf16, #tpu.memory_space<vmem>>, vector<1x8x16xbf16>
    %117 = vector.shape_cast %116 : vector<1x8x16xbf16> to vector<8x16xbf16>
    %cst_98 = arith.constant dense<0.000000e+00> : vector<8x512xf32>
    %118 = tpu.matmul %117, %115, %cst_98 {dimension_numbers = #tpu.dot_dimension_numbers<[1], [0], [0], [1], [0, 0, 1, 1], [], []>} : vector<8x16xbf16>, vector<16x512xbf16>, vector<8x512xf32> -> vector<8x512xf32>
    %119 = arith.addf %113, %118 : vector<8x512xf32>
    %c0_99 = arith.constant 0 : index
    %c143_100 = arith.constant 143 : index
    %120 = vector.load %arg18[%c0_99, %c143_100] : memref<16x768xf32, #tpu.memory_space<vmem>>, vector<16x512xf32>
    %121 = arith.truncf %120 : vector<16x512xf32> to vector<16x512xbf16>
    %c6_101 = arith.constant 6 : index
    %c0_102 = arith.constant 0 : index
    %c0_103 = arith.constant 0 : index
    %122 = vector.load %arg5[%c6_101, %c0_102, %c0_103] : memref<9x8x16xbf16, #tpu.memory_space<vmem>>, vector<1x8x16xbf16>
    %123 = vector.shape_cast %122 : vector<1x8x16xbf16> to vector<8x16xbf16>
    %cst_104 = arith.constant dense<0.000000e+00> : vector<8x512xf32>
    %124 = tpu.matmul %123, %121, %cst_104 {dimension_numbers = #tpu.dot_dimension_numbers<[1], [0], [0], [1], [0, 0, 1, 1], [], []>} : vector<8x16xbf16>, vector<16x512xbf16>, vector<8x512xf32> -> vector<8x512xf32>
    %125 = arith.addf %119, %124 : vector<8x512xf32>
    %c0_105 = arith.constant 0 : index
    %c144_106 = arith.constant 144 : index
    %126 = vector.load %arg18[%c0_105, %c144_106] : memref<16x768xf32, #tpu.memory_space<vmem>>, vector<16x512xf32>
    %127 = arith.truncf %126 : vector<16x512xf32> to vector<16x512xbf16>
    %c7_107 = arith.constant 7 : index
    %c0_108 = arith.constant 0 : index
    %c0_109 = arith.constant 0 : index
    %128 = vector.load %arg5[%c7_107, %c0_108, %c0_109] : memref<9x8x16xbf16, #tpu.memory_space<vmem>>, vector<1x8x16xbf16>
    %129 = vector.shape_cast %128 : vector<1x8x16xbf16> to vector<8x16xbf16>
    %cst_110 = arith.constant dense<0.000000e+00> : vector<8x512xf32>
    %130 = tpu.matmul %129, %127, %cst_110 {dimension_numbers = #tpu.dot_dimension_numbers<[1], [0], [0], [1], [0, 0, 1, 1], [], []>} : vector<8x16xbf16>, vector<16x512xbf16>, vector<8x512xf32> -> vector<8x512xf32>
    %131 = arith.addf %125, %130 : vector<8x512xf32>
    %c0_111 = arith.constant 0 : index
    %c145_112 = arith.constant 145 : index
    %132 = vector.load %arg18[%c0_111, %c145_112] : memref<16x768xf32, #tpu.memory_space<vmem>>, vector<16x512xf32>
    %133 = arith.truncf %132 : vector<16x512xf32> to vector<16x512xbf16>
    %c8_113 = arith.constant 8 : index
    %c0_114 = arith.constant 0 : index
    %c0_115 = arith.constant 0 : index
    %134 = vector.load %arg5[%c8_113, %c0_114, %c0_115] : memref<9x8x16xbf16, #tpu.memory_space<vmem>>, vector<1x8x16xbf16>
    %135 = vector.shape_cast %134 : vector<1x8x16xbf16> to vector<8x16xbf16>
    %cst_116 = arith.constant dense<0.000000e+00> : vector<8x512xf32>
    %136 = tpu.matmul %135, %133, %cst_116 {dimension_numbers = #tpu.dot_dimension_numbers<[1], [0], [0], [1], [0, 0, 1, 1], [], []>} : vector<8x16xbf16>, vector<16x512xbf16>, vector<8x512xf32> -> vector<8x512xf32>
    %137 = arith.addf %131, %136 : vector<8x512xf32>
    %cst_117 = arith.constant dense<0.000000e+00> : vector<8xf32>
    %138 = vector.multi_reduction <add>, %137, %cst_117 [1] : vector<8x512xf32> to vector<8xf32>
    %139 = vector.shape_cast %138 : vector<8xf32> to vector<8x1xf32>
    %cst_118 = arith.constant 0.00347222225 : f32
    %140 = vector.broadcast %cst_118 : f32 to vector<8x1xf32>
    %141 = arith.mulf %139, %140 : vector<8x1xf32>
    %142 = arith.mulf %137, %137 : vector<8x512xf32>
    %cst_119 = arith.constant dense<0.000000e+00> : vector<8xf32>
    %143 = vector.multi_reduction <add>, %142, %cst_119 [1] : vector<8x512xf32> to vector<8xf32>
    %144 = vector.shape_cast %143 : vector<8xf32> to vector<8x1xf32>
    %cst_120 = arith.constant 0.00347222225 : f32
    %145 = vector.broadcast %cst_120 : f32 to vector<8x1xf32>
    %146 = arith.mulf %144, %145 : vector<8x1xf32>
    %147 = arith.mulf %141, %141 : vector<8x1xf32>
    %148 = arith.subf %146, %147 : vector<8x1xf32>
    %149 = vector.broadcast %141 : vector<8x1xf32> to vector<8x512xf32>
    %150 = arith.subf %137, %149 : vector<8x512xf32>
    %cst_121 = arith.constant 9.99999974E-6 : f32
    %151 = vector.broadcast %cst_121 : f32 to vector<8x1xf32>
    %152 = arith.addf %148, %151 : vector<8x1xf32>
    %153 = math.rsqrt %152 : vector<8x1xf32>
    %154 = vector.broadcast %153 : vector<8x1xf32> to vector<8x512xf32>
    %155 = arith.mulf %150, %154 : vector<8x512xf32>
    %156 = vector.broadcast %80 : vector<8x1xf32> to vector<8x512xf32>
    %157 = arith.mulf %155, %156 : vector<8x512xf32>
    %158 = vector.broadcast %81 : vector<8x1xf32> to vector<8x512xf32>
    %159 = arith.addf %157, %158 : vector<8x512xf32>
    %cst_122 = arith.constant 0.000000e+00 : f32
    %160 = vector.broadcast %cst_122 : f32 to vector<8x512xf32>
    %161 = arith.maximumf %159, %160 : vector<8x512xf32>
    %162 = vector.broadcast %82 : vector<1x512xf32> to vector<8x512xf32>
    %163 = arith.mulf %161, %162 : vector<8x512xf32>
    %c0_123 = arith.constant 0 : index
    %c128_124 = arith.constant 128 : index
    %164 = vector.load %arg18[%c0_123, %c128_124] : memref<16x768xf32, #tpu.memory_space<vmem>>, vector<8x512xf32>
    tpu.vector_store %arg18[%c0_123, %c128_124], %163 {strides = array<i32>} : memref<16x768xf32, #tpu.memory_space<vmem>>, vector<8x512xf32>,
    %c0_125 = arith.constant 0 : index
    %c128_126 = arith.constant 128 : index
    %165 = vector.load %arg18[%c0_125, %c128_126] : memref<16x768xf32, #tpu.memory_space<vmem>>, vector<8x512xf32>
    %c0_127 = arith.constant 0 : index
    %c129_128 = arith.constant 129 : index
    %166 = vector.load %arg18[%c0_127, %c129_128] : memref<16x768xf32, #tpu.memory_space<vmem>>, vector<8x512xf32>
    %c0_129 = arith.constant 0 : index
    %c144_130 = arith.constant 144 : index
    %167 = vector.load %arg18[%c0_129, %c144_130] : memref<16x768xf32, #tpu.memory_space<vmem>>, vector<8x512xf32>
    %c0_131 = arith.constant 0 : index
    %c145_132 = arith.constant 145 : index
    %168 = vector.load %arg18[%c0_131, %c145_132] : memref<16x768xf32, #tpu.memory_space<vmem>>, vector<8x512xf32>
    %169 = arith.maximumf %165, %166 : vector<8x512xf32>
    %170 = arith.maximumf %167, %168 : vector<8x512xf32>
    %171 = arith.maximumf %169, %170 : vector<8x512xf32>
    %c0_133 = arith.constant 0 : index
    %c0_134 = arith.constant 0 : index
    %172 = vector.load %arg9[%c0_133, %c0_134] : memref<512x338xf32, #tpu.memory_space<vmem>>, vector<512x338xf32>
    %cst_135 = arith.constant dense<0.000000e+00> : vector<8x338xf32>
    %173 = tpu.matmul %171, %172, %cst_135 {dimension_numbers = #tpu.dot_dimension_numbers<[1], [0], [0], [1], [0, 0, 1, 1], [], []>} : vector<8x512xf32>, vector<512x338xf32>, vector<8x338xf32> -> vector<8x338xf32>
    %c0_136 = arith.constant 0 : index
    %c128_137 = arith.constant 128 : index
    %174 = vector.load %arg19[%c0_136, %c128_137] : memref<8x594xf32, #tpu.memory_space<vmem>>, vector<8x338xf32>
    tpu.vector_store %arg19[%c0_136, %c128_137], %173 {strides = array<i32>} : memref<8x594xf32, #tpu.memory_space<vmem>>, vector<8x338xf32>,
    %c0_138 = arith.constant 0 : index
    %c0_139 = arith.constant 0 : index
    %175 = vector.load %arg11[%c0_138, %c0_139] : memref<4x1xf32, #tpu.memory_space<vmem>>, vector<4x1xf32>
    %c0_140 = arith.constant 0 : index
    %c0_141 = arith.constant 0 : index
    %176 = vector.load %arg12[%c0_140, %c0_141] : memref<4x1xf32, #tpu.memory_space<vmem>>, vector<4x1xf32>
    %c0_142 = arith.constant 0 : index
    %c0_143 = arith.constant 0 : index
    %177 = vector.load %arg13[%c0_142, %c0_143] : memref<1x338xf32, #tpu.memory_space<vmem>>, vector<1x338xf32>
    %cst_144 = arith.constant 0.000000e+00 : f32
    %178 = vector.broadcast %cst_144 : f32 to vector<4x338xf32>
    %c0_145 = arith.constant 0 : index
    %c114 = arith.constant 114 : index
    %179 = vector.load %arg19[%c0_145, %c114] : memref<8x594xf32, #tpu.memory_space<vmem>>, vector<8x338xf32>
    %180 = arith.truncf %179 : vector<8x338xf32> to vector<8x338xbf16>
    %c0_146 = arith.constant 0 : index
    %c0_147 = arith.constant 0 : index
    %c0_148 = arith.constant 0 : index
    %181 = vector.load %arg10[%c0_146, %c0_147, %c0_148] : memref<9x4x8xbf16, #tpu.memory_space<vmem>>, vector<1x4x8xbf16>
    %182 = vector.shape_cast %181 : vector<1x4x8xbf16> to vector<4x8xbf16>
    %cst_149 = arith.constant dense<0.000000e+00> : vector<4x338xf32>
    %183 = tpu.matmul %182, %180, %cst_149 {dimension_numbers = #tpu.dot_dimension_numbers<[1], [0], [0], [1], [0, 0, 1, 1], [], []>} : vector<4x8xbf16>, vector<8x338xbf16>, vector<4x338xf32> -> vector<4x338xf32>
    %184 = arith.addf %178, %183 : vector<4x338xf32>
    %c0_150 = arith.constant 0 : index
    %c115 = arith.constant 115 : index
    %185 = vector.load %arg19[%c0_150, %c115] : memref<8x594xf32, #tpu.memory_space<vmem>>, vector<8x338xf32>
    %186 = arith.truncf %185 : vector<8x338xf32> to vector<8x338xbf16>
    %c1_151 = arith.constant 1 : index
    %c0_152 = arith.constant 0 : index
    %c0_153 = arith.constant 0 : index
    %187 = vector.load %arg10[%c1_151, %c0_152, %c0_153] : memref<9x4x8xbf16, #tpu.memory_space<vmem>>, vector<1x4x8xbf16>
    %188 = vector.shape_cast %187 : vector<1x4x8xbf16> to vector<4x8xbf16>
    %cst_154 = arith.constant dense<0.000000e+00> : vector<4x338xf32>
    %189 = tpu.matmul %188, %186, %cst_154 {dimension_numbers = #tpu.dot_dimension_numbers<[1], [0], [0], [1], [0, 0, 1, 1], [], []>} : vector<4x8xbf16>, vector<8x338xbf16>, vector<4x338xf32> -> vector<4x338xf32>
    %190 = arith.addf %184, %189 : vector<4x338xf32>
    %c0_155 = arith.constant 0 : index
    %c116 = arith.constant 116 : index
    %191 = vector.load %arg19[%c0_155, %c116] : memref<8x594xf32, #tpu.memory_space<vmem>>, vector<8x338xf32>
    %192 = arith.truncf %191 : vector<8x338xf32> to vector<8x338xbf16>
    %c2_156 = arith.constant 2 : index
    %c0_157 = arith.constant 0 : index
    %c0_158 = arith.constant 0 : index
    %193 = vector.load %arg10[%c2_156, %c0_157, %c0_158] : memref<9x4x8xbf16, #tpu.memory_space<vmem>>, vector<1x4x8xbf16>
    %194 = vector.shape_cast %193 : vector<1x4x8xbf16> to vector<4x8xbf16>
    %cst_159 = arith.constant dense<0.000000e+00> : vector<4x338xf32>
    %195 = tpu.matmul %194, %192, %cst_159 {dimension_numbers = #tpu.dot_dimension_numbers<[1], [0], [0], [1], [0, 0, 1, 1], [], []>} : vector<4x8xbf16>, vector<8x338xbf16>, vector<4x338xf32> -> vector<4x338xf32>
    %196 = arith.addf %190, %195 : vector<4x338xf32>
    %c0_160 = arith.constant 0 : index
    %c127_161 = arith.constant 127 : index
    %197 = vector.load %arg19[%c0_160, %c127_161] : memref<8x594xf32, #tpu.memory_space<vmem>>, vector<8x338xf32>
    %198 = arith.truncf %197 : vector<8x338xf32> to vector<8x338xbf16>
    %c3_162 = arith.constant 3 : index
    %c0_163 = arith.constant 0 : index
    %c0_164 = arith.constant 0 : index
    %199 = vector.load %arg10[%c3_162, %c0_163, %c0_164] : memref<9x4x8xbf16, #tpu.memory_space<vmem>>, vector<1x4x8xbf16>
    %200 = vector.shape_cast %199 : vector<1x4x8xbf16> to vector<4x8xbf16>
    %cst_165 = arith.constant dense<0.000000e+00> : vector<4x338xf32>
    %201 = tpu.matmul %200, %198, %cst_165 {dimension_numbers = #tpu.dot_dimension_numbers<[1], [0], [0], [1], [0, 0, 1, 1], [], []>} : vector<4x8xbf16>, vector<8x338xbf16>, vector<4x338xf32> -> vector<4x338xf32>
    %202 = arith.addf %196, %201 : vector<4x338xf32>
    %c0_166 = arith.constant 0 : index
    %c128_167 = arith.constant 128 : index
    %203 = vector.load %arg19[%c0_166, %c128_167] : memref<8x594xf32, #tpu.memory_space<vmem>>, vector<8x338xf32>
    %204 = arith.truncf %203 : vector<8x338xf32> to vector<8x338xbf16>
    %c4_168 = arith.constant 4 : index
    %c0_169 = arith.constant 0 : index
    %c0_170 = arith.constant 0 : index
    %205 = vector.load %arg10[%c4_168, %c0_169, %c0_170] : memref<9x4x8xbf16, #tpu.memory_space<vmem>>, vector<1x4x8xbf16>
    %206 = vector.shape_cast %205 : vector<1x4x8xbf16> to vector<4x8xbf16>
    %cst_171 = arith.constant dense<0.000000e+00> : vector<4x338xf32>
    %207 = tpu.matmul %206, %204, %cst_171 {dimension_numbers = #tpu.dot_dimension_numbers<[1], [0], [0], [1], [0, 0, 1, 1], [], []>} : vector<4x8xbf16>, vector<8x338xbf16>, vector<4x338xf32> -> vector<4x338xf32>
    %208 = arith.addf %202, %207 : vector<4x338xf32>
    %c0_172 = arith.constant 0 : index
    %c129_173 = arith.constant 129 : index
    %209 = vector.load %arg19[%c0_172, %c129_173] : memref<8x594xf32, #tpu.memory_space<vmem>>, vector<8x338xf32>
    %210 = arith.truncf %209 : vector<8x338xf32> to vector<8x338xbf16>
    %c5_174 = arith.constant 5 : index
    %c0_175 = arith.constant 0 : index
    %c0_176 = arith.constant 0 : index
    %211 = vector.load %arg10[%c5_174, %c0_175, %c0_176] : memref<9x4x8xbf16, #tpu.memory_space<vmem>>, vector<1x4x8xbf16>
    %212 = vector.shape_cast %211 : vector<1x4x8xbf16> to vector<4x8xbf16>
    %cst_177 = arith.constant dense<0.000000e+00> : vector<4x338xf32>
    %213 = tpu.matmul %212, %210, %cst_177 {dimension_numbers = #tpu.dot_dimension_numbers<[1], [0], [0], [1], [0, 0, 1, 1], [], []>} : vector<4x8xbf16>, vector<8x338xbf16>, vector<4x338xf32> -> vector<4x338xf32>
    %214 = arith.addf %208, %213 : vector<4x338xf32>
    %c0_178 = arith.constant 0 : index
    %c140 = arith.constant 140 : index
    %215 = vector.load %arg19[%c0_178, %c140] : memref<8x594xf32, #tpu.memory_space<vmem>>, vector<8x338xf32>
    %216 = arith.truncf %215 : vector<8x338xf32> to vector<8x338xbf16>
    %c6_179 = arith.constant 6 : index
    %c0_180 = arith.constant 0 : index
    %c0_181 = arith.constant 0 : index
    %217 = vector.load %arg10[%c6_179, %c0_180, %c0_181] : memref<9x4x8xbf16, #tpu.memory_space<vmem>>, vector<1x4x8xbf16>
    %218 = vector.shape_cast %217 : vector<1x4x8xbf16> to vector<4x8xbf16>
    %cst_182 = arith.constant dense<0.000000e+00> : vector<4x338xf32>
    %219 = tpu.matmul %218, %216, %cst_182 {dimension_numbers = #tpu.dot_dimension_numbers<[1], [0], [0], [1], [0, 0, 1, 1], [], []>} : vector<4x8xbf16>, vector<8x338xbf16>, vector<4x338xf32> -> vector<4x338xf32>
    %220 = arith.addf %214, %219 : vector<4x338xf32>
    %c0_183 = arith.constant 0 : index
    %c141 = arith.constant 141 : index
    %221 = vector.load %arg19[%c0_183, %c141] : memref<8x594xf32, #tpu.memory_space<vmem>>, vector<8x338xf32>
    %222 = arith.truncf %221 : vector<8x338xf32> to vector<8x338xbf16>
    %c7_184 = arith.constant 7 : index
    %c0_185 = arith.constant 0 : index
    %c0_186 = arith.constant 0 : index
    %223 = vector.load %arg10[%c7_184, %c0_185, %c0_186] : memref<9x4x8xbf16, #tpu.memory_space<vmem>>, vector<1x4x8xbf16>
    %224 = vector.shape_cast %223 : vector<1x4x8xbf16> to vector<4x8xbf16>
    %cst_187 = arith.constant dense<0.000000e+00> : vector<4x338xf32>
    %225 = tpu.matmul %224, %222, %cst_187 {dimension_numbers = #tpu.dot_dimension_numbers<[1], [0], [0], [1], [0, 0, 1, 1], [], []>} : vector<4x8xbf16>, vector<8x338xbf16>, vector<4x338xf32> -> vector<4x338xf32>
    %226 = arith.addf %220, %225 : vector<4x338xf32>
    %c0_188 = arith.constant 0 : index
    %c142 = arith.constant 142 : index
    %227 = vector.load %arg19[%c0_188, %c142] : memref<8x594xf32, #tpu.memory_space<vmem>>, vector<8x338xf32>
    %228 = arith.truncf %227 : vector<8x338xf32> to vector<8x338xbf16>
    %c8_189 = arith.constant 8 : index
    %c0_190 = arith.constant 0 : index
    %c0_191 = arith.constant 0 : index
    %229 = vector.load %arg10[%c8_189, %c0_190, %c0_191] : memref<9x4x8xbf16, #tpu.memory_space<vmem>>, vector<1x4x8xbf16>
    %230 = vector.shape_cast %229 : vector<1x4x8xbf16> to vector<4x8xbf16>
    %cst_192 = arith.constant dense<0.000000e+00> : vector<4x338xf32>
    %231 = tpu.matmul %230, %228, %cst_192 {dimension_numbers = #tpu.dot_dimension_numbers<[1], [0], [0], [1], [0, 0, 1, 1], [], []>} : vector<4x8xbf16>, vector<8x338xbf16>, vector<4x338xf32> -> vector<4x338xf32>
    %232 = arith.addf %226, %231 : vector<4x338xf32>
    %cst_193 = arith.constant dense<0.000000e+00> : vector<4xf32>
    %233 = vector.multi_reduction <add>, %232, %cst_193 [1] : vector<4x338xf32> to vector<4xf32>
    %234 = vector.shape_cast %233 : vector<4xf32> to vector<4x1xf32>
    %cst_194 = arith.constant 0.00617283955 : f32
    %235 = vector.broadcast %cst_194 : f32 to vector<4x1xf32>
    %236 = arith.mulf %234, %235 : vector<4x1xf32>
    %237 = arith.mulf %232, %232 : vector<4x338xf32>
    %cst_195 = arith.constant dense<0.000000e+00> : vector<4xf32>
    %238 = vector.multi_reduction <add>, %237, %cst_195 [1] : vector<4x338xf32> to vector<4xf32>
    %239 = vector.shape_cast %238 : vector<4xf32> to vector<4x1xf32>
    %cst_196 = arith.constant 0.00617283955 : f32
    %240 = vector.broadcast %cst_196 : f32 to vector<4x1xf32>
    %241 = arith.mulf %239, %240 : vector<4x1xf32>
    %242 = arith.mulf %236, %236 : vector<4x1xf32>
    %243 = arith.subf %241, %242 : vector<4x1xf32>
    %244 = vector.broadcast %236 : vector<4x1xf32> to vector<4x338xf32>
    %245 = arith.subf %232, %244 : vector<4x338xf32>
    %cst_197 = arith.constant 9.99999974E-6 : f32
    %246 = vector.broadcast %cst_197 : f32 to vector<4x1xf32>
    %247 = arith.addf %243, %246 : vector<4x1xf32>
    %248 = math.rsqrt %247 : vector<4x1xf32>
    %249 = vector.broadcast %248 : vector<4x1xf32> to vector<4x338xf32>
    %250 = arith.mulf %245, %249 : vector<4x338xf32>
    %251 = vector.broadcast %175 : vector<4x1xf32> to vector<4x338xf32>
    %252 = arith.mulf %250, %251 : vector<4x338xf32>
    %253 = vector.broadcast %176 : vector<4x1xf32> to vector<4x338xf32>
    %254 = arith.addf %252, %253 : vector<4x338xf32>
    %cst_198 = arith.constant 0.000000e+00 : f32
    %255 = vector.broadcast %cst_198 : f32 to vector<4x338xf32>
    %256 = arith.maximumf %254, %255 : vector<4x338xf32>
    %257 = vector.broadcast %177 : vector<1x338xf32> to vector<4x338xf32>
    %258 = arith.mulf %256, %257 : vector<4x338xf32>
    %c0_199 = arith.constant 0 : index
    %c128_200 = arith.constant 128 : index
    %259 = vector.load %arg19[%c0_199, %c128_200] : memref<8x594xf32, #tpu.memory_space<vmem>>, vector<4x338xf32>
    tpu.vector_store %arg19[%c0_199, %c128_200], %258 {strides = array<i32>} : memref<8x594xf32, #tpu.memory_space<vmem>>, vector<4x338xf32>,
    %c0_201 = arith.constant 0 : index
    %c128_202 = arith.constant 128 : index
    %260 = vector.load %arg19[%c0_201, %c128_202] : memref<8x594xf32, #tpu.memory_space<vmem>>, vector<4x338xf32>
    %c0_203 = arith.constant 0 : index
    %c129_204 = arith.constant 129 : index
    %261 = vector.load %arg19[%c0_203, %c129_204] : memref<8x594xf32, #tpu.memory_space<vmem>>, vector<4x338xf32>
    %c0_205 = arith.constant 0 : index
    %c141_206 = arith.constant 141 : index
    %262 = vector.load %arg19[%c0_205, %c141_206] : memref<8x594xf32, #tpu.memory_space<vmem>>, vector<4x338xf32>
    %c0_207 = arith.constant 0 : index
    %c142_208 = arith.constant 142 : index
    %263 = vector.load %arg19[%c0_207, %c142_208] : memref<8x594xf32, #tpu.memory_space<vmem>>, vector<4x338xf32>
    %264 = arith.addf %260, %261 : vector<4x338xf32>
    %265 = arith.addf %264, %262 : vector<4x338xf32>
    %266 = arith.addf %265, %263 : vector<4x338xf32>
    %cst_209 = arith.constant 2.500000e-01 : f32
    %267 = vector.broadcast %cst_209 : f32 to vector<4x338xf32>
    %268 = arith.mulf %266, %267 : vector<4x338xf32>
    %c0_210 = arith.constant 0 : index
    %c0_211 = arith.constant 0 : index
    %269 = vector.load %arg14[%c0_210, %c0_211] : memref<338x256xf32, #tpu.memory_space<vmem>>, vector<338x256xf32>
    %cst_212 = arith.constant dense<0.000000e+00> : vector<4x256xf32>
    %270 = tpu.matmul %268, %269, %cst_212 {dimension_numbers = #tpu.dot_dimension_numbers<[1], [0], [0], [1], [0, 0, 1, 1], [], []>} : vector<4x338xf32>, vector<338x256xf32>, vector<4x256xf32> -> vector<4x256xf32>
    %c0_213 = arith.constant 0 : index
    %c0_214 = arith.constant 0 : index
    %271 = vector.load %arg16[%c0_213, %c0_214] : memref<1x10xf32, #tpu.memory_space<vmem>>, vector<1x10xf32>
    %272 = vector.extract_strided_slice %270 {offsets = [0, 0], sizes = [4, 25], strides = [1, 1]} : vector<4x256xf32> to vector<4x25xf32>
    %273 = vector.extract_strided_slice %272 {offsets = [0, 0], sizes = [1, 25], strides = [1, 1]} : vector<4x25xf32> to vector<1x25xf32>
    %c0_215 = arith.constant 0 : index
    %c0_216 = arith.constant 0 : index
    %c0_217 = arith.constant 0 : index
    %274 = vector.load %arg15[%c0_215, %c0_216, %c0_217] : memref<4x25x10xf32, #tpu.memory_space<vmem>>, vector<1x25x10xf32>
    %275 = vector.shape_cast %274 : vector<1x25x10xf32> to vector<25x10xf32>
    %cst_218 = arith.constant dense<0.000000e+00> : vector<1x10xf32>
    %276 = tpu.matmul %273, %275, %cst_218 {dimension_numbers = #tpu.dot_dimension_numbers<[1], [0], [0], [1], [0, 0, 1, 1], [], []>} : vector<1x25xf32>, vector<25x10xf32>, vector<1x10xf32> -> vector<1x10xf32>
    %277 = arith.addf %271, %276 : vector<1x10xf32>
    %278 = vector.extract_strided_slice %272 {offsets = [1, 0], sizes = [1, 25], strides = [1, 1]} : vector<4x25xf32> to vector<1x25xf32>
    %c1_219 = arith.constant 1 : index
    %c0_220 = arith.constant 0 : index
    %c0_221 = arith.constant 0 : index
    %279 = vector.load %arg15[%c1_219, %c0_220, %c0_221] : memref<4x25x10xf32, #tpu.memory_space<vmem>>, vector<1x25x10xf32>
    %280 = vector.shape_cast %279 : vector<1x25x10xf32> to vector<25x10xf32>
    %cst_222 = arith.constant dense<0.000000e+00> : vector<1x10xf32>
    %281 = tpu.matmul %278, %280, %cst_222 {dimension_numbers = #tpu.dot_dimension_numbers<[1], [0], [0], [1], [0, 0, 1, 1], [], []>} : vector<1x25xf32>, vector<25x10xf32>, vector<1x10xf32> -> vector<1x10xf32>
    %282 = arith.addf %277, %281 : vector<1x10xf32>
    %283 = vector.extract_strided_slice %272 {offsets = [2, 0], sizes = [1, 25], strides = [1, 1]} : vector<4x25xf32> to vector<1x25xf32>
    %c2_223 = arith.constant 2 : index
    %c0_224 = arith.constant 0 : index
    %c0_225 = arith.constant 0 : index
    %284 = vector.load %arg15[%c2_223, %c0_224, %c0_225] : memref<4x25x10xf32, #tpu.memory_space<vmem>>, vector<1x25x10xf32>
    %285 = vector.shape_cast %284 : vector<1x25x10xf32> to vector<25x10xf32>
    %cst_226 = arith.constant dense<0.000000e+00> : vector<1x10xf32>
    %286 = tpu.matmul %283, %285, %cst_226 {dimension_numbers = #tpu.dot_dimension_numbers<[1], [0], [0], [1], [0, 0, 1, 1], [], []>} : vector<1x25xf32>, vector<25x10xf32>, vector<1x10xf32> -> vector<1x10xf32>
    %287 = arith.addf %282, %286 : vector<1x10xf32>
    %288 = vector.extract_strided_slice %272 {offsets = [3, 0], sizes = [1, 25], strides = [1, 1]} : vector<4x25xf32> to vector<1x25xf32>
    %c3_227 = arith.constant 3 : index
    %c0_228 = arith.constant 0 : index
    %c0_229 = arith.constant 0 : index
    %289 = vector.load %arg15[%c3_227, %c0_228, %c0_229] : memref<4x25x10xf32, #tpu.memory_space<vmem>>, vector<1x25x10xf32>
    %290 = vector.shape_cast %289 : vector<1x25x10xf32> to vector<25x10xf32>
    %cst_230 = arith.constant dense<0.000000e+00> : vector<1x10xf32>
    %291 = tpu.matmul %288, %290, %cst_230 {dimension_numbers = #tpu.dot_dimension_numbers<[1], [0], [0], [1], [0, 0, 1, 1], [], []>} : vector<1x25xf32>, vector<25x10xf32>, vector<1x10xf32> -> vector<1x10xf32>
    %292 = arith.addf %287, %291 : vector<1x10xf32>
    %cst_231 = arith.constant 0.000000e+00 : f32
    %293 = vector.broadcast %cst_231 : f32 to vector<1x10xf32>
    %294 = arith.maximumf %292, %293 : vector<1x10xf32>
    %c0_232 = arith.constant 0 : index
    %c0_233 = arith.constant 0 : index
    %295 = vector.load %arg17[%c0_232, %c0_233] : memref<2x10xf32, #tpu.memory_space<vmem>>, vector<1x10xf32>
    tpu.vector_store %arg17[%c0_232, %c0_233], %294 {strides = array<i32>} : memref<2x10xf32, #tpu.memory_space<vmem>>, vector<1x10xf32>,
    %296 = vector.extract_strided_slice %270 {offsets = [0, 128], sizes = [4, 25], strides = [1, 1]} : vector<4x256xf32> to vector<4x25xf32>
    %297 = vector.extract_strided_slice %296 {offsets = [0, 0], sizes = [1, 25], strides = [1, 1]} : vector<4x25xf32> to vector<1x25xf32>
    %c0_234 = arith.constant 0 : index
    %c0_235 = arith.constant 0 : index
    %c0_236 = arith.constant 0 : index
    %298 = vector.load %arg15[%c0_234, %c0_235, %c0_236] : memref<4x25x10xf32, #tpu.memory_space<vmem>>, vector<1x25x10xf32>
    %299 = vector.shape_cast %298 : vector<1x25x10xf32> to vector<25x10xf32>
    %cst_237 = arith.constant dense<0.000000e+00> : vector<1x10xf32>
    %300 = tpu.matmul %297, %299, %cst_237 {dimension_numbers = #tpu.dot_dimension_numbers<[1], [0], [0], [1], [0, 0, 1, 1], [], []>} : vector<1x25xf32>, vector<25x10xf32>, vector<1x10xf32> -> vector<1x10xf32>
    %301 = arith.addf %271, %300 : vector<1x10xf32>
    %302 = vector.extract_strided_slice %296 {offsets = [1, 0], sizes = [1, 25], strides = [1, 1]} : vector<4x25xf32> to vector<1x25xf32>
    %c1_238 = arith.constant 1 : index
    %c0_239 = arith.constant 0 : index
    %c0_240 = arith.constant 0 : index
    %303 = vector.load %arg15[%c1_238, %c0_239, %c0_240] : memref<4x25x10xf32, #tpu.memory_space<vmem>>, vector<1x25x10xf32>
    %304 = vector.shape_cast %303 : vector<1x25x10xf32> to vector<25x10xf32>
    %cst_241 = arith.constant dense<0.000000e+00> : vector<1x10xf32>
    %305 = tpu.matmul %302, %304, %cst_241 {dimension_numbers = #tpu.dot_dimension_numbers<[1], [0], [0], [1], [0, 0, 1, 1], [], []>} : vector<1x25xf32>, vector<25x10xf32>, vector<1x10xf32> -> vector<1x10xf32>
    %306 = arith.addf %301, %305 : vector<1x10xf32>
    %307 = vector.extract_strided_slice %296 {offsets = [2, 0], sizes = [1, 25], strides = [1, 1]} : vector<4x25xf32> to vector<1x25xf32>
    %c2_242 = arith.constant 2 : index
    %c0_243 = arith.constant 0 : index
    %c0_244 = arith.constant 0 : index
    %308 = vector.load %arg15[%c2_242, %c0_243, %c0_244] : memref<4x25x10xf32, #tpu.memory_space<vmem>>, vector<1x25x10xf32>
    %309 = vector.shape_cast %308 : vector<1x25x10xf32> to vector<25x10xf32>
    %cst_245 = arith.constant dense<0.000000e+00> : vector<1x10xf32>
    %310 = tpu.matmul %307, %309, %cst_245 {dimension_numbers = #tpu.dot_dimension_numbers<[1], [0], [0], [1], [0, 0, 1, 1], [], []>} : vector<1x25xf32>, vector<25x10xf32>, vector<1x10xf32> -> vector<1x10xf32>
    %311 = arith.addf %306, %310 : vector<1x10xf32>
    %312 = vector.extract_strided_slice %296 {offsets = [3, 0], sizes = [1, 25], strides = [1, 1]} : vector<4x25xf32> to vector<1x25xf32>
    %c3_246 = arith.constant 3 : index
    %c0_247 = arith.constant 0 : index
    %c0_248 = arith.constant 0 : index
    %313 = vector.load %arg15[%c3_246, %c0_247, %c0_248] : memref<4x25x10xf32, #tpu.memory_space<vmem>>, vector<1x25x10xf32>
    %314 = vector.shape_cast %313 : vector<1x25x10xf32> to vector<25x10xf32>
    %cst_249 = arith.constant dense<0.000000e+00> : vector<1x10xf32>
    %315 = tpu.matmul %312, %314, %cst_249 {dimension_numbers = #tpu.dot_dimension_numbers<[1], [0], [0], [1], [0, 0, 1, 1], [], []>} : vector<1x25xf32>, vector<25x10xf32>, vector<1x10xf32> -> vector<1x10xf32>
    %316 = arith.addf %311, %315 : vector<1x10xf32>
    %cst_250 = arith.constant 0.000000e+00 : f32
    %317 = vector.broadcast %cst_250 : f32 to vector<1x10xf32>
    %318 = arith.maximumf %316, %317 : vector<1x10xf32>
    %c1_251 = arith.constant 1 : index
    %c0_252 = arith.constant 0 : index
    %319 = vector.load %arg17[%c1_251, %c0_252] : memref<2x10xf32, #tpu.memory_space<vmem>>, vector<1x10xf32>
    tpu.vector_store %arg17[%c1_251, %c0_252], %318 {strides = array<i32>} : memref<2x10xf32, #tpu.memory_space<vmem>>, vector<1x10xf32>,
    return
  }
}

</mosaic_0001>

<bundles_post_ra>
// kernel: forward.1
= control target key start
LH: loop header
LB: loop body
LE: loop exit
PB: predicated region body
PF: predicated region fallthrough
CT: control target
= control target key end

     0   :  { %s8022_s0 = inlined_call_operand.vmem [shape: bf16[8,768], index: 0, kind: input, shape index: {}]   ;;  %s8023_s1 = inlined_call_operand.vmem [shape: bf16[9,16,8], index: 1, kind: input, shape index: {}]   ;;  %s8024_s2 = inlined_call_operand.vmem [shape: f32[16,1], index: 2, kind: input, shape index: {}]   ;;  %s8025_s3 = inlined_call_operand.vmem [shape: f32[16,1], index: 3, kind: input, shape index: {}]   ;;  %s8026_s4 = inlined_call_operand.vmem [shape: f32[1,512], index: 4, kind: input, shape index: {}]   ;;  %s8027_s5 = inlined_call_operand.vmem [shape: bf16[9,8,16], index: 5, kind: input, shape index: {}]   ;;  %s8028_s6 = inlined_call_operand.vmem [shape: f32[8,1], index: 6, kind: input, shape index: {}]   ;;  %s8029_s7 = inlined_call_operand.vmem [shape: f32[8,1], index: 7, kind: input, shape index: {}]   ;;  %s8030_s8 = inlined_call_operand.vmem [shape: f32[1,512], index: 8, kind: input, shape index: {}]   ;;  %s8031_s9 = inlined_call_operand.vmem [shape: f32[512,338], index: 9, kind: input, shape index: {}]   ;;  %s8032_s10 = inlined_call_operand.vmem [shape: bf16[9,4,8], index: 10, kind: input, shape index: {}]   ;;  %s8033_s11 = inlined_call_operand.vmem [shape: f32[4,1], index: 11, kind: input, shape index: {}]   ;;  %s8034_s12 = inlined_call_operand.vmem [shape: f32[4,1], index: 12, kind: input, shape index: {}]   ;;  %s8035_s13 = inlined_call_operand.vmem [shape: f32[1,338], index: 13, kind: input, shape index: {}]   ;;  %s8036_s14 = inlined_call_operand.vmem [shape: f32[338,256], index: 14, kind: input, shape index: {}]   ;;  %s8037_s15 = inlined_call_operand.vmem [shape: f32[4,25,10], index: 15, kind: input, shape index: {}]   ;;  %s8038_s16 = inlined_call_operand.vmem [shape: f32[1,10], index: 16, kind: input, shape index: {}]   ;;  %s8039_s17 = inlined_call_operand.hbm [shape: f32[2,10], index: 17, kind: output, shape index: {}]  }
   0x1   :  { %8042 = sst [smem:[#allocation7_spill]] %s8022_s0 }
   0x2   :  { %8043 = sst [smem:[#allocation8_spill]] %s8023_s1 }
   0x3   :  { %s8044_s26 = sld [smem:[#allocation7_spill]]  ;;  %s6127_s29 = smov 16   ;;  %v6128_v6 = vmov 0  }
   0x4   :  { %171 = vmatprep.mubr.bf16.mxu1 %v6128_v6  ;;  %292 = vmatprep.mubr.bf16.mxu0 %v6128_v6  ;;  %s6129_s18 = smov 17  }
   0x5   :  { %6053 = vset.pattern.permute.xlu1 %v6128_v6  ;;  %6054 = vset.pattern.permute.xlu0 %v6128_v6 }
   0x9   :  { %v82_v0 = vld [vmem:[%s8044_s26 + $0x8] sm:$0xff]  ;;  %v81_v1 = vld [vmem:[%s8044_s26] sm:$0xff]  ;;  %v6079_v7 = vld [vmem:[%s8044_s26 + $0x10] ss:$0 sps:$4 sm:$0xff]  }
   0xa   :  { %v5049_v2 = vcombine.low %v82_v0, %v82_v0  ;;  %v5047_v3 = vcombine.low %v81_v1, %v81_v1  ;;  %v5050_v4 = vcombine.high %v82_v0, %v82_v0  ;;  %v5048_v5 = vcombine.high %v81_v1, %v81_v1 }
   0xc   :  { %111 = vrot.lane.b32.xlu1 %v5049_v2, %s6127_s29  ;;  %107 = vrot.lane.b32.xlu0 %v5047_v3, %s6127_s29 }
  0x10   :  { %113 = vrot.lane.b32.xlu1 %v5050_v4, %s6127_s29  ;;  %109 = vrot.lane.b32.xlu0 %v5048_v5, %s6127_s29 }
  0x14   :  { %230 = vrot.lane.b32.xlu1 %v5047_v3, %s6129_s18  ;;  %115 = vrot.lane.b32.xlu0 %v6079_v7, %s6127_s29 }
  0x15   :  { %22 = vsyncpa [#allocation5], 0  ;;  %s6130_s19 = smov 15   ;;  %s6131_s1 = smov 1   ;;  %v739_v8 = vld [vmem:[%s8044_s26 + $0x4] sm:$0xff]  ;;  %v740_v11 = vld [vmem:[%s8044_s26 + $0xc] sm:$0xff] }
  0x16   :  { %v6273_v9 = vcombine.low %v739_v8, %v739_v8  ;;  %v6275_v10 = vcombine.high %v739_v8, %v739_v8  ;;  %s6132_s24 = smov 127   ;;  %v6284_v12 = vcombine.low %v740_v11, %v740_v11  ;;  %v6286_v13 = vcombine.high %v740_v11, %v740_v11  ;;  %v6084_v14 = vld [vmem:[%s8044_s26 + $0x14] ss:$0 sps:$4 sm:$0xff]   ;;  %s6133_s28 = smov 113  }
  0x17   :  { %s6134_s0 = smov 112   ;;  %s6135_s26 = smov 111   ;;  %vm117_vm0 = vcmask 130048   ;;  %vm126_vm1 = vcmask 1043456   ;;  %vm122_vm2 = vcmask 64512   ;;  %vm240_vm3 = vcmask 138240  }
  0x18   :  { %234 = vrot.lane.b32.xlu1 %v5049_v2, %s6129_s18  ;;  %232 = vrot.lane.b32.xlu0 %v5048_v5, %s6129_s18  ;;  %s8045_s21 = sld [smem:[#allocation8_spill]]  ;;  %vm364_vm4 = vcmask 121856   ;;  %vm496_vm5 = vcmask 7168   ;;  %v634_v63 = vsel %vm126_vm1, %v6273_v9, 0  ;;  %vm773_vm6 = vcmask 1039360  }
  0x19   :  { %vm905_vm7 = vcmask 924672   ;;  %vm1037_vm8 = vcmask 916480   ;;  %vm1169_vm9 = vcmask 908288   ;;  %vm74_vm10 = vcmask 670720  }
  0x1a   :  { %vm6139_vm11 = vmmov 0   ;;  %vm3063_vm12 = vcmask 105472   ;;  %vm3168_vm13 = vcmask 113664   ;;  %vm3275_vm14 = vcmask 97280  }
  0x1b   :  { %vm3910_vm15 = vcmask 932864  }
  0x1c   :  { %236 = vrot.lane.b32.xlu0 %v5050_v4, %s6129_s18  ;;  %238 = vrot.lane.b32.xlu1 %v6079_v7, %s6129_s18 }
  0x1e   :  { %v6085_v22 = vld [vmem:[%s8045_s21 + $0x8] sm:$0xff]   ;;  %v6086_v33 = vld [vmem:[%s8045_s21] sm:$0xff]   ;;  %v6087_v47 = vld [vmem:[%s8045_s21 + $0x10] sm:$0xff]  }
  0x1f   :  { %v6088_v61 = vld [vmem:[%s8045_s21 + $0x18] sm:$0xff]  }
  0x20   :  { %354 = vrot.lane.b32.xlu0 %v5047_v3, %s6130_s19  ;;  %356 = vrot.lane.b32.xlu1 %v5048_v5, %s6130_s19 }
  0x24   :  { %358 = vrot.lane.b32.xlu0 %v5049_v2, %s6130_s19  ;;  %360 = vrot.lane.b32.xlu1 %v5050_v4, %s6130_s19 }
  0x28   :  { %362 = vrot.lane.b32.xlu0 %v6079_v7, %s6130_s19  ;;  %486 = vrot.lane.b32.xlu1 %v5047_v3, %s6131_s1 }
  0x2c   :  { %490 = vrot.lane.b32.xlu1 %v5049_v2, %s6131_s1  ;;  %488 = vrot.lane.b32.xlu0 %v5048_v5, %s6131_s1 }
  0x30   :  { %494 = vrot.lane.b32.xlu1 %v6079_v7, %s6131_s1  ;;  %492 = vrot.lane.b32.xlu0 %v5050_v4, %s6131_s1 }
  0x34   :  { %763 = vrot.lane.b32.xlu0 %v6273_v9, %s6132_s24  ;;  %765 = vrot.lane.b32.xlu1 %v6275_v10, %s6132_s24 }
  0x38   :  { %767 = vrot.lane.b32.xlu0 %v6284_v12, %s6132_s24  ;;  %769 = vrot.lane.b32.xlu1 %v6286_v13, %s6132_s24 }
  0x3c   :  { %771 = vrot.lane.b32.xlu0 %v6084_v14, %s6132_s24  ;;  %895 = vrot.lane.b32.xlu1 %v6273_v9, %s6133_s28 }
  0x40   :  { %899 = vrot.lane.b32.xlu1 %v6284_v12, %s6133_s28  ;;  %897 = vrot.lane.b32.xlu0 %v6275_v10, %s6133_s28 }
  0x44   :  { %901 = vrot.lane.b32.xlu0 %v6286_v13, %s6133_s28  ;;  %903 = vrot.lane.b32.xlu1 %v6084_v14, %s6133_s28 }
  0x48   :  { %1027 = vrot.lane.b32.xlu0 %v6273_v9, %s6134_s0  ;;  %1029 = vrot.lane.b32.xlu1 %v6275_v10, %s6134_s0 }
  0x4c   :  { %1031 = vrot.lane.b32.xlu0 %v6284_v12, %s6134_s0  ;;  %1033 = vrot.lane.b32.xlu1 %v6286_v13, %s6134_s0 }
  0x50   :  { %1035 = vrot.lane.b32.xlu0 %v6084_v14, %s6134_s0  ;;  %1159 = vrot.lane.b32.xlu1 %v6273_v9, %s6135_s26  ;;  %v6089_v9 = vld [vmem:[%s8045_s21 + $0x20] sm:$0xff]  }
  0x54   :  { %1163 = vrot.lane.b32.xlu1 %v6284_v12, %s6135_s26  ;;  %1161 = vrot.lane.b32.xlu0 %v6275_v10, %s6135_s26 }
  0x58   :  { %1167 = vrot.lane.b32.xlu1 %v6084_v14, %s6135_s26  ;;  %1165 = vrot.lane.b32.xlu0 %v6286_v13, %s6135_s26 }
  0x7e   :  { %v112_v15 = vpop.permute.xlu1 %111  ;;  %v108_v16 = vpop.permute.xlu0 %107 }
  0x82   :  { %v114_v17 = vpop.permute.xlu1 %113  ;;  %v110_v18 = vpop.permute.xlu0 %109 }
  0x83   :  { %v119_v19 = vsel %vm117_vm0, %v110_v18, %v112_v15  ;;  %v118_v20 = vsel %vm117_vm0, %v108_v16, %v110_v18  ;;  %v120_v23 = vsel %vm117_vm0, %v112_v15, %v114_v17 }
  0x84   :  { %5052 = vmatprep.subr.msk.bf16.mxu1 %vm126_vm1, %v119_v19  ;;  %v128_v21 = vsel %vm126_vm1, %v118_v20, 0  ;;  %v134_v27 = vsel %vm126_vm1, %v120_v23, 0 }
  0x85   :  { %140 = vmatpush1.bf16.msra.mxu1 %v128_v21 }
  0x86   :  { %v231_v24 = vpop.permute.xlu1 %230  ;;  %v116_v25 = vpop.permute.xlu0 %115 }
  0x87   :  { %v121_v26 = vsel %vm117_vm0, %v114_v17, %v116_v25 }
  0x88   :  { %5053 = vmatmul.mubr.msk.bf16.vlgmr.msra.gmra.mrb[0].mxu1 %vm122_vm2, %v6085_v22  ;;  %5054 = vmatprep.subr.msk.bf16.mxu1 %vm126_vm1, %v121_v26 }
  0x89   :  { %183 = vmatpush1.bf16.msra.mxu1 %v134_v27  ;;  %214 = vmatprep.mubr.bf16.mxu1 %v6128_v6 }
  0x8a   :  { %v235_v28 = vpop.permute.xlu1 %234  ;;  %v233_v29 = vpop.permute.xlu0 %232 }
  0x8b   :  { %v242_v30 = vsel %vm240_vm3, %v233_v29, %v235_v28  ;;  %v241_v31 = vsel %vm240_vm3, %v231_v24, %v233_v29 }
  0x8c   :  { %5057 = vmatprep.subr.msk.bf16.mxu0 %vm126_vm1, %v242_v30  ;;  %v249_v32 = vsel %vm126_vm1, %v241_v31, 0 }
  0x8d   :  { %261 = vmatpush1.bf16.msra.mxu0 %v249_v32 }
  0x8e   :  { %v237_v34 = vpop.permute.xlu0 %236  ;;  %v239_v35 = vpop.permute.xlu1 %238 }
  0x8f   :  { %v243_v36 = vsel %vm240_vm3, %v235_v28, %v237_v34  ;;  %v244_v37 = vsel %vm240_vm3, %v237_v34, %v239_v35 }
  0x90   :  { %5055 = vmatmul.mubr.msk.bf16.vlgmr.msra.gmra.mrb[4].mxu1 %vm122_vm2, %v6085_v22  ;;  %5058 = vmatmul.mubr.msk.bf16.vlgmr.msra.gmra.mrb[0].mxu0 %vm122_vm2, %v6086_v33  ;;  %v255_v38 = vsel %vm126_vm1, %v243_v36, 0  ;;  %v6090_v22 = vld [vmem:[%s8045_s21 + $0x28] sm:$0xff]  }
  0x91   :  { %5059 = vmatprep.subr.msk.bf16.mxu1 %vm126_vm1, %v244_v37  ;;  %335 = vmatprep.mubr.bf16.mxu1 %v6128_v6 }
  0x92   :  { %v355_v39 = vpop.permute.xlu0 %354  ;;  %304 = vmatpush1.bf16.msra.mxu1 %v255_v38  ;;  %v357_v40 = vpop.permute.xlu1 %356  ;;  %416 = vmatprep.mubr.bf16.mxu0 %v6128_v6 }
  0x93   :  { %v365_v41 = vsel %vm364_vm4, %v355_v39, %v357_v40 }
  0x94   :  { %v373_v43 = vsel %vm126_vm1, %v365_v41, 0 }
  0x96   :  { %v359_v42 = vpop.permute.xlu0 %358  ;;  %v361_v44 = vpop.permute.xlu1 %360 }
  0x97   :  { %v366_v45 = vsel %vm364_vm4, %v357_v40, %v359_v42  ;;  %v367_v46 = vsel %vm364_vm4, %v359_v42, %v361_v44  ;;  %v6092_v42 = vld [vmem:[%s8045_s21 + $0x38] sm:$0xff]  }
  0x98   :  { %5064 = vmatprep.subr.msk.bf16.mxu0 %vm126_vm1, %v366_v45  ;;  %v379_v51 = vsel %vm126_vm1, %v367_v46, 0 }
  0x99   :  { %385 = vmatpush1.bf16.msra.mxu0 %v373_v43 }
  0x9a   :  { %v363_v48 = vpop.permute.xlu0 %362  ;;  %v487_v49 = vpop.permute.xlu1 %486 }
  0x9b   :  { %v368_v50 = vsel %vm364_vm4, %v361_v44, %v363_v48  ;;  %v76_v48 = vld [vmem:[%s8024_s2] sm:$0xff] }
  0x9c   :  { %5060 = vmatmul.mubr.msk.bf16.vlgmr.msra.gmra.mrb[4].mxu1 %vm122_vm2, %v6086_v33  ;;  %5065 = vmatmul.mubr.msk.bf16.vlgmr.msra.gmra.mrb[0].mxu0 %vm122_vm2, %v6087_v47  ;;  %v6091_v33 = vld [vmem:[%s8045_s21 + $0x30] sm:$0xff]  }
  0x9d   :  { %5066 = vmatprep.subr.msk.bf16.mxu1 %vm126_vm1, %v368_v50  ;;  %459 = vmatprep.mubr.bf16.mxu1 %v6128_v6  ;;  %v6093_v50 = vld [vmem:[%s8045_s21 + $0x40] sm:$0xff]  }
  0x9e   :  { %428 = vmatpush1.bf16.msra.mxu1 %v379_v51  ;;  %v491_v52 = vpop.permute.xlu1 %490  ;;  %v489_v53 = vpop.permute.xlu0 %488  ;;  %548 = vmatprep.mubr.bf16.mxu0 %v6128_v6 }
  0x9f   :  { %v497_v54 = vsel %vm496_vm5, %v487_v49, %v489_v53  ;;  %v498_v55 = vsel %vm496_vm5, %v489_v53, %v491_v52  ;;  %1341 = vperm.xlu1 %6053, %v76_v48  }
  0xa0   :  { %5071 = vmatprep.subr.msk.bf16.mxu0 %vm126_vm1, %v498_v55  ;;  %v505_v56 = vsel %vm126_vm1, %v497_v54, 0 }
  0xa1   :  { %517 = vmatpush1.bf16.msra.mxu0 %v505_v56 }
  0xa2   :  { %v495_v57 = vpop.permute.xlu1 %494  ;;  %v493_v58 = vpop.permute.xlu0 %492  ;;  %5082 = vmatprep.subr.msk.bf16.mxu0 %vm126_vm1, %v6275_v10  ;;  %v640_v10 = vsel %vm126_vm1, %v6284_v12, 0 }
  0xa3   :  { %v499_v59 = vsel %vm496_vm5, %v491_v52, %v493_v58  ;;  %v500_v60 = vsel %vm496_vm5, %v493_v58, %v495_v57 }
  0xa4   :  { %5073 = vmatprep.subr.msk.bf16.mxu1 %vm126_vm1, %v500_v60  ;;  %v511_v62 = vsel %vm126_vm1, %v499_v59, 0 }
  0xa6   :  { %v764_v0 = vpop.permute.xlu0 %763  ;;  %v766_v1 = vpop.permute.xlu1 %765 }
  0xa7   :  { %v774_v8 = vsel %vm773_vm6, %v764_v0, %v766_v1 }
  0xa8   :  { %5067 = vmatmul.mubr.msk.bf16.vlgmr.msra.gmra.mrb[4].mxu1 %vm122_vm2, %v6087_v47  ;;  %5072 = vmatmul.mubr.msk.bf16.vlgmr.msra.gmra.mrb[0].mxu0 %vm122_vm2, %v6088_v61  ;;  %v782_v11 = vsel %vm126_vm1, %v774_v8, 0 }
  0xa9   :  { %560 = vmatpush1.bf16.msra.mxu1 %v511_v62  ;;  %646 = vmatpush1.bf16.msra.mxu0 %v634_v63 }
  0xaa   :  { %591 = vmatprep.mubr.bf16.mxu1 %v6128_v6  ;;  %677 = vmatprep.mubr.bf16.mxu0 %v6128_v6  ;;  %v768_v2 = vpop.permute.xlu0 %767  ;;  %v770_v3 = vpop.permute.xlu1 %769 }
  0xab   :  { %5084 = vmatprep.subr.msk.bf16.mxu1 %vm126_vm1, %v6286_v13  ;;  %v775_v4 = vsel %vm773_vm6, %v766_v1, %v768_v2  ;;  %v776_v20 = vsel %vm773_vm6, %v768_v2, %v770_v3 }
  0xac   :  { %5094 = vmatprep.subr.msk.bf16.mxu0 %vm126_vm1, %v775_v4  ;;  %v788_v23 = vsel %vm126_vm1, %v776_v20, 0 }
  0xae   :  { %v772_v5 = vpop.permute.xlu0 %771  ;;  %v896_v7 = vpop.permute.xlu1 %895 }
  0xaf   :  { %v777_v15 = vsel %vm773_vm6, %v770_v3, %v772_v5 }
  0xb2   :  { %v900_v14 = vpop.permute.xlu1 %899  ;;  %v898_v13 = vpop.permute.xlu0 %897 }
  0xb3   :  { %v907_v16 = vsel %vm905_vm7, %v898_v13, %v900_v14  ;;  %v906_v21 = vsel %vm905_vm7, %v896_v7, %v898_v13 }
  0xb4   :  { %5074 = vmatmul.mubr.msk.bf16.vlgmr.msra.gmra.mrb[4].mxu1 %vm122_vm2, %v6088_v61  ;;  %5083 = vmatmul.mubr.msk.bf16.vlgmr.msra.gmra.mrb[0].mxu0 %vm122_vm2, %v6089_v9  ;;  %v914_v24 = vsel %vm126_vm1, %v906_v21, 0 }
  0xb5   :  { %689 = vmatpush1.bf16.msra.mxu1 %v640_v10  ;;  %794 = vmatpush1.bf16.msra.mxu0 %v782_v11 }
  0xb6   :  { %720 = vmatprep.mubr.bf16.mxu1 %v6128_v6  ;;  %825 = vmatprep.mubr.bf16.mxu0 %v6128_v6  ;;  %v902_v17 = vpop.permute.xlu0 %901  ;;  %v904_v12 = vpop.permute.xlu1 %903 }
  0xb7   :  { %5096 = vmatprep.subr.msk.bf16.mxu1 %vm126_vm1, %v777_v15  ;;  %5101 = vmatprep.subr.msk.bf16.mxu0 %vm126_vm1, %v907_v16  ;;  %v909_v27 = vsel %vm905_vm7, %v902_v17, %v904_v12  ;;  %v908_v31 = vsel %vm905_vm7, %v900_v14, %v902_v17 }
  0xb8   :  { %v920_v36 = vsel %vm126_vm1, %v908_v31, 0 }
  0xba   :  { %v1028_v18 = vpop.permute.xlu0 %1027  ;;  %v1030_v19 = vpop.permute.xlu1 %1029 }
  0xbb   :  { %v1038_v32 = vsel %vm1037_vm8, %v1028_v18, %v1030_v19 }
  0xbc   :  { %v1046_v37 = vsel %vm126_vm1, %v1038_v32, 0 }
  0xbe   :  { %v1032_v25 = vpop.permute.xlu0 %1031  ;;  %v1034_v26 = vpop.permute.xlu1 %1033 }
  0xbf   :  { %v1039_v28 = vsel %vm1037_vm8, %v1030_v19, %v1032_v25  ;;  %v1040_v40 = vsel %vm1037_vm8, %v1032_v25, %v1034_v26  ;;  %v78_v25 = vld [vmem:[%s8025_s3] sm:$0xff] }
  0xc0   :  { %5085 = vmatmul.mubr.msk.bf16.vlgmr.msra.gmra.mrb[4].mxu1 %vm122_vm2, %v6089_v9  ;;  %5095 = vmatmul.mubr.msk.bf16.vlgmr.msra.gmra.mrb[0].mxu0 %vm122_vm2, %v6090_v22  ;;  %v1052_v45 = vsel %vm126_vm1, %v1040_v40, 0 }
  0xc1   :  { %837 = vmatpush1.bf16.msra.mxu1 %v788_v23  ;;  %926 = vmatpush1.bf16.msra.mxu0 %v914_v24 }
  0xc2   :  { %868 = vmatprep.mubr.bf16.mxu1 %v6128_v6  ;;  %957 = vmatprep.mubr.bf16.mxu0 %v6128_v6  ;;  %v1036_v29 = vpop.permute.xlu0 %1035  ;;  %v1160_v30 = vpop.permute.xlu1 %1159 }
  0xc3   :  { %5103 = vmatprep.subr.msk.bf16.mxu1 %vm126_vm1, %v909_v27  ;;  %5108 = vmatprep.subr.msk.bf16.mxu0 %vm126_vm1, %v1039_v28  ;;  %v1041_v38 = vsel %vm1037_vm8, %v1034_v26, %v1036_v29  ;;  %v79_v26 = vld [vmem:[%s8025_s3 + $0x8] sm:$0xff]  ;;  %v6136_v28 = vmov 0.0|0.0  }
  0xc4   :  { %v77_v27 = vld [vmem:[%s8024_s2 + $0x8] sm:$0xff] }
  0xc6   :  { %v1164_v34 = vpop.permute.xlu1 %1163  ;;  %v1162_v35 = vpop.permute.xlu0 %1161 }
  0xc7   :  { %v1171_v39 = vsel %vm1169_vm9, %v1162_v35, %v1164_v34  ;;  %v1170_v41 = vsel %vm1169_vm9, %v1160_v30, %v1162_v35 }
  0xc8   :  { %v1178_v46 = vsel %vm126_vm1, %v1170_v41, 0 }
  0xca   :  { %v1168_v43 = vpop.permute.xlu1 %1167  ;;  %v1166_v44 = vpop.permute.xlu0 %1165 }
  0xcb   :  { %v1173_v47 = vsel %vm1169_vm9, %v1166_v44, %v1168_v43  ;;  %v1172_v49 = vsel %vm1169_vm9, %v1164_v34, %v1166_v44  ;;  %v1384_v44 = vlaneseq }
  0xcc   :  { %5097 = vmatmul.mubr.msk.bf16.vlgmr.msra.gmra.mrb[4].mxu1 %vm122_vm2, %v6090_v22  ;;  %5102 = vmatmul.mubr.msk.bf16.vlgmr.msra.gmra.mrb[0].mxu0 %vm122_vm2, %v6091_v33  ;;  %v1184_v51 = vsel %vm126_vm1, %v1172_v49, 0 }
  0xcd   :  { %969 = vmatpush1.bf16.msra.mxu1 %v920_v36  ;;  %1058 = vmatpush1.bf16.msra.mxu0 %v1046_v37 }
  0xce   :  { %1000 = vmatprep.mubr.bf16.mxu1 %v6128_v6  ;;  %1089 = vmatprep.mubr.bf16.mxu0 %v6128_v6 }
  0xcf   :  { %5110 = vmatprep.subr.msk.bf16.mxu1 %vm126_vm1, %v1041_v38  ;;  %5115 = vmatprep.subr.msk.bf16.mxu0 %vm126_vm1, %v1171_v39 }
  0xd8   :  { %5104 = vmatmul.mubr.msk.bf16.vlgmr.msra.gmra.mrb[4].mxu1 %vm122_vm2, %v6091_v33  ;;  %5109 = vmatmul.mubr.msk.bf16.vlgmr.msra.gmra.mrb[0].mxu0 %vm122_vm2, %v6092_v42 }
  0xd9   :  { %1101 = vmatpush1.bf16.msra.mxu1 %v1052_v45  ;;  %1190 = vmatpush1.bf16.msra.mxu0 %v1178_v46  ;;  %v6502_v45 = vshrl.u32 %v1384_v44, 7 }
  0xda   :  { %1132 = vmatprep.mubr.bf16.mxu1 %v6128_v6  ;;  %1221 = vmatprep.mubr.bf16.mxu0 %v6128_v6 }
  0xdb   :  { %5117 = vmatprep.subr.msk.bf16.mxu1 %vm126_vm1, %v1173_v47 }
  0xe4   :  { %5111 = vmatmul.mubr.msk.bf16.vlgmr.msra.gmra.mrb[4].mxu1 %vm122_vm2, %v6092_v42  ;;  %5116 = vmatmul.mubr.msk.bf16.vlgmr.msra.gmra.mrb[0].mxu0 %vm122_vm2, %v6093_v50 }
  0xe5   :  { %1233 = vmatpush1.bf16.msra.mxu1 %v1184_v51  ;;  %1264 = vmatprep.mubr.bf16.mxu1 %v6128_v6 }
  0xe6   :  { %1500 = vmatprep.mubr.bf16.mxu0 %v6128_v6 }
  0xf0   :  { %5118 = vmatmul.mubr.msk.bf16.vlgmr.msra.gmra.mrb[4].mxu1 %vm122_vm2, %v6093_v50 }
  0xf1   :  { %1541 = vmatprep.mubr.bf16.mxu1 %v6128_v6 }
 0x11e   :  { %v1342_v29 = vpop.permute.xlu1 %1341 }
 0x15b   :  { %v173_v52 = vpop.f32.mrb[0].mxu1 }
 0x15c   :  { %v175_v53 = vpop.f32.mrb[1].mxu1 }
 0x15d   :  { %v177_v54 = vpop.f32.mrb[2].mxu1 }
 0x15e   :  { %v179_v55 = vpop.f32.mrb[3].mxu1 }
 0x1b7   :  { %v1223_v56 = vpop.f32.mrb[0].mxu0 }
 0x1b8   :  { %v6461_v57 = vadd.f32 %v1223_v56, %v173_v52  ;;  %v1225_v58 = vpop.f32.mrb[1].mxu0  ;;  %v6510_v56 = vsub.s32 1, %v6502_v45 }
 0x1b9   :  { %v6463_v59 = vadd.f32 %v1225_v58, %v175_v53  ;;  %v1227_v60 = vpop.f32.mrb[2].mxu0  ;;  %v6513_v58 = vsub.s32 2, %v6502_v45 }
 0x1ba   :  { %v6465_v61 = vadd.f32 %v1227_v60, %v177_v54  ;;  %v1229_v62 = vpop.f32.mrb[3].mxu0  ;;  %v1295_v0 = vmul.f32 %v6461_v57, %v6461_v57 }
 0x1bb   :  { %v6467_v63 = vadd.f32 %v1229_v62, %v179_v55  ;;  %v1296_v1 = vmul.f32 %v6463_v59, %v6463_v59  ;;  %v1283_v4 = vadd.f32 %v6463_v59, %v6461_v57  ;;  %v6507_v55 = vsub.s32 0, %v6502_v45 }
 0x1bc   :  { %v1299_v2 = vmul.f32 %v6465_v61, %v6465_v61 }
 0x1bd   :  { %v1300_v3 = vmul.f32 %v6467_v63, %v6467_v63  ;;  %v1288_v7 = vadd.f32 %v6467_v63, %v6465_v61  ;;  %v1303_v11 = vadd.f32 %v1296_v1, %v1295_v0 }
 0x1bf   :  { %v1308_v15 = vadd.f32 %v1300_v3, %v1299_v2  ;;  %v80_v3 = vld [vmem:[%s8026_s4] sm:$0xf] }
 0x1c3   :  { %v1266_v5 = vpop.f32.mrb[4].mxu1 }
 0x1c4   :  { %v1297_v8 = vmul.f32 %v1266_v5, %v1266_v5  ;;  %v1268_v9 = vpop.f32.mrb[5].mxu1  ;;  %v1284_v10 = vadd.f32 %v1283_v4, %v1266_v5 }
 0x1c5   :  { %v6481_v14 = vpop.f32.mrb[6].mxu1  ;;  %v1298_v13 = vmul.f32 %v1268_v9, %v1268_v9 }
 0x1c6   :  { %v1301_v16 = vmul.f32 %v6481_v14, %v6481_v14  ;;  %v6485_v17 = vpop.f32.mrb[7].mxu1  ;;  %v1285_v12 = vadd.f32 %v1284_v10, %v1268_v9  ;;  %v1289_v18 = vadd.f32 %v1288_v7, %v6481_v14  ;;  %v1304_v19 = vadd.f32 %v1303_v11, %v1297_v8 }
 0x1c7   :  { %v1302_v20 = vmul.f32 %v6485_v17, %v6485_v17 }
 0x1c8   :  { %1286 = vadd.xlane.f32.xlu0 %v1285_v12  ;;  %v1290_v21 = vadd.f32 %v1289_v18, %v6485_v17  ;;  %v1305_v22 = vadd.f32 %v1304_v19, %v1298_v13  ;;  %v1309_v23 = vadd.f32 %v1308_v15, %v1301_v16 }
 0x1ca   :  { %1291 = vadd.xlane.f32.xlu1 %v1290_v21  ;;  %v1310_v24 = vadd.f32 %v1309_v23, %v1302_v20  ;;  %v1387_v20 = vrot.slane %v80_v3, %v6507_v55  ;;  %v1391_v21 = vrot.slane %v80_v3, %v6510_v56 }
 0x1cc   :  { %1306 = vadd.xlane.f32.xlu0 %v1305_v22 }
 0x1d0   :  { %1311 = vadd.xlane.f32.xlu0 %v1310_v24 }
 0x1db   :  { %1359 = vperm.xlu1 %6053, %v78_v25  }
 0x1df   :  { %1364 = vperm.xlu1 %6053, %v79_v26  }
 0x1e3   :  { %1446 = vrot.lane.b32.xlu1 %v6136_v28, %s6127_s29 }
 0x1e6   :  { %1346 = vperm.xlu0 %6054, %v77_v27  }
 0x255   :  { %v1287_v30 = vpop.xlane.xlu0 %1286 }
 0x256   :  { %v1293_v31 = vmul.f32 0.005, %v1287_v30 }
 0x257   :  { %v1292_v32 = vpop.xlane.xlu1 %1291 }
 0x258   :  { %v1294_v34 = vmul.f32 0.005, %v1292_v32  ;;  %v1315_v35 = vmul.f32 %v1293_v31, %v1293_v31  ;;  %v1319_v46 = vsub.f32 %v6461_v57, %v1293_v31  ;;  %v1320_v47 = vsub.f32 %v6463_v59, %v1293_v31 }
 0x259   :  { %v1307_v33 = vpop.xlane.xlu0 %1306  ;;  %v1321_v48 = vsub.f32 %v1266_v5, %v1293_v31  ;;  %v1322_v49 = vsub.f32 %v1268_v9, %v1293_v31  ;;  %v1398_v57 = vsub.s32 3, %v6502_v45 }
 0x25a   :  { %v1313_v36 = vmul.f32 0.005, %v1307_v33  ;;  %v1316_v41 = vmul.f32 %v1294_v34, %v1294_v34  ;;  %v1323_v4 = vsub.f32 %v6465_v61, %v1294_v34  ;;  %v1324_v5 = vsub.f32 %v6467_v63, %v1294_v34 }
 0x25b   :  { %v1360_v1 = vpop.permute.xlu1 %1359  ;;  %v1325_v7 = vsub.f32 %v6481_v14, %v1294_v34  ;;  %v1326_v8 = vsub.f32 %v6485_v17, %v1294_v34  ;;  %v1395_v61 = vrot.slane %v80_v3, %v6513_v58  ;;  %v1399_v63 = vrot.slane %v80_v3, %v1398_v57 }
 0x25c   :  { %v1317_v37 = vsub.f32 %v1313_v36, %v1315_v35 }
 0x25d   :  { %v1312_v38 = vpop.xlane.xlu0 %1311 }
 0x25e   :  { %v1327_v39 = vadd.f32 1e-05, %v1317_v37  ;;  %v1314_v40 = vmul.f32 0.005, %v1312_v38 }
 0x260   :  { %6094 = vrsqrt.f32 %v1327_v39  ;;  %v1318_v42 = vsub.f32 %v1314_v40, %v1316_v41 }
 0x262   :  { %v1328_v43 = vadd.f32 1e-05, %v1318_v42 }
 0x264   :  { %6096 = vrsqrt.f32 %v1328_v43 }
 0x265   :  { %v1347_v15 = vpop.permute.xlu0 %1346 }
 0x26a   :  { %v6095_v50 = vpop.eup %6094 }
 0x26b   :  { %v1331_v51 = vmul.f32 %v6095_v50, %v1319_v46  ;;  %v1332_v52 = vmul.f32 %v6095_v50, %v1320_v47  ;;  %v1333_v53 = vmul.f32 %v6095_v50, %v1321_v48  ;;  %v1334_v54 = vmul.f32 %v6095_v50, %v1322_v49 }
 0x26d   :  { %v1349_v60 = vmul.f32 %v1342_v29, %v1331_v51  ;;  %v1350_v59 = vmul.f32 %v1342_v29, %v1332_v52  ;;  %v1351_v62 = vmul.f32 %v1342_v29, %v1333_v53  ;;  %v1352_v0 = vmul.f32 %v1342_v29, %v1334_v54  ;;  %v1365_v29 = vpop.permute.xlu1 %1364 }
 0x26e   :  { %v6097_v2 = vpop.eup %6096 }
 0x26f   :  { %v1367_v9 = vadd.f32 %v1360_v1, %v1349_v60  ;;  %v1368_v10 = vadd.f32 %v1360_v1, %v1350_v59  ;;  %v1369_v11 = vadd.f32 %v1360_v1, %v1351_v62  ;;  %v1370_v13 = vadd.f32 %v1360_v1, %v1352_v0  ;;  %v5119_v0 = vld [vmem:[%s8027_s5 + $0x4] sm:$0xf] }
 0x270   :  { %v1335_v16 = vmul.f32 %v6097_v2, %v1323_v4  ;;  %v1336_v12 = vmul.f32 %v6097_v2, %v1324_v5  ;;  %v1337_v18 = vmul.f32 %v6097_v2, %v1325_v7  ;;  %v1338_v19 = vmul.f32 %v6097_v2, %v1326_v8 }
 0x271   :  { %v1375_v24 = vmax.f32 %v1367_v9, 0.0  ;;  %v1376_v25 = vmax.f32 %v1368_v10, 0.0  ;;  %v1377_v26 = vmax.f32 %v1369_v11, 0.0  ;;  %v1378_v27 = vmax.f32 %v1370_v13, 0.0  ;;  %v1447_v51 = vpop.permute.xlu1 %1446 }
 0x272   :  { %v1353_v14 = vmul.f32 %v1347_v15, %v1335_v16  ;;  %v1354_v17 = vmul.f32 %v1347_v15, %v1336_v12  ;;  %v1355_v22 = vmul.f32 %v1347_v15, %v1337_v18  ;;  %v1356_v23 = vmul.f32 %v1347_v15, %v1338_v19  ;;  %v1438_v15 = vld [vmem:[%s8027_s5] sm:$0xf] }
 0x273   :  { %v1404_v38 = vmul.f32 %v1387_v20, %v1375_v24  ;;  %v1405_v39 = vmul.f32 %v1391_v21, %v1376_v25  ;;  %v1406_v40 = vmul.f32 %v1395_v61, %v1377_v26  ;;  %v1407_v41 = vmul.f32 %v1399_v63, %v1378_v27 }
 0x274   :  { %v1371_v30 = vadd.f32 %v1365_v29, %v1353_v14  ;;  %v1372_v31 = vadd.f32 %v1365_v29, %v1354_v17  ;;  %v1373_v32 = vadd.f32 %v1365_v29, %v1355_v22  ;;  %v1374_v33 = vadd.f32 %v1365_v29, %v1356_v23  ;;  %v5124_v23 = vld [vmem:[%s8027_s5 + $0x8] sm:$0xf] }
 0x276   :  { %v1379_v34 = vmax.f32 %v1371_v30, 0.0  ;;  %v1380_v35 = vmax.f32 %v1372_v31, 0.0  ;;  %v1381_v36 = vmax.f32 %v1373_v32, 0.0  ;;  %v1382_v37 = vmax.f32 %v1374_v33, 0.0 }
 0x278   :  { %v1408_v42 = vmul.f32 %v1387_v20, %v1379_v34  ;;  %v1409_v43 = vmul.f32 %v1391_v21, %v1380_v35  ;;  %v1410_v44 = vmul.f32 %v1395_v61, %v1381_v36  ;;  %v1411_v46 = vmul.f32 %v1399_v63, %v1382_v37  ;;  %v5127_v34 = vld [vmem:[%s8027_s5 + $0xc] sm:$0xf] }
 0x27a   :  { %v6528_v47 = vpack.c.bf16 %v1408_v42, %v1404_v38  ;;  %v6530_v48 = vpack.c.bf16 %v1409_v43, %v1405_v39  ;;  %v6532_v49 = vpack.c.bf16 %v1410_v44, %v1406_v40  ;;  %v6534_v50 = vpack.c.bf16 %v1411_v46, %v1407_v41  ;;  %v5130_v42 = vld [vmem:[%s8027_s5 + $0x10] sm:$0xf] }
 0x27c   :  { %1554 = vrot.lane.b32.xlu0 %v6530_v48, %s6129_s18  ;;  %1448 = vrot.lane.b32.xlu1 %v6528_v47, %s6127_s29 }
 0x280   :  { %1556 = vrot.lane.b32.xlu0 %v6532_v49, %s6129_s18  ;;  %1450 = vrot.lane.b32.xlu1 %v6530_v48, %s6127_s29 }
 0x284   :  { %1655 = vrot.lane.b32.xlu0 %v6136_v28, %s6130_s19  ;;  %1452 = vrot.lane.b32.xlu1 %v6532_v49, %s6127_s29 }
 0x288   :  { %1657 = vrot.lane.b32.xlu0 %v6528_v47, %s6130_s19  ;;  %1454 = vrot.lane.b32.xlu1 %v6534_v50, %s6127_s29 }
 0x28c   :  { %1663 = vrot.lane.b32.xlu0 %v6534_v50, %s6130_s19  ;;  %1550 = vrot.lane.b32.xlu1 %v6136_v28, %s6129_s18 }
 0x290   :  { %1768 = vrot.lane.b32.xlu0 %v6530_v48, %s6131_s1  ;;  %1552 = vrot.lane.b32.xlu1 %v6528_v47, %s6129_s18 }
 0x294   :  { %1770 = vrot.lane.b32.xlu0 %v6532_v49, %s6131_s1  ;;  %1558 = vrot.lane.b32.xlu1 %v6534_v50, %s6129_s18  ;;  %s6146_s18 = smov [#allocation4]  }
 0x298   :  { %1986 = vrot.lane.b32.xlu0 %v6530_v48, %s6132_s24  ;;  %1659 = vrot.lane.b32.xlu1 %v6530_v48, %s6130_s19 }
 0x29c   :  { %1984 = vrot.lane.b32.xlu0 %v6528_v47, %s6132_s24  ;;  %1661 = vrot.lane.b32.xlu1 %v6532_v49, %s6130_s19  ;;  %s6140_s19 = smov 14  }
 0x2a0   :  { %1992 = vrot.lane.b32.xlu0 %v6136_v28, %s6132_s24  ;;  %1764 = vrot.lane.b32.xlu1 %v6136_v28, %s6131_s1 }
 0x2a4   :  { %2097 = vrot.lane.b32.xlu0 %v6532_v49, %s6133_s28  ;;  %1766 = vrot.lane.b32.xlu1 %v6528_v47, %s6131_s1 }
 0x2a8   :  { %2099 = vrot.lane.b32.xlu0 %v6534_v50, %s6133_s28  ;;  %1772 = vrot.lane.b32.xlu1 %v6534_v50, %s6131_s1 }
 0x2ac   :  { %2204 = vrot.lane.b32.xlu0 %v6530_v48, %s6134_s0  ;;  %1988 = vrot.lane.b32.xlu1 %v6532_v49, %s6132_s24 }
 0x2b0   :  { %2202 = vrot.lane.b32.xlu0 %v6528_v47, %s6134_s0  ;;  %1990 = vrot.lane.b32.xlu1 %v6534_v50, %s6132_s24 }
 0x2b4   :  { %2210 = vrot.lane.b32.xlu0 %v6136_v28, %s6134_s0  ;;  %2095 = vrot.lane.b32.xlu1 %v6530_v48, %s6133_s28 }
 0x2b8   :  { %2315 = vrot.lane.b32.xlu0 %v6532_v49, %s6135_s26  ;;  %2093 = vrot.lane.b32.xlu1 %v6528_v47, %s6133_s28 }
 0x2bc   :  { %2317 = vrot.lane.b32.xlu0 %v6534_v50, %s6135_s26  ;;  %2101 = vrot.lane.b32.xlu1 %v6136_v28, %s6133_s28  ;;  %s6141_s28 = smov 12  }
 0x2c0   :  { %2206 = vrot.lane.b32.xlu1 %v6532_v49, %s6134_s0 }
 0x2c4   :  { %2208 = vrot.lane.b32.xlu1 %v6534_v50, %s6134_s0 }
 0x2c8   :  { %2313 = vrot.lane.b32.xlu1 %v6530_v48, %s6135_s26 }
 0x2cc   :  { %2311 = vrot.lane.b32.xlu1 %v6528_v47, %s6135_s26 }
 0x2d0   :  { %2319 = vrot.lane.b32.xlu1 %v6136_v28, %s6135_s26  ;;  %s6142_s26 = smov 116  }
 0x2ee   :  { %v1555_v52 = vpop.permute.xlu0 %1554  ;;  %v1449_v53 = vpop.permute.xlu1 %1448 }
 0x2ef   :  { %v1456_v62 = vsel %vm117_vm0, %v1447_v51, %v1449_v53 }
 0x2f2   :  { %v1557_v54 = vpop.permute.xlu0 %1556  ;;  %v1451_v60 = vpop.permute.xlu1 %1450 }
 0x2f3   :  { %v1457_v59 = vsel %vm117_vm0, %v1449_v53, %v1451_v60  ;;  %v1562_v19 = vsel %vm240_vm3, %v1555_v52, %v1557_v54  ;;  %v5133_v53 = vld [vmem:[%s8027_s5 + $0x14] sm:$0xf] }
 0x2f4   :  { %1468 = vmatprep.subr.bf16.mxu0 %v1457_v59 }
 0x2f5   :  { %1469 = vmatpush1.bf16.msra.mxu0 %v1456_v62 }
 0x2f6   :  { %v1656_v1 = vpop.permute.xlu0 %1655  ;;  %v1453_v2 = vpop.permute.xlu1 %1452 }
 0x2f7   :  { %v1458_v7 = vsel %vm117_vm0, %v1451_v60, %v1453_v2 }
 0x2f8   :  { %5120 = vmatmul.mubr.msk.bf16.vlgmr.msra.gmra.mrb[4].mxu0 %vm117_vm0, %v5119_v0 }
 0x2f9   :  { %1603 = vmatprep.mubr.bf16.mxu0 %v6128_v6 }
 0x2fa   :  { %v1658_v3 = vpop.permute.xlu0 %1657  ;;  %v1455_v4 = vpop.permute.xlu1 %1454 }
 0x2fb   :  { %v1459_v5 = vsel %vm117_vm0, %v1453_v2, %v1455_v4  ;;  %v1665_v61 = vsel %vm364_vm4, %v1656_v1, %v1658_v3 }
 0x2fc   :  { %1509 = vmatprep.subr.bf16.mxu1 %v1459_v5  ;;  %v5136_v5 = vld [vmem:[%s8027_s5 + $0x18] sm:$0xf] }
 0x2fd   :  { %1510 = vmatpush1.bf16.msra.mxu1 %v1458_v7 }
 0x2fe   :  { %v1551_v8 = vpop.permute.xlu1 %1550  ;;  %v1664_v9 = vpop.permute.xlu0 %1663 }
 0x300   :  { %5121 = vmatmul.mubr.msk.bf16.vlgmr.msra.gmra.mrb[8].mxu1 %vm117_vm0, %v5119_v0 }
 0x301   :  { %1644 = vmatprep.mubr.bf16.mxu1 %v6128_v6 }
 0x302   :  { %v1553_v10 = vpop.permute.xlu1 %1552  ;;  %v1769_v16 = vpop.permute.xlu0 %1768 }
 0x303   :  { %v1560_v11 = vsel %vm240_vm3, %v1551_v8, %v1553_v10  ;;  %v1561_v13 = vsel %vm240_vm3, %v1553_v10, %v1555_v52 }
 0x304   :  { %1571 = vmatprep.subr.bf16.mxu0 %v1561_v13 }
 0x305   :  { %1572 = vmatpush1.bf16.msra.mxu0 %v1560_v11 }
 0x306   :  { %v1559_v12 = vpop.permute.xlu1 %1558  ;;  %v1771_v63 = vpop.permute.xlu0 %1770 }
 0x307   :  { %v1563_v18 = vsel %vm240_vm3, %v1557_v54, %v1559_v12  ;;  %v1776_v33 = vsel %vm496_vm5, %v1769_v16, %v1771_v63  ;;  %vm3803_vm3 = vcmask 941056  }
 0x308   :  { %5122 = vmatmul.mubr.msk.bf16.vlgmr.msra.gmra.mrb[4].mxu0 %vm117_vm0, %v1438_v15  ;;  %1612 = vmatprep.subr.bf16.mxu1 %v1563_v18 }
 0x309   :  { %1613 = vmatpush1.bf16.msra.mxu1 %v1562_v19  ;;  %1708 = vmatprep.mubr.bf16.mxu0 %v6128_v6  ;;  %v5142_v19 = vld [vmem:[%s8027_s5 + $0x20] sm:$0xf] }
 0x30a   :  { %v1660_v20 = vpop.permute.xlu1 %1659  ;;  %v1987_v24 = vpop.permute.xlu0 %1986 }
 0x30b   :  { %v1666_v21 = vsel %vm364_vm4, %v1658_v3, %v1660_v20 }
 0x30c   :  { %5123 = vmatmul.mubr.msk.bf16.vlgmr.msra.gmra.mrb[8].mxu1 %vm117_vm0, %v1438_v15  ;;  %1676 = vmatprep.subr.bf16.mxu0 %v1666_v21 }
 0x30d   :  { %1677 = vmatpush1.bf16.msra.mxu0 %v1665_v61  ;;  %1749 = vmatprep.mubr.bf16.mxu1 %v6128_v6 }
 0x30e   :  { %v1662_v14 = vpop.permute.xlu1 %1661  ;;  %v1985_v30 = vpop.permute.xlu0 %1984 }
 0x30f   :  { %v1667_v17 = vsel %vm364_vm4, %v1660_v20, %v1662_v14  ;;  %v1668_v22 = vsel %vm364_vm4, %v1662_v14, %v1664_v9  ;;  %v1994_v46 = vsel %vm773_vm6, %v1985_v30, %v1987_v24  ;;  %vm6145_vm4 = vmmov 1  }
 0x310   :  { %1717 = vmatprep.subr.bf16.mxu1 %v1668_v22 }
 0x311   :  { %1718 = vmatpush1.bf16.msra.mxu1 %v1667_v17 }
 0x312   :  { %v1765_v25 = vpop.permute.xlu1 %1764  ;;  %v1993_v35 = vpop.permute.xlu0 %1992 }
 0x314   :  { %5125 = vmatmul.mubr.msk.bf16.vlgmr.msra.gmra.mrb[4].mxu0 %vm117_vm0, %v5124_v23 }
 0x315   :  { %1817 = vmatprep.mubr.bf16.mxu0 %v6128_v6 }
 0x316   :  { %v1767_v26 = vpop.permute.xlu1 %1766  ;;  %v2098_v40 = vpop.permute.xlu0 %2097 }
 0x317   :  { %v1774_v27 = vsel %vm496_vm5, %v1765_v25, %v1767_v26  ;;  %v1775_v29 = vsel %vm496_vm5, %v1767_v26, %v1769_v16  ;;  %v5139_v16 = vld [vmem:[%s8027_s5 + $0x1c] sm:$0xf]  ;;  %s5036_s5 = sshll.u32 %s6146_s18, 4  ;;  %s5037_s5 = int_to_ptr.vmem [resolvable:$true] %s5036_s5 }
 0x318   :  { %5126 = vmatmul.mubr.msk.bf16.vlgmr.msra.gmra.mrb[8].mxu1 %vm117_vm0, %v5124_v23  ;;  %1785 = vmatprep.subr.bf16.mxu0 %v1775_v29  ;;  %p6108_p1 = scmp.lt.s32.totalorder %s5037_s5, %s5037_s5 }
 0x319   :  { %1786 = vmatpush1.bf16.msra.mxu0 %v1774_v27  ;;  %1858 = vmatprep.mubr.bf16.mxu1 %v6128_v6 }
 0x31a   :  { %1876 = vmatprep.subr.bf16.mxu0 %v6530_v48  ;;  %v1773_v31 = vpop.permute.xlu1 %1772  ;;  %v2100_v43 = vpop.permute.xlu0 %2099 }
 0x31b   :  { %v1777_v32 = vsel %vm496_vm5, %v1771_v63, %v1773_v31  ;;  %v2105_v1 = vsel %vm905_vm7, %v2098_v40, %v2100_v43 }
 0x31c   :  { %1826 = vmatprep.subr.bf16.mxu1 %v1777_v32 }
 0x31d   :  { %1827 = vmatpush1.bf16.msra.mxu1 %v1776_v33 }
 0x31e   :  { %1917 = vmatprep.subr.bf16.mxu1 %v6534_v50  ;;  %v1989_v36 = vpop.permute.xlu1 %1988  ;;  %v2205_v50 = vpop.permute.xlu0 %2204 }
 0x31f   :  { %v1995_v37 = vsel %vm773_vm6, %v1987_v24, %v1989_v36 }
 0x320   :  { %5128 = vmatmul.mubr.msk.bf16.vlgmr.msra.gmra.mrb[4].mxu0 %vm117_vm0, %v5127_v34 }
 0x321   :  { %1877 = vmatpush1.bf16.msra.mxu0 %v6528_v47  ;;  %1908 = vmatprep.mubr.bf16.mxu0 %v6128_v6 }
 0x322   :  { %2005 = vmatprep.subr.bf16.mxu0 %v1995_v37  ;;  %v1991_v38 = vpop.permute.xlu1 %1990  ;;  %v2203_v54 = vpop.permute.xlu0 %2202  ;;  %v6137_v37 = vmov 0.0  }
 0x323   :  { %v1997_v39 = vsel %vm773_vm6, %v1991_v38, %v1993_v35  ;;  %v1996_v51 = vsel %vm773_vm6, %v1989_v36, %v1991_v38  ;;  %v2212_v8 = vsel %vm1037_vm8, %v2203_v54, %v2205_v50  ;;  %v1421_v35 = vld [vmem:[%s8029_s7] sm:$0xff]  ;;  %70 = vst [vmem:[#allocation3] sm:$0xff] %v6137_v37  ;;  %73 = vst [vmem:[#allocation3 + $0x18] sm:$0xff] %v6137_v37 }
 0x324   :  { %5129 = vmatmul.mubr.msk.bf16.vlgmr.msra.gmra.mrb[8].mxu1 %vm117_vm0, %v5127_v34  ;;  %v1420_v36 = vld [vmem:[%s8028_s6] sm:$0xff]  ;;  %s6144_s6 = smov 114  }
 0x325   :  { %1918 = vmatpush1.bf16.msra.mxu1 %v6532_v49  ;;  %1949 = vmatprep.mubr.bf16.mxu1 %v6128_v6 }
 0x326   :  { %2046 = vmatprep.subr.bf16.mxu1 %v1997_v39  ;;  %v2096_v41 = vpop.permute.xlu1 %2095  ;;  %v2211_v2 = vpop.permute.xlu0 %2210 }
 0x327   :  { %v2104_v47 = vsel %vm905_vm7, %v2096_v41, %v2098_v40 }
 0x32a   :  { %v2094_v44 = vpop.permute.xlu1 %2093  ;;  %v2316_v7 = vpop.permute.xlu0 %2315 }
 0x32b   :  { %v2103_v59 = vsel %vm905_vm7, %v2094_v44, %v2096_v41 }
 0x32c   :  { %5131 = vmatmul.mubr.msk.bf16.vlgmr.msra.gmra.mrb[4].mxu0 %vm117_vm0, %v5130_v42 }
 0x32d   :  { %2006 = vmatpush1.bf16.msra.mxu0 %v1994_v46  ;;  %2037 = vmatprep.mubr.bf16.mxu0 %v6128_v6 }
 0x32e   :  { %2114 = vmatprep.subr.bf16.mxu0 %v2104_v47  ;;  %v2102_v48 = vpop.permute.xlu1 %2101  ;;  %v2318_v11 = vpop.permute.xlu0 %2317 }
 0x32f   :  { %v2106_v49 = vsel %vm905_vm7, %v2100_v43, %v2102_v48  ;;  %v2323_v18 = vsel %vm1169_vm9, %v2316_v7, %v2318_v11  ;;  %vm4376_vm7 = vcmask 203776  }
 0x330   :  { %5132 = vmatmul.mubr.msk.bf16.vlgmr.msra.gmra.mrb[8].mxu1 %vm117_vm0, %v5130_v42 }
 0x331   :  { %2047 = vmatpush1.bf16.msra.mxu1 %v1996_v51  ;;  %2078 = vmatprep.mubr.bf16.mxu1 %v6128_v6 }
 0x332   :  { %2155 = vmatprep.subr.bf16.mxu1 %v2106_v49  ;;  %v2207_v52 = vpop.permute.xlu1 %2206 }
 0x333   :  { %v2213_v62 = vsel %vm1037_vm8, %v2205_v50, %v2207_v52 }
 0x336   :  { %v2209_v60 = vpop.permute.xlu1 %2208 }
 0x337   :  { %v2215_v3 = vsel %vm1037_vm8, %v2209_v60, %v2211_v2  ;;  %v2214_v13 = vsel %vm1037_vm8, %v2207_v52, %v2209_v60  ;;  %v1422_v60 = vld [vmem:[%s8030_s8] sm:$0xf] }
 0x338   :  { %5134 = vmatmul.mubr.msk.bf16.vlgmr.msra.gmra.mrb[4].mxu0 %vm117_vm0, %v5133_v53 }
 0x339   :  { %2115 = vmatpush1.bf16.msra.mxu0 %v2103_v59  ;;  %2146 = vmatprep.mubr.bf16.mxu0 %v6128_v6 }
 0x33a   :  { %2223 = vmatprep.subr.bf16.mxu0 %v2213_v62  ;;  %v2314_v0 = vpop.permute.xlu1 %2313 }
 0x33b   :  { %v2322_v9 = vsel %vm1169_vm9, %v2314_v0, %v2316_v7  ;;  %v2472_v7 = vrot.slane %v1422_v60, %v6507_v55 }
 0x33c   :  { %5135 = vmatmul.mubr.msk.bf16.vlgmr.msra.gmra.mrb[8].mxu1 %vm117_vm0, %v5133_v53 }
 0x33d   :  { %2156 = vmatpush1.bf16.msra.mxu1 %v2105_v1  ;;  %2187 = vmatprep.mubr.bf16.mxu1 %v6128_v6 }
 0x33e   :  { %2264 = vmatprep.subr.bf16.mxu1 %v2215_v3  ;;  %v2312_v4 = vpop.permute.xlu1 %2311 }
 0x33f   :  { %v2321_v12 = vsel %vm1169_vm9, %v2312_v4, %v2314_v0  ;;  %v2476_v4 = vrot.slane %v1422_v60, %v6510_v56 }
 0x342   :  { %v2320_v10 = vpop.permute.xlu1 %2319 }
 0x343   :  { %v2324_v15 = vsel %vm1169_vm9, %v2318_v11, %v2320_v10 }
 0x344   :  { %5137 = vmatmul.mubr.msk.bf16.vlgmr.msra.gmra.mrb[4].mxu0 %vm117_vm0, %v5136_v5 }
 0x345   :  { %2224 = vmatpush1.bf16.msra.mxu0 %v2212_v8  ;;  %2255 = vmatprep.mubr.bf16.mxu0 %v6128_v6  ;;  %v2484_v8 = vrot.slane %v1422_v60, %v1398_v57 }
 0x346   :  { %2332 = vmatprep.subr.bf16.mxu0 %v2322_v9 }
 0x348   :  { %5138 = vmatmul.mubr.msk.bf16.vlgmr.msra.gmra.mrb[8].mxu1 %vm117_vm0, %v5136_v5  ;;  %v2480_v5 = vrot.slane %v1422_v60, %v6513_v58  ;;  %v2562_v60 = vld [vmem:[%s8031_s9 + $0x10] sm:$0xff] }
 0x349   :  { %2265 = vmatpush1.bf16.msra.mxu1 %v2214_v13  ;;  %2296 = vmatprep.mubr.bf16.mxu1 %v6128_v6 }
 0x34a   :  { %2373 = vmatprep.subr.bf16.mxu1 %v2324_v15 }
 0x350   :  { %5140 = vmatmul.mubr.msk.bf16.vlgmr.msra.gmra.mrb[4].mxu0 %vm117_vm0, %v5139_v16 }
 0x351   :  { %2333 = vmatpush1.bf16.msra.mxu0 %v2321_v12  ;;  %2364 = vmatprep.mubr.bf16.mxu0 %v6128_v6 }
 0x354   :  { %5141 = vmatmul.mubr.msk.bf16.vlgmr.msra.gmra.mrb[8].mxu1 %vm117_vm0, %v5139_v16 }
 0x355   :  { %2374 = vmatpush1.bf16.msra.mxu1 %v2323_v18  ;;  %2405 = vmatprep.mubr.bf16.mxu1 %v6128_v6 }
 0x35c   :  { %5143 = vmatmul.mubr.msk.bf16.vlgmr.msra.gmra.mrb[4].mxu0 %vm117_vm0, %v5142_v19 }
 0x360   :  { %5144 = vmatmul.mubr.msk.bf16.vlgmr.msra.gmra.mrb[8].mxu1 %vm117_vm0, %v5142_v19  ;;  %vm3696_vm0 = vcmask 949248  }
 0x42f   :  { %v2366_v20 = vpop.f32.mrb[4].mxu0 }
 0x430   :  { %v2424_v21 = vmul.f32 %v2366_v20, %v2366_v20  ;;  %v2368_v61 = vpop.f32.mrb[5].mxu0 }
 0x431   :  { %v2418_v63 = vadd.f32 %v2368_v61, %v2366_v20  ;;  %v2425_v14 = vmul.f32 %v2368_v61, %v2368_v61  ;;  %v2370_v17 = vpop.f32.mrb[6].mxu0 }
 0x432   :  { %v2371_v22 = vpop.f32.mrb[7].mxu0  ;;  %v2560_v17 = vld [vmem:[%s8031_s9] sm:$0xff] }
 0x433   :  { %v2407_v23 = vpop.f32.mrb[8].mxu1  ;;  %v2428_v24 = vadd.f32 %v2425_v14, %v2424_v21  ;;  %v2564_v14 = vld [vmem:[%s8031_s9 + $0x20] sm:$0xff] }
 0x434   :  { %v2426_v25 = vmul.f32 %v2407_v23, %v2407_v23  ;;  %v2409_v26 = vpop.f32.mrb[9].mxu1  ;;  %v2419_v27 = vadd.f32 %v2418_v63, %v2407_v23  ;;  %v2561_v63 = vld [vmem:[%s8031_s9 + $0x8] sm:$0xff] }
 0x435   :  { %v2411_v29 = vpop.f32.mrb[10].mxu1  ;;  %v2427_v30 = vmul.f32 %v2409_v26, %v2409_v26  ;;  %v5493_v22 = vpack.c.bf16 %v2564_v14, %v2561_v63  ;;  %v2628_v63 = vld [vmem:[%s8031_s9 + $0x220] sm:$0xff] }
 0x436   :  { %v2412_v31 = vpop.f32.mrb[11].mxu1  ;;  %v2420_v32 = vadd.f32 %v2419_v27, %v2409_v26  ;;  %v2429_v33 = vadd.f32 %v2428_v24, %v2426_v25  ;;  %v2567_v24 = vld [vmem:[%s8031_s9 + $0x38] sm:$0xff]  ;;  %v2570_v25 = vld [vmem:[%s8031_s9 + $0x50] sm:$0xff] }
 0x437   :  { %v5497_v27 = vpack.c.bf16 %v2570_v25, %v2567_v24  ;;  %v2566_v29 = vld [vmem:[%s8031_s9 + $0x30] sm:$0xff]  ;;  %5494 = vmatprep.subr.bf16.mxu0 %v5493_v22  ;;  %v2573_v31 = vld [vmem:[%s8031_s9 + $0x68] sm:$0xff]  ;;  %v2599_v22 = vld [vmem:[%s8031_s9 + $0x138] sm:$0xff] }
 0x438   :  { %2421 = vadd.xlane.f32.xlu0 %v2420_v32  ;;  %v2430_v34 = vadd.f32 %v2429_v33, %v2427_v30  ;;  %v2569_v30 = vld [vmem:[%s8031_s9 + $0x48] sm:$0xff]  ;;  %v2576_v32 = vld [vmem:[%s8031_s9 + $0x80] sm:$0xff]  ;;  %v2631_v24 = vld [vmem:[%s8031_s9 + $0x238] sm:$0xff] }
 0x439   :  { %v5499_v33 = vpack.c.bf16 %v2569_v30, %v2566_v29  ;;  %v2580_v29 = vld [vmem:[%s8031_s9 + $0xa0] sm:$0xff]  ;;  %v2583_v30 = vld [vmem:[%s8031_s9 + $0xb8] sm:$0xff] }
 0x43a   :  { %2431 = vadd.xlane.f32.xlu1 %v2430_v34  ;;  %v5501_v34 = vpack.c.bf16 %v2576_v32, %v2573_v31  ;;  %v2606_v31 = vld [vmem:[%s8031_s9 + $0x170] sm:$0xff] }
 0x43b   :  { %v2634_v32 = vld [vmem:[%s8031_s9 + $0x250] sm:$0xff] }
 0x44b   :  { %2457 = vperm.xlu1 %6053, %v1421_v35   ;;  %v2572_v35 = vld [vmem:[%s8031_s9 + $0x60] sm:$0xff] }
 0x44e   :  { %2448 = vperm.xlu0 %6054, %v1420_v36   ;;  %v2575_v36 = vld [vmem:[%s8031_s9 + $0x78] sm:$0xff] }
 0x4c5   :  { %v2422_v38 = vpop.xlane.xlu0 %2421 }
 0x4c6   :  { %v2423_v39 = vmul.f32 0.0034722222, %v2422_v38  ;;  %v2579_v38 = vld [vmem:[%s8031_s9 + $0x98] sm:$0xff] }
 0x4c7   :  { %v2432_v40 = vpop.xlane.xlu1 %2431 }
 0x4c8   :  { %v2433_v41 = vmul.f32 0.0034722222, %v2432_v40  ;;  %v2434_v42 = vmul.f32 %v2423_v39, %v2423_v39  ;;  %v2436_v46 = vsub.f32 %v2366_v20, %v2423_v39  ;;  %v2437_v47 = vsub.f32 %v2368_v61, %v2423_v39 }
 0x4c9   :  { %v2438_v48 = vsub.f32 %v2407_v23, %v2423_v39  ;;  %v2439_v49 = vsub.f32 %v2409_v26, %v2423_v39  ;;  %v2563_v23 = vld [vmem:[%s8031_s9 + $0x18] sm:$0xff]  ;;  %v2582_v39 = vld [vmem:[%s8031_s9 + $0xb0] sm:$0xff]  ;;  %v5503_v40 = vpack.c.bf16 %v2575_v36, %v2572_v35  ;;  %v2605_v36 = vld [vmem:[%s8031_s9 + $0x168] sm:$0xff] }
 0x4ca   :  { %v2435_v43 = vsub.f32 %v2433_v41, %v2434_v42  ;;  %v5495_v26 = vpack.c.bf16 %v2563_v23, %v2560_v17  ;;  %v5505_v41 = vpack.c.bf16 %v2582_v39, %v2579_v38  ;;  %v2578_v42 = vld [vmem:[%s8031_s9 + $0x90] sm:$0xff]  ;;  %v2596_v17 = vld [vmem:[%s8031_s9 + $0x120] sm:$0xff]  ;;  %v5635_v38 = vpack.c.bf16 %v2583_v30, %v2580_v29 }
 0x4cb   :  { %v2458_v3 = vpop.permute.xlu1 %2457  ;;  %v2602_v35 = vld [vmem:[%s8031_s9 + $0x150] sm:$0xff] }
 0x4cc   :  { %v2440_v44 = vadd.f32 1e-05, %v2435_v43  ;;  %5496 = vmatpush1.bf16.msra.mxu0 %v5495_v26  ;;  %v2581_v43 = vld [vmem:[%s8031_s9 + $0xa8] sm:$0xff]  ;;  %v2603_v26 = vld [vmem:[%s8031_s9 + $0x158] sm:$0xff]  ;;  %v2642_v29 = vld [vmem:[%s8031_s9 + $0x290] sm:$0xff] }
 0x4cd   :  { %v2449_v59 = vpop.permute.xlu0 %2448  ;;  %5498 = vmatprep.subr.bf16.mxu0 %v5497_v27  ;;  %v5633_v27 = vpack.c.bf16 %v2631_v24, %v2628_v63  ;;  %v5521_v39 = vpack.c.bf16 %v2606_v31, %v2603_v26  ;;  %v2626_v63 = vld [vmem:[%s8031_s9 + $0x210] sm:$0xff]  ;;  %v2635_v26 = vld [vmem:[%s8031_s9 + $0x258] sm:$0xff] }
 0x4ce   :  { %6098 = vrsqrt.f32 %v2440_v44  ;;  %v2585_v44 = vld [vmem:[%s8031_s9 + $0xc8] sm:$0xff] }
 0x4d0   :  { %5500 = vmatpush1.bf16.msra.mxu0 %v5499_v33  ;;  %v2637_v33 = vld [vmem:[%s8031_s9 + $0x268] sm:$0xff] }
 0x4d1   :  { %5502 = vmatprep.subr.bf16.mxu0 %v5501_v34  ;;  %v5519_v34 = vpack.c.bf16 %v2599_v22, %v2596_v17  ;;  %v2633_v17 = vld [vmem:[%s8031_s9 + $0x248] sm:$0xff]  ;;  %v2636_v22 = vld [vmem:[%s8031_s9 + $0x260] sm:$0xff] }
 0x4d2   :  { %v5541_v24 = vpack.c.bf16 %v2636_v22, %v2633_v17 }
 0x4d4   :  { %5504 = vmatpush1.bf16.msra.mxu0 %v5503_v40  ;;  %v2609_v40 = vld [vmem:[%s8031_s9 + $0x188] sm:$0xff] }
 0x4d5   :  { %5506 = vmatprep.subr.bf16.mxu0 %v5505_v41  ;;  %v5637_v41 = vpack.c.bf16 %v2637_v33, %v2634_v32  ;;  %v2638_v32 = vld [vmem:[%s8031_s9 + $0x270] sm:$0xff]  ;;  %v2641_v33 = vld [vmem:[%s8031_s9 + $0x288] sm:$0xff] }
 0x4d8   :  { %v6099_v50 = vpop.eup %6098 }
 0x4d9   :  { %v2442_v51 = vmul.f32 %v6099_v50, %v2436_v46  ;;  %v2443_v52 = vmul.f32 %v6099_v50, %v2437_v47  ;;  %v2444_v53 = vmul.f32 %v6099_v50, %v2438_v48  ;;  %v2445_v54 = vmul.f32 %v6099_v50, %v2439_v49  ;;  %v2588_v46 = vld [vmem:[%s8031_s9 + $0xe0] sm:$0xff]  ;;  %v2610_v47 = vld [vmem:[%s8031_s9 + $0x190] sm:$0xff]  ;;  %v2587_v50 = vld [vmem:[%s8031_s9 + $0xd8] sm:$0xff] }
 0x4da   :  { %v5507_v48 = vpack.c.bf16 %v2581_v43, %v2578_v42  ;;  %v2584_v49 = vld [vmem:[%s8031_s9 + $0xc0] sm:$0xff]  ;;  %v2586_v42 = vld [vmem:[%s8031_s9 + $0xd0] sm:$0xff]  ;;  %v2589_v43 = vld [vmem:[%s8031_s9 + $0xe8] sm:$0xff] }
 0x4db   :  { %v2451_v62 = vmul.f32 %v2449_v59, %v2442_v51  ;;  %v2452_v0 = vmul.f32 %v2449_v59, %v2443_v52  ;;  %v2453_v1 = vmul.f32 %v2449_v59, %v2444_v53  ;;  %v2454_v2 = vmul.f32 %v2449_v59, %v2445_v54  ;;  %v2613_v51 = vld [vmem:[%s8031_s9 + $0x1a8] sm:$0xff]  ;;  %v2591_v53 = vld [vmem:[%s8031_s9 + $0xf8] sm:$0xff] }
 0x4dc   :  { %v5509_v52 = vpack.c.bf16 %v2588_v46, %v2585_v44  ;;  %v5621_v54 = vpack.c.bf16 %v2613_v51, %v2610_v47  ;;  %v2565_v59 = vld [vmem:[%s8031_s9 + $0x28] sm:$0xff]  ;;  %5508 = vmatpush1.bf16.msra.mxu0 %v5507_v48  ;;  %v2612_v44 = vld [vmem:[%s8031_s9 + $0x1a0] sm:$0xff]  ;;  %v2643_v47 = vld [vmem:[%s8031_s9 + $0x298] sm:$0xff]  ;;  %v5523_v48 = vpack.c.bf16 %v2605_v36, %v2602_v35  ;;  %v5639_v51 = vpack.c.bf16 %v2589_v43, %v2586_v42 }
 0x4dd   :  { %v2460_v9 = vadd.f32 %v2458_v3, %v2451_v62  ;;  %v2461_v10 = vadd.f32 %v2458_v3, %v2452_v0  ;;  %v2462_v11 = vadd.f32 %v2458_v3, %v2453_v1  ;;  %v2463_v13 = vadd.f32 %v2458_v3, %v2454_v2  ;;  %v2594_v62 = vld [vmem:[%s8031_s9 + $0x110] sm:$0xff]  ;;  %v2616_v1 = vld [vmem:[%s8031_s9 + $0x1c0] sm:$0xff]  ;;  %v2619_v2 = vld [vmem:[%s8031_s9 + $0x1d8] sm:$0xff] }
 0x4de   :  { %v5623_v0 = vpack.c.bf16 %v2565_v59, %v2562_v60  ;;  %5622 = vmatprep.subr.bf16.mxu1 %v5621_v54  ;;  %v5625_v3 = vpack.c.bf16 %v2619_v2, %v2616_v1  ;;  %5510 = vmatprep.subr.bf16.mxu0 %v5509_v52  ;;  %v2640_v46 = vld [vmem:[%s8031_s9 + $0x280] sm:$0xff]  ;;  %v5525_v52 = vpack.c.bf16 %v2612_v44, %v2609_v40  ;;  %v2595_v59 = vld [vmem:[%s8031_s9 + $0x118] sm:$0xff]  ;;  %v2649_v1 = vld [vmem:[%s8031_s9 + $0x2c8] sm:$0xff] }
 0x4df   :  { %v2464_v15 = vmax.f32 %v2460_v9, 0.0  ;;  %v2467_v16 = vmax.f32 %v2463_v13, 0.0  ;;  %v2465_v12 = vmax.f32 %v2461_v10, 0.0  ;;  %v2466_v18 = vmax.f32 %v2462_v11, 0.0  ;;  %v2571_v9 = vld [vmem:[%s8031_s9 + $0x58] sm:$0xff]  ;;  %v2597_v11 = vld [vmem:[%s8031_s9 + $0x128] sm:$0xff] }
 0x4e0   :  { %5624 = vmatpush3.bf16.msra.mxu1 %v5623_v0  ;;  %v5513_v10 = vpack.c.bf16 %v2594_v62, %v2591_v53  ;;  %v2615_v53 = vld [vmem:[%s8031_s9 + $0x1b8] sm:$0xff]  ;;  %v5641_v54 = vpack.c.bf16 %v2643_v47, %v2640_v46  ;;  %v2592_v60 = vld [vmem:[%s8031_s9 + $0x100] sm:$0xff]  ;;  %v2618_v62 = vld [vmem:[%s8031_s9 + $0x1d0] sm:$0xff]  ;;  %v5547_v36 = vpack.c.bf16 %v2641_v33, %v2638_v32 }
 0x4e1   :  { %v6727_v19 = vmul.f32 %v2476_v4, %v2465_v12  ;;  %v6729_v20 = vmul.f32 %v2480_v5, %v2466_v18  ;;  %v6731_v21 = vmul.f32 %v2472_v7, %v2464_v15  ;;  %v6733_v61 = vmul.f32 %v2484_v8, %v2467_v16  ;;  %v2568_v4 = vld [vmem:[%s8031_s9 + $0x40] sm:$0xff]  ;;  %v2590_v7 = vld [vmem:[%s8031_s9 + $0xf0] sm:$0xff]  ;;  %v2593_v8 = vld [vmem:[%s8031_s9 + $0x108] sm:$0xff]  ;;  %5626 = vmatprep.subr.bf16.mxu1 %v5625_v3 }
 0x4e2   :  { %v5511_v5 = vpack.c.bf16 %v2587_v50, %v2584_v49  ;;  %v5627_v13 = vpack.c.bf16 %v2571_v9, %v2568_v4  ;;  %v2622_v15 = vld [vmem:[%s8031_s9 + $0x1f0] sm:$0xff]  ;;  %v2625_v16 = vld [vmem:[%s8031_s9 + $0x208] sm:$0xff]  ;;  %v2600_v12 = vld [vmem:[%s8031_s9 + $0x140] sm:$0xff]  ;;  %v5515_v14 = vpack.c.bf16 %v2593_v8, %v2590_v7  ;;  %v5643_v3 = vpack.c.bf16 %v2595_v59, %v2592_v60 }
 0x4e3   :  { %v6055_v45 = vpack.i.bf16 %v6729_v20, %v6727_v19  ;;  %v6060_v57 = vpack.i.bf16 %v6731_v21, %v6733_v61  ;;  %v5629_v18 = vpack.c.bf16 %v2625_v16, %v2622_v15  ;;  %v5517_v25 = vpack.c.bf16 %v2600_v12, %v2597_v11  ;;  %v2608_v49 = vld [vmem:[%s8031_s9 + $0x180] sm:$0xff]  ;;  %v2611_v50 = vld [vmem:[%s8031_s9 + $0x198] sm:$0xff]  ;;  %v2646_v0 = vld [vmem:[%s8031_s9 + $0x2b0] sm:$0xff] }
 0x4e4   :  { %5512 = vmatpush1.bf16.msra.mxu0 %v5511_v5  ;;  %5628 = vmatpush3.bf16.msra.mxu1 %v5627_v13  ;;  %v5527_v2 = vpack.c.bf16 %v2611_v50, %v2608_v49  ;;  %v5529_v4 = vpack.c.bf16 %v2618_v62, %v2615_v53  ;;  %v2614_v5 = vld [vmem:[%s8031_s9 + $0x1b0] sm:$0xff]  ;;  %v2617_v7 = vld [vmem:[%s8031_s9 + $0x1c8] sm:$0xff]  ;;  %v5645_v8 = vpack.c.bf16 %v2649_v1, %v2646_v0  ;;  %v2620_v15 = vld [vmem:[%s8031_s9 + $0x1e0] sm:$0xff] }
 0x4e5   :  { %6056 = vrot.lane.b32.xlu0 %v6055_v45, %s6132_s24  ;;  %6061 = vrot.lane.b32.xlu1 %v6060_v57, %s6132_s24  ;;  %v2574_v45 = vld [vmem:[%s8031_s9 + $0x70] sm:$0xff]  ;;  %v2577_v57 = vld [vmem:[%s8031_s9 + $0x88] sm:$0xff]  ;;  %v5531_v11 = vpack.c.bf16 %v2617_v7, %v2614_v5 }
 0x4e6   :  { %v5631_v23 = vpack.c.bf16 %v2577_v57, %v2574_v45  ;;  %5514 = vmatprep.subr.bf16.mxu0 %v5513_v10  ;;  %5630 = vmatprep.subr.bf16.mxu1 %v5629_v18  ;;  %v2621_v9 = vld [vmem:[%s8031_s9 + $0x1e8] sm:$0xff]  ;;  %v2624_v10 = vld [vmem:[%s8031_s9 + $0x200] sm:$0xff]  ;;  %v2623_v16 = vld [vmem:[%s8031_s9 + $0x1f8] sm:$0xff] }
 0x4e7   :  { %v5533_v13 = vpack.c.bf16 %v2624_v10, %v2621_v9  ;;  %v2627_v12 = vld [vmem:[%s8031_s9 + $0x218] sm:$0xff]  ;;  %v2630_v18 = vld [vmem:[%s8031_s9 + $0x230] sm:$0xff]  ;;  %v5535_v45 = vpack.c.bf16 %v2623_v16, %v2620_v15  ;;  %v2648_v35 = vld [vmem:[%s8031_s9 + $0x2c0] sm:$0xff] }
 0x4e8   :  { %5516 = vmatpush1.bf16.msra.mxu0 %v5515_v14  ;;  %5632 = vmatpush3.bf16.msra.mxu1 %v5631_v23  ;;  %v5537_v57 = vpack.c.bf16 %v2630_v18, %v2627_v12  ;;  %v2629_v14 = vld [vmem:[%s8031_s9 + $0x228] sm:$0xff]  ;;  %v2647_v40 = vld [vmem:[%s8031_s9 + $0x2b8] sm:$0xff]  ;;  %v2654_v47 = vld [vmem:[%s8031_s9 + $0x2f0] sm:$0xff] }
 0x4e9   :  { %2515 = vrot.lane.b32.xlu0 %v6137_v37, %s6132_s24  ;;  %5518 = vmatprep.subr.bf16.mxu0 %v5517_v25  ;;  %v5539_v23 = vpack.c.bf16 %v2629_v14, %v2626_v63  ;;  %v2632_v25 = vld [vmem:[%s8031_s9 + $0x240] sm:$0xff]  ;;  %v2601_v43 = vld [vmem:[%s8031_s9 + $0x148] sm:$0xff]  ;;  %v2651_v46 = vld [vmem:[%s8031_s9 + $0x2d8] sm:$0xff] }
 0x4ea   :  { %5634 = vmatprep.subr.bf16.mxu1 %v5633_v27  ;;  %v2639_v27 = vld [vmem:[%s8031_s9 + $0x278] sm:$0xff]  ;;  %v5543_v30 = vpack.c.bf16 %v2635_v26, %v2632_v25  ;;  %v5553_v49 = vpack.c.bf16 %v2654_v47, %v2651_v46  ;;  %v2604_v60 = vld [vmem:[%s8031_s9 + $0x160] sm:$0xff]  ;;  %v2657_v0 = vld [vmem:[%s8031_s9 + $0x308] sm:$0xff] }
 0x4eb   :  { %v5545_v31 = vpack.c.bf16 %v2642_v29, %v2639_v27  ;;  %v2655_v50 = vld [vmem:[%s8031_s9 + $0x2f8] sm:$0xff]  ;;  %v2660_v1 = vld [vmem:[%s8031_s9 + $0x320] sm:$0xff]  ;;  %v2658_v26 = vld [vmem:[%s8031_s9 + $0x310] sm:$0xff] }
 0x4ec   :  { %5520 = vmatpush1.bf16.msra.mxu0 %v5519_v34  ;;  %5636 = vmatpush3.bf16.msra.mxu1 %v5635_v38  ;;  %v2645_v34 = vld [vmem:[%s8031_s9 + $0x2a8] sm:$0xff]  ;;  %v2607_v59 = vld [vmem:[%s8031_s9 + $0x178] sm:$0xff]  ;;  %v2712_v32 = vld [vmem:[%s8031_s9 + $0x4c0] sm:$0xff] }
 0x4ed   :  { %5522 = vmatprep.subr.bf16.mxu0 %v5521_v39  ;;  %5638 = vmatprep.subr.bf16.mxu1 %v5637_v41  ;;  %v5549_v38 = vpack.c.bf16 %v2648_v35, %v2645_v34  ;;  %v2644_v39 = vld [vmem:[%s8031_s9 + $0x2a0] sm:$0xff]  ;;  %v2598_v41 = vld [vmem:[%s8031_s9 + $0x130] sm:$0xff]  ;;  %v5651_v62 = vpack.c.bf16 %v2607_v59, %v2604_v60  ;;  %v2661_v27 = vld [vmem:[%s8031_s9 + $0x328] sm:$0xff] }
 0x4ee   :  { %v5551_v42 = vpack.c.bf16 %v2647_v40, %v2644_v39  ;;  %v5647_v44 = vpack.c.bf16 %v2601_v43, %v2598_v41  ;;  %v2663_v29 = vld [vmem:[%s8031_s9 + $0x338] sm:$0xff]  ;;  %v5655_v41 = vpack.c.bf16 %v2661_v27, %v2658_v26  ;;  %v2665_v43 = vld [vmem:[%s8031_s9 + $0x348] sm:$0xff] }
 0x4ef   :  { %v2715_v33 = vld [vmem:[%s8031_s9 + $0x4d8] sm:$0xff] }
 0x4f0   :  { %5524 = vmatpush1.bf16.msra.mxu0 %v5523_v48  ;;  %5640 = vmatpush3.bf16.msra.mxu1 %v5639_v51  ;;  %v2652_v48 = vld [vmem:[%s8031_s9 + $0x2e0] sm:$0xff]  ;;  %v2650_v51 = vld [vmem:[%s8031_s9 + $0x2d0] sm:$0xff]  ;;  %v2683_v26 = vld [vmem:[%s8031_s9 + $0x3d8] sm:$0xff] }
 0x4f1   :  { %5526 = vmatprep.subr.bf16.mxu0 %v5525_v52  ;;  %5642 = vmatprep.subr.bf16.mxu1 %v5641_v54  ;;  %v2653_v52 = vld [vmem:[%s8031_s9 + $0x2e8] sm:$0xff]  ;;  %v5649_v53 = vpack.c.bf16 %v2655_v50, %v2652_v48  ;;  %v5657_v48 = vpack.c.bf16 %v2715_v33, %v2712_v32  ;;  %v2667_v50 = vld [vmem:[%s8031_s9 + $0x358] sm:$0xff]  ;;  %v2690_v33 = vld [vmem:[%s8031_s9 + $0x410] sm:$0xff] }
 0x4f2   :  { %v5555_v54 = vpack.c.bf16 %v2653_v52, %v2650_v51  ;;  %v2669_v51 = vld [vmem:[%s8031_s9 + $0x368] sm:$0xff]  ;;  %v2672_v52 = vld [vmem:[%s8031_s9 + $0x380] sm:$0xff]  ;;  %v2687_v32 = vld [vmem:[%s8031_s9 + $0x3f8] sm:$0xff] }
 0x4f4   :  { %5528 = vmatpush1.bf16.msra.mxu0 %v5527_v2  ;;  %5644 = vmatpush3.bf16.msra.mxu1 %v5643_v3  ;;  %v2706_v2 = vld [vmem:[%s8031_s9 + $0x490] sm:$0xff]  ;;  %v5557_v3 = vpack.c.bf16 %v2660_v1, %v2657_v0  ;;  %v2668_v1 = vld [vmem:[%s8031_s9 + $0x360] sm:$0xff] }
 0x4f5   :  { %5530 = vmatprep.subr.bf16.mxu0 %v5529_v4  ;;  %5646 = vmatprep.subr.bf16.mxu1 %v5645_v8  ;;  %v2709_v4 = vld [vmem:[%s8031_s9 + $0x4a8] sm:$0xff] }
 0x4f6   :  { %v5653_v8 = vpack.c.bf16 %v2709_v4, %v2706_v2  ;;  %v2671_v2 = vld [vmem:[%s8031_s9 + $0x378] sm:$0xff] }
 0x4f8   :  { %5532 = vmatpush1.bf16.msra.mxu0 %v5531_v11  ;;  %5648 = vmatpush3.bf16.msra.mxu1 %v5647_v44 }
 0x4f9   :  { %5534 = vmatprep.subr.bf16.mxu0 %v5533_v13  ;;  %5650 = vmatprep.subr.bf16.mxu1 %v5649_v53  ;;  %v2718_v53 = vld [vmem:[%s8031_s9 + $0x4f0] sm:$0xff] }
 0x4fc   :  { %5536 = vmatpush1.bf16.msra.mxu0 %v5535_v45  ;;  %5652 = vmatpush3.bf16.msra.mxu1 %v5651_v62 }
 0x4fd   :  { %5538 = vmatprep.subr.bf16.mxu0 %v5537_v57  ;;  %5654 = vmatprep.subr.bf16.mxu1 %v5653_v8  ;;  %v2675_v8 = vld [vmem:[%s8031_s9 + $0x398] sm:$0xff] }
 0x500   :  { %5540 = vmatpush1.bf16.msra.mxu0 %v5539_v23 }
 0x501   :  { %5542 = vmatprep.subr.bf16.mxu0 %v5541_v24 }
 0x504   :  { %5544 = vmatpush1.bf16.msra.mxu0 %v5543_v30 }
 0x505   :  { %5546 = vmatprep.subr.bf16.mxu0 %v5545_v31  ;;  %v2666_v31 = vld [vmem:[%s8031_s9 + $0x350] sm:$0xff] }
 0x506   :  { %v5561_v47 = vpack.c.bf16 %v2666_v31, %v2663_v29  ;;  %v2685_v31 = vld [vmem:[%s8031_s9 + $0x3e8] sm:$0xff] }
 0x508   :  { %5548 = vmatpush1.bf16.msra.mxu0 %v5547_v36 }
 0x509   :  { %5550 = vmatprep.subr.bf16.mxu0 %v5549_v38 }
 0x50c   :  { %5552 = vmatpush1.bf16.msra.mxu0 %v5551_v42  ;;  %v2662_v42 = vld [vmem:[%s8031_s9 + $0x330] sm:$0xff] }
 0x50d   :  { %5554 = vmatprep.subr.bf16.mxu0 %v5553_v49  ;;  %v2664_v49 = vld [vmem:[%s8031_s9 + $0x340] sm:$0xff]  ;;  %v5563_v62 = vpack.c.bf16 %v2665_v43, %v2662_v42  ;;  %v5577_v42 = vpack.c.bf16 %v2690_v33, %v2687_v32  ;;  %v2726_v32 = vld [vmem:[%s8031_s9 + $0x530] sm:$0xff] }
 0x50e   :  { %v5659_v0 = vpack.c.bf16 %v2667_v50, %v2664_v49  ;;  %v2696_v49 = vld [vmem:[%s8031_s9 + $0x440] sm:$0xff]  ;;  %v2742_v50 = vld [vmem:[%s8031_s9 + $0x5b0] sm:$0xff] }
 0x510   :  { %5556 = vmatpush1.bf16.msra.mxu0 %v5555_v54  ;;  %v2721_v54 = vld [vmem:[%s8031_s9 + $0x508] sm:$0xff] }
 0x511   :  { %5558 = vmatprep.subr.bf16.mxu0 %v5557_v3  ;;  %v5565_v3 = vpack.c.bf16 %v2672_v52, %v2669_v51  ;;  %v5661_v4 = vpack.c.bf16 %v2721_v54, %v2718_v53  ;;  %v2745_v51 = vld [vmem:[%s8031_s9 + $0x5c8] sm:$0xff]  ;;  %v2692_v54 = vld [vmem:[%s8031_s9 + $0x420] sm:$0xff] }
 0x557   :  { %v6057_v5 = vpop.permute.xlu0 %6056  ;;  %v6062_v7 = vpop.permute.xlu1 %6061 }
 0x558   :  { %v6059_v9 = vunpack.i.h.bf16 %v6057_v5  ;;  %v6058_v10 = vunpack.i.l.bf16 %v6057_v5  ;;  %v6064_v11 = vunpack.i.h.bf16 %v6062_v7  ;;  %v6063_v13 = vunpack.i.l.bf16 %v6062_v7  ;;  %v2670_v5 = vld [vmem:[%s8031_s9 + $0x370] sm:$0xff]  ;;  %v2673_v7 = vld [vmem:[%s8031_s9 + $0x388] sm:$0xff] }
 0x55a   :  { %v2519_v15 = vsel %vm773_vm6, %v6058_v10, %v6059_v9  ;;  %v2520_v16 = vsel %vm773_vm6, %v6059_v9, %v6063_v13  ;;  %v2518_v12 = vsel %vm773_vm6, %v6064_v11, %v6058_v10  ;;  %v2678_v9 = vld [vmem:[%s8031_s9 + $0x3b0] sm:$0xff]  ;;  %v2724_v10 = vld [vmem:[%s8031_s9 + $0x520] sm:$0xff]  ;;  %v2727_v11 = vld [vmem:[%s8031_s9 + $0x538] sm:$0xff] }
 0x55b   :  { %v2527_v18 = vmax.f32 %v6727_v19, %v2519_v15  ;;  %v7048_v45 = vmax.f32 %v6729_v20, %v2520_v16  ;;  %v2516_v57 = vpop.permute.xlu0 %2515  ;;  %v2526_v63 = vmax.f32 %v6731_v21, %v2518_v12  ;;  %v2656_v20 = vld [vmem:[%s8031_s9 + $0x300] sm:$0xff]  ;;  %v2659_v21 = vld [vmem:[%s8031_s9 + $0x318] sm:$0xff]  ;;  %v5663_v15 = vpack.c.bf16 %v2673_v7, %v2670_v5  ;;  %v2674_v16 = vld [vmem:[%s8031_s9 + $0x390] sm:$0xff] }
 0x55c   :  { %v2521_v14 = vsel %vm773_vm6, %v6063_v13, %v2516_v57  ;;  %v2531_v22 = vmax.f32 %v2516_v57, 0.0  ;;  %v5559_v40 = vpack.c.bf16 %v2659_v21, %v2656_v20  ;;  %v5567_v13 = vpack.c.bf16 %v2671_v2, %v2668_v1  ;;  %v2677_v12 = vld [vmem:[%s8031_s9 + $0x3a8] sm:$0xff]  ;;  %v2699_v2 = vld [vmem:[%s8031_s9 + $0x458] sm:$0xff] }
 0x55d   :  { %v2529_v17 = vmax.f32 %v6733_v61, %v2521_v14  ;;  %2537 = vrot.lane.b32.xlu0 %v2526_v63, %s6134_s0  ;;  %v6065_v23 = vpack.i.bf16 %v7048_v45, %v2527_v18  ;;  %v5665_v57 = vpack.c.bf16 %v2727_v11, %v2724_v10  ;;  %v2679_v14 = vld [vmem:[%s8031_s9 + $0x3b8] sm:$0xff]  ;;  %v5571_v20 = vpack.c.bf16 %v2677_v12, %v2674_v16  ;;  %v2697_v1 = vld [vmem:[%s8031_s9 + $0x448] sm:$0xff] }
 0x55e   :  { %v2751_v5 = vld [vmem:[%s8031_s9 + $0x5f8] sm:$0xff]  ;;  %v2705_v12 = vld [vmem:[%s8031_s9 + $0x488] sm:$0xff] }
 0x55f   :  { %6066 = vrot.lane.b32.xlu1 %v6065_v23, %s6134_s0  ;;  %v6070_v24 = vpack.i.bf16 %v2531_v22, %v2529_v17  ;;  %v2684_v22 = vld [vmem:[%s8031_s9 + $0x3e0] sm:$0xff]  ;;  %v2730_v23 = vld [vmem:[%s8031_s9 + $0x550] sm:$0xff]  ;;  %v2703_v16 = vld [vmem:[%s8031_s9 + $0x478] sm:$0xff] }
 0x563   :  { %6071 = vrot.lane.b32.xlu1 %v6070_v24, %s6134_s0  ;;  %v2733_v24 = vld [vmem:[%s8031_s9 + $0x568] sm:$0xff]  ;;  %s6143_s0 = smov 115  }
 0x564   :  { %v5669_v29 = vpack.c.bf16 %v2733_v24, %v2730_v23  ;;  %v2711_v24 = vld [vmem:[%s8031_s9 + $0x4b8] sm:$0xff] }
 0x5cf   :  { %v2538_v30 = vpop.permute.xlu0 %2537 }
 0x5d1   :  { %v7057_v19 = vpop.permute.xlu1 %6066 }
 0x5d2   :  { %v6069_v61 = vunpack.i.h.bf16 %v7057_v19  ;;  %v6068_v25 = vunpack.i.l.bf16 %v7057_v19  ;;  %v2710_v19 = vld [vmem:[%s8031_s9 + $0x4b0] sm:$0xff] }
 0x5d4   :  { %v2548_v34 = vsel %vm1037_vm8, %v2538_v30, %v6068_v25  ;;  %v2549_v35 = vsel %vm1037_vm8, %v6068_v25, %v6069_v61  ;;  %v2680_v25 = vld [vmem:[%s8031_s9 + $0x3c0] sm:$0xff]  ;;  %v2682_v30 = vld [vmem:[%s8031_s9 + $0x3d0] sm:$0xff] }
 0x5d5   :  { %v2556_v36 = vmax.f32 %v2526_v63, %v2548_v34  ;;  %v7089_v38 = vpop.permute.xlu1 %6071  ;;  %v2557_v39 = vmax.f32 %v2527_v18, %v2549_v35  ;;  %v5569_v18 = vpack.c.bf16 %v2678_v9, %v2675_v8  ;;  %v2676_v63 = vld [vmem:[%s8031_s9 + $0x3a0] sm:$0xff]  ;;  %v2739_v35 = vld [vmem:[%s8031_s9 + $0x598] sm:$0xff]  ;;  %v2698_v9 = vld [vmem:[%s8031_s9 + $0x450] sm:$0xff] }
 0x5d6   :  { %v6074_v44 = vunpack.i.h.bf16 %v7089_v38  ;;  %v6073_v46 = vunpack.i.l.bf16 %v7089_v38  ;;  %v5667_v21 = vpack.c.bf16 %v2679_v14, %v2676_v63  ;;  %v2736_v34 = vld [vmem:[%s8031_s9 + $0x580] sm:$0xff]  ;;  %v2717_v38 = vld [vmem:[%s8031_s9 + $0x4e8] sm:$0xff] }
 0x5d7   :  { %2816 = vmatprep.mubr.f32.mxu0 %v2557_v39  ;;  %2958 = vmatprep.mubr.f32.mxu1 %v2557_v39  ;;  %v5671_v39 = vpack.c.bf16 %v2685_v31, %v2682_v30  ;;  %v5673_v43 = vpack.c.bf16 %v2739_v35, %v2736_v34  ;;  %v2719_v30 = vld [vmem:[%s8031_s9 + $0x4f8] sm:$0xff]  ;;  %v2722_v35 = vld [vmem:[%s8031_s9 + $0x510] sm:$0xff] }
 0x5d8   :  { %2817 = vmatmul.mubr.f32.vlgmr.msra.gmra.mrb[8].mxu0 %v2556_v36  ;;  %2959 = vmatmul.mubr.f32.vlgmr.msra.gmra.mrb[12].mxu1 %v2556_v36  ;;  %v2551_v60 = vsel %vm1037_vm8, %v6073_v46, %v6074_v44  ;;  %v5575_v36 = vpack.c.bf16 %v2683_v26, %v2680_v25  ;;  %v2688_v44 = vld [vmem:[%s8031_s9 + $0x400] sm:$0xff]  ;;  %v2550_v23 = vsel %vm1037_vm8, %v6069_v61, %v6073_v46  ;;  %v2713_v61 = vld [vmem:[%s8031_s9 + $0x4c8] sm:$0xff]  ;;  %v2723_v31 = vld [vmem:[%s8031_s9 + $0x518] sm:$0xff]  ;;  %vm4702_vm8 = vcmask 73728  }
 0x5d9   :  { %5560 = vmatpush1.bf16.msra.mxu0 %v5559_v40  ;;  %5656 = vmatpush3.bf16.msra.mxu1 %v5655_v41  ;;  %v2559_v59 = vmax.f32 %v2529_v17, %v2551_v60  ;;  %v2681_v17 = vld [vmem:[%s8031_s9 + $0x3c8] sm:$0xff]  ;;  %v2686_v40 = vld [vmem:[%s8031_s9 + $0x3f0] sm:$0xff]  ;;  %v2695_v60 = vld [vmem:[%s8031_s9 + $0x438] sm:$0xff]  ;;  %v2558_v25 = vmax.f32 %v7048_v45, %v2550_v23  ;;  %v5595_v46 = vpack.c.bf16 %v2713_v61, %v2710_v19 }
 0x5da   :  { %5562 = vmatprep.subr.bf16.mxu0 %v5561_v47  ;;  %5658 = vmatprep.subr.bf16.mxu1 %v5657_v48  ;;  %v5573_v27 = vpack.c.bf16 %v2684_v22, %v2681_v17  ;;  %v2689_v41 = vld [vmem:[%s8031_s9 + $0x408] sm:$0xff]  ;;  %v2691_v47 = vld [vmem:[%s8031_s9 + $0x418] sm:$0xff]  ;;  %v5583_v7 = vpack.c.bf16 %v2695_v60, %v2692_v54  ;;  %v2704_v17 = vld [vmem:[%s8031_s9 + $0x480] sm:$0xff]  ;;  %v5601_v34 = vpack.c.bf16 %v2726_v32, %v2723_v31 }
 0x5db   :  { %2887 = vmatprep.mubr.f32.mxu0 %v2559_v59  ;;  %3028 = vmatprep.mubr.f32.mxu1 %v2559_v59  ;;  %v2693_v48 = vld [vmem:[%s8031_s9 + $0x428] sm:$0xff]  ;;  %v5579_v52 = vpack.c.bf16 %v2689_v41, %v2686_v40  ;;  %v5675_v53 = vpack.c.bf16 %v2691_v47, %v2688_v44  ;;  %v2707_v22 = vld [vmem:[%s8031_s9 + $0x498] sm:$0xff]  ;;  %v2720_v45 = vld [vmem:[%s8031_s9 + $0x500] sm:$0xff] }
 0x5dc   :  { %v5581_v59 = vpack.c.bf16 %v2696_v49, %v2693_v48  ;;  %v2732_v40 = vld [vmem:[%s8031_s9 + $0x560] sm:$0xff]  ;;  %v2731_v44 = vld [vmem:[%s8031_s9 + $0x558] sm:$0xff]  ;;  %v2738_v48 = vld [vmem:[%s8031_s9 + $0x590] sm:$0xff] }
 0x5dd   :  { %5564 = vmatpush1.bf16.msra.mxu0 %v5563_v62  ;;  %5660 = vmatpush3.bf16.msra.mxu1 %v5659_v0  ;;  %v5677_v62 = vpack.c.bf16 %v2745_v51, %v2742_v50  ;;  %v2694_v0 = vld [vmem:[%s8031_s9 + $0x430] sm:$0xff]  ;;  %v2735_v47 = vld [vmem:[%s8031_s9 + $0x578] sm:$0xff]  ;;  %v2744_v54 = vld [vmem:[%s8031_s9 + $0x5c0] sm:$0xff] }
 0x5de   :  { %5566 = vmatprep.subr.bf16.mxu0 %v5565_v3  ;;  %5662 = vmatprep.subr.bf16.mxu1 %v5661_v4  ;;  %v2702_v3 = vld [vmem:[%s8031_s9 + $0x470] sm:$0xff]  ;;  %v2748_v4 = vld [vmem:[%s8031_s9 + $0x5e0] sm:$0xff]  ;;  %v5679_v8 = vpack.c.bf16 %v2697_v1, %v2694_v0  ;;  %v5609_v50 = vpack.c.bf16 %v2738_v48, %v2735_v47  ;;  %v2743_v0 = vld [vmem:[%s8031_s9 + $0x5b8] sm:$0xff] }
 0x5df   :  { %v5585_v10 = vpack.c.bf16 %v2702_v3, %v2699_v2  ;;  %v5681_v11 = vpack.c.bf16 %v2751_v5, %v2748_v4  ;;  %v2734_v51 = vld [vmem:[%s8031_s9 + $0x570] sm:$0xff]  ;;  %v2747_v1 = vld [vmem:[%s8031_s9 + $0x5d8] sm:$0xff]  ;;  %v3048_v31 = vld [vmem:[%s8032_s10] sm:$0x3] }
 0x5e0   :  { %v2750_v2 = vld [vmem:[%s8031_s9 + $0x5f0] sm:$0xff] }
 0x5e1   :  { %5568 = vmatpush1.bf16.msra.mxu0 %v5567_v13  ;;  %5664 = vmatpush3.bf16.msra.mxu1 %v5663_v15  ;;  %v2701_v13 = vld [vmem:[%s8031_s9 + $0x468] sm:$0xff]  ;;  %v2700_v15 = vld [vmem:[%s8031_s9 + $0x460] sm:$0xff]  ;;  %v5617_v4 = vpack.c.bf16 %v2750_v2, %v2747_v1  ;;  %v2746_v5 = vld [vmem:[%s8031_s9 + $0x5d0] sm:$0xff] }
 0x5e2   :  { %5570 = vmatprep.subr.bf16.mxu0 %v5569_v18  ;;  %5666 = vmatprep.subr.bf16.mxu1 %v5665_v57  ;;  %v2708_v18 = vld [vmem:[%s8031_s9 + $0x4a0] sm:$0xff]  ;;  %v5587_v57 = vpack.c.bf16 %v2701_v13, %v2698_v9  ;;  %v5683_v63 = vpack.c.bf16 %v2703_v16, %v2700_v15 }
 0x5e3   :  { %v5589_v14 = vpack.c.bf16 %v2708_v18, %v2705_v12 }
 0x5e5   :  { %5572 = vmatpush1.bf16.msra.mxu0 %v5571_v20  ;;  %5668 = vmatpush3.bf16.msra.mxu1 %v5667_v21  ;;  %v2714_v20 = vld [vmem:[%s8031_s9 + $0x4d0] sm:$0xff]  ;;  %v5591_v21 = vpack.c.bf16 %v2707_v22, %v2704_v17 }
 0x5e6   :  { %5574 = vmatprep.subr.bf16.mxu0 %v5573_v27  ;;  %5670 = vmatprep.subr.bf16.mxu1 %v5669_v29  ;;  %v5593_v26 = vpack.c.bf16 %v2714_v20, %v2711_v24  ;;  %v5597_v27 = vpack.c.bf16 %v2720_v45, %v2717_v38  ;;  %v2716_v29 = vld [vmem:[%s8031_s9 + $0x4e0] sm:$0xff] }
 0x5e7   :  { %v5599_v33 = vpack.c.bf16 %v2719_v30, %v2716_v29 }
 0x5e9   :  { %5576 = vmatpush1.bf16.msra.mxu0 %v5575_v36  ;;  %5672 = vmatpush3.bf16.msra.mxu1 %v5671_v39  ;;  %v2725_v36 = vld [vmem:[%s8031_s9 + $0x528] sm:$0xff] }
 0x5ea   :  { %5578 = vmatprep.subr.bf16.mxu0 %v5577_v42  ;;  %5674 = vmatprep.subr.bf16.mxu1 %v5673_v43  ;;  %v2729_v39 = vld [vmem:[%s8031_s9 + $0x548] sm:$0xff]  ;;  %v5603_v41 = vpack.c.bf16 %v2725_v36, %v2722_v35  ;;  %v2728_v43 = vld [vmem:[%s8031_s9 + $0x540] sm:$0xff] }
 0x5eb   :  { %v5605_v42 = vpack.c.bf16 %v2732_v40, %v2729_v39  ;;  %v5607_v49 = vpack.c.bf16 %v2731_v44, %v2728_v43 }
 0x5ed   :  { %5580 = vmatpush1.bf16.msra.mxu0 %v5579_v52  ;;  %5676 = vmatpush3.bf16.msra.mxu1 %v5675_v53  ;;  %v2737_v52 = vld [vmem:[%s8031_s9 + $0x588] sm:$0xff] }
 0x5ee   :  { %5582 = vmatprep.subr.bf16.mxu0 %v5581_v59  ;;  %5678 = vmatprep.subr.bf16.mxu1 %v5677_v62  ;;  %v2741_v53 = vld [vmem:[%s8031_s9 + $0x5a8] sm:$0xff]  ;;  %v5611_v60 = vpack.c.bf16 %v2737_v52, %v2734_v51  ;;  %v2740_v62 = vld [vmem:[%s8031_s9 + $0x5a0] sm:$0xff] }
 0x5ef   :  { %v5613_v59 = vpack.c.bf16 %v2744_v54, %v2741_v53  ;;  %v5615_v3 = vpack.c.bf16 %v2743_v0, %v2740_v62 }
 0x5f1   :  { %5584 = vmatpush1.bf16.msra.mxu0 %v5583_v7  ;;  %5680 = vmatpush3.bf16.msra.mxu1 %v5679_v8  ;;  %v2749_v7 = vld [vmem:[%s8031_s9 + $0x5e8] sm:$0xff]  ;;  %s6138_s9 = smov 13  }
 0x5f2   :  { %5586 = vmatprep.subr.bf16.mxu0 %v5585_v10  ;;  %5682 = vmatprep.subr.bf16.mxu1 %v5681_v11  ;;  %v5619_v8 = vpack.c.bf16 %v2749_v7, %v2746_v5  ;;  %v5156_v7 = vld [vmem:[%s8032_s10 + $0x6] sm:$0x3] }
 0x5f5   :  { %5588 = vmatpush1.bf16.msra.mxu0 %v5587_v57  ;;  %5684 = vmatpush3.bf16.msra.mxu1 %v5683_v63 }
 0x5f6   :  { %5590 = vmatprep.subr.bf16.mxu0 %v5589_v14  ;;  %5351 = vmatprep.subr.bf16.mxu1 %v6137_v37 }
 0x5f8   :  { %3029 = vmatmul.mubr.f32.vlgmr.msra.gmra.mrb[14].mxu1 %v2558_v25 }
 0x5f9   :  { %5592 = vmatpush1.bf16.msra.mxu0 %v5591_v21  ;;  %5353 = vmatprep.mubr.msk.bf16.mxu1 %vm6139_vm11, %v6137_v37 }
 0x5fa   :  { %5594 = vmatprep.subr.bf16.mxu0 %v5593_v26  ;;  %v7418_v26 = vld [vmem:[%s8032_s10 + $0x2] sm:$0x3] }
 0x5fd   :  { %5596 = vmatpush1.bf16.msra.mxu0 %v5595_v46 }
 0x5fe   :  { %5598 = vmatprep.subr.bf16.mxu0 %v5597_v27 }
 0x601   :  { %5600 = vmatpush1.bf16.msra.mxu0 %v5599_v33  ;;  %v7428_v33 = vld [vmem:[#allocation3] sm:$0xff] }
 0x602   :  { %5602 = vmatprep.subr.bf16.mxu0 %v5601_v34 }
 0x605   :  { %5604 = vmatpush1.bf16.msra.mxu0 %v5603_v41 }
 0x606   :  { %5606 = vmatprep.subr.bf16.mxu0 %v5605_v42 }
 0x609   :  { %5608 = vmatpush1.bf16.msra.mxu0 %v5607_v49 }
 0x60a   :  { %5610 = vmatprep.subr.bf16.mxu0 %v5609_v50  ;;  %v5152_v50 = vld [vmem:[%s8032_s10 + $0x4] sm:$0x3] }
 0x60d   :  { %5612 = vmatpush1.bf16.msra.mxu0 %v5611_v60 }
 0x60e   :  { %5614 = vmatprep.subr.bf16.mxu0 %v5613_v59 }
 0x611   :  { %5616 = vmatpush1.bf16.msra.mxu0 %v5615_v3 }
 0x612   :  { %5618 = vmatprep.subr.bf16.mxu0 %v5617_v4 }
 0x615   :  { %5620 = vmatpush1.bf16.msra.mxu0 %v5619_v8 }
 0x618   :  { %2888 = vmatmul.mubr.f32.vlgmr.msra.gmra.mrb[8].mxu0 %v2558_v25 }
 0x619   :  { %3111 = vmatprep.mubr.bf16.mxu0 %v6128_v6 }
 0x6ab   :  { %v5255_v9 = vpop.f32.mrb[12].mxu1 }
 0x6ac   :  { %v5256_v10 = vpop.f32.mrb[13].mxu1 }
 0x6ad   :  { %v5257_v11 = vadd.f32 %v5256_v10, %v5255_v9 }
 0x6cb   :  { %v5290_v13 = vpop.f32.mrb[14].mxu1 }
 0x6cc   :  { %v5291_v15 = vpop.f32.mrb[15].mxu1 }
 0x6cd   :  { %v5292_v16 = vadd.f32 %v5291_v15, %v5290_v13 }
 0x6cf   :  { %v3031_v12 = vadd.f32 %v5292_v16, %v5257_v11 }
 0x6d1   :  { %3036 = vst.msk [vmem:[#allocation3 + $0x18] sm:$0xff] %vm74_vm10, %v3031_v12 }
 0x6d8   :  { %v3043_v18 = vld [vmem:[#allocation3 + $0x18] sm:$0xff] }
 0x6d9   :  { %v7357_v57 = vpack.c.bf16 %v3043_v18, %v3043_v18 }
 0x6db   :  { %3061 = vrot.lane.b32.xlu1 %v7357_v57, %s6138_s9 }
 0x6eb   :  { %v2889_v63 = vpop.f32.mrb[8].mxu0 }
 0x6ec   :  { %3034 = vst [vmem:[#allocation3 + $0x8] sm:$0xff] %v2889_v63  ;;  %v7363_v14 = vpack.c.bf16 %v2889_v63, %v2889_v63  ;;  %v2891_v17 = vpop.f32.mrb[9].mxu0 }
 0x6ed   :  { %3035 = vst [vmem:[#allocation3 + $0x10] sm:$0xff] %v2891_v17  ;;  %v7365_v22 = vpack.c.bf16 %v2891_v17, %v2891_v17  ;;  %v5160_v17 = vld [vmem:[%s8032_s10 + $0x8] sm:$0x3] }
 0x6ee   :  { %3162 = vrot.lane.b32.xlu1 %v7363_v14, %s6140_s19  ;;  %v3490_v63 = vsel %vm126_vm1, %v7363_v14, 0 }
 0x6ef   :  { %3059 = vrot.lane.b32.xlu0 %v7365_v22, %s6138_s9 }
 0x6f2   :  { %3166 = vrot.lane.b32.xlu1 %v7357_v57, %s6140_s19 }
 0x6f3   :  { %3160 = vrot.lane.b32.xlu0 %v6136_v28, %s6140_s19 }
 0x6f6   :  { %3269 = vrot.lane.b32.xlu1 %v7363_v14, %s6141_s28 }
 0x6f7   :  { %3164 = vrot.lane.b32.xlu0 %v7365_v22, %s6140_s19 }
 0x6fa   :  { %3273 = vrot.lane.b32.xlu1 %v7357_v57, %s6141_s28 }
 0x6fb   :  { %3267 = vrot.lane.b32.xlu0 %v6136_v28, %s6141_s28 }
 0x6fe   :  { %3379 = vrot.lane.b32.xlu1 %v7363_v14, %s6131_s1 }
 0x6ff   :  { %3271 = vrot.lane.b32.xlu0 %v7365_v22, %s6141_s28 }
 0x702   :  { %3383 = vrot.lane.b32.xlu1 %v7357_v57, %s6131_s1 }
 0x703   :  { %3377 = vrot.lane.b32.xlu0 %v6136_v28, %s6131_s1 }
 0x706   :  { %3586 = vrot.lane.b32.xlu1 %v7365_v22, %s6132_s24 }
 0x707   :  { %3381 = vrot.lane.b32.xlu0 %v7365_v22, %s6131_s1 }
 0x70a   :  { %3690 = vrot.lane.b32.xlu1 %v7363_v14, %s6142_s26 }
 0x70b   :  { %3584 = vrot.lane.b32.xlu0 %v7363_v14, %s6132_s24 }
 0x70e   :  { %3694 = vrot.lane.b32.xlu1 %v7357_v57, %s6142_s26 }
 0x70f   :  { %3588 = vrot.lane.b32.xlu0 %v7357_v57, %s6132_s24 }
 0x712   :  { %3799 = vrot.lane.b32.xlu1 %v7365_v22, %s6143_s0 }
 0x713   :  { %3692 = vrot.lane.b32.xlu0 %v7365_v22, %s6142_s26 }
 0x716   :  { %3904 = vrot.lane.b32.xlu1 %v7363_v14, %s6144_s6 }
 0x717   :  { %3797 = vrot.lane.b32.xlu0 %v7363_v14, %s6143_s0 }
 0x71a   :  { %3908 = vrot.lane.b32.xlu1 %v7357_v57, %s6144_s6 }
 0x71b   :  { %3801 = vrot.lane.b32.xlu0 %v7357_v57, %s6143_s0 }
 0x71e   :  { %3057 = vrot.lane.b32.xlu1 %v7363_v14, %s6138_s9 }
 0x71f   :  { %3906 = vrot.lane.b32.xlu0 %v7365_v22, %s6144_s6 }
 0x723   :  { %3055 = vrot.lane.b32.xlu0 %v6136_v28, %s6138_s9 }
 0x74d   :  { %v3062_v37 = vpop.permute.xlu1 %3061 }
 0x760   :  { %v3163_v23 = vpop.permute.xlu1 %3162 }
 0x761   :  { %v7410_v24 = vpop.permute.xlu0 %3059 }
 0x762   :  { %v3066_v20 = vsel %vm3063_vm12, %v7410_v24, %v3062_v37 }
 0x763   :  { %v3077_v21 = vsel %vm126_vm1, %v3066_v20, 0 }
 0x764   :  { %5352 = vmatpush3.bf16.msra.mxu1 %v3077_v21  ;;  %v3167_v25 = vpop.permute.xlu1 %3166 }
 0x765   :  { %v3161_v19 = vpop.permute.xlu0 %3160 }
 0x766   :  { %v3169_v61 = vsel %vm3168_vm13, %v3161_v19, %v3163_v23 }
 0x767   :  { %5354 = vmatmul.mubr.msk.bf16.vlgmr.msra.gmra.mrb[16].mxu1 %vm122_vm2, %v7418_v26  ;;  %v3176_v27 = vsel %vm126_vm1, %v3169_v61, 0 }
 0x768   :  { %v3270_v38 = vpop.permute.xlu1 %3269  ;;  %3216 = vmatprep.mubr.bf16.mxu1 %v6128_v6 }
 0x769   :  { %v3165_v45 = vpop.permute.xlu0 %3164 }
 0x76a   :  { %v3170_v46 = vsel %vm3168_vm13, %v3163_v23, %v3165_v45  ;;  %v3171_v29 = vsel %vm3168_vm13, %v3165_v45, %v3167_v25 }
 0x76b   :  { %5149 = vmatprep.subr.msk.bf16.mxu1 %vm126_vm1, %v3170_v46  ;;  %v3182_v34 = vsel %vm126_vm1, %v3171_v29, 0  ;;  %v5172_v46 = vld [vmem:[%s8032_s10 + $0xe] sm:$0x3] }
 0x76c   :  { %v3274_v30 = vpop.permute.xlu1 %3273  ;;  %3185 = vmatpush1.bf16.msra.mxu1 %v3176_v27 }
 0x76d   :  { %v3268_v32 = vpop.permute.xlu0 %3267  ;;  %5357 = vmatprep.subr.bf16.mxu1 %v7428_v33 }
 0x76e   :  { %v3276_v40 = vsel %vm3275_vm14, %v3268_v32, %v3270_v38 }
 0x76f   :  { %5150 = vmatmul.mubr.msk.bf16.vlgmr.msra.gmra.mrb[20].mxu1 %vm122_vm2, %v3048_v31  ;;  %v3283_v43 = vsel %vm126_vm1, %v3276_v40, 0 }
 0x770   :  { %v3380_v35 = vpop.permute.xlu1 %3379  ;;  %5358 = vmatpush3.bf16.msra.mxu1 %v3182_v34  ;;  %5359 = vmatprep.mubr.msk.bf16.mxu1 %vm6139_vm11, %v7428_v33 }
 0x771   :  { %v3272_v36 = vpop.permute.xlu0 %3271 }
 0x772   :  { %v3277_v39 = vsel %vm3275_vm14, %v3270_v38, %v3272_v36  ;;  %v3278_v48 = vsel %vm3275_vm14, %v3272_v36, %v3274_v30 }
 0x773   :  { %5153 = vmatprep.subr.msk.bf16.mxu1 %vm126_vm1, %v3277_v39  ;;  %v3289_v52 = vsel %vm126_vm1, %v3278_v48, 0 }
 0x774   :  { %v3384_v41 = vpop.permute.xlu1 %3383 }
 0x775   :  { %v3378_v42 = vpop.permute.xlu0 %3377 }
 0x776   :  { %v3385_v59 = vsel %vm496_vm5, %v3378_v42, %v3380_v35 }
 0x777   :  { %5360 = vmatmul.mubr.msk.bf16.vlgmr.msra.gmra.mrb[16].mxu1 %vm122_vm2, %v3048_v31  ;;  %v3392_v1 = vsel %vm126_vm1, %v3385_v59, 0  ;;  %v5176_v31 = vld [vmem:[%s8032_s10 + $0x10] sm:$0x3] }
 0x778   :  { %3292 = vmatpush1.bf16.msra.mxu1 %v3283_v43  ;;  %v3587_v44 = vpop.permute.xlu1 %3586  ;;  %3323 = vmatprep.mubr.bf16.mxu1 %v6128_v6 }
 0x779   :  { %v3382_v47 = vpop.permute.xlu0 %3381  ;;  %5363 = vmatprep.subr.bf16.mxu1 %v7428_v33 }
 0x77a   :  { %v3386_v53 = vsel %vm496_vm5, %v3380_v35, %v3382_v47  ;;  %v3387_v4 = vsel %vm496_vm5, %v3382_v47, %v3384_v41 }
 0x77b   :  { %v3398_v9 = vsel %vm126_vm1, %v3387_v4, 0 }
 0x77c   :  { %v7440_v49 = vpop.permute.xlu1 %3690 }
 0x77d   :  { %v3585_v51 = vpop.permute.xlu0 %3584 }
 0x77e   :  { %v3590_v37 = vsel %vm773_vm6, %v3585_v51, %v3587_v44 }
 0x77f   :  { %5154 = vmatmul.mubr.msk.bf16.vlgmr.msra.gmra.mrb[20].mxu1 %vm122_vm2, %v5152_v50  ;;  %v3596_v23 = vsel %vm126_vm1, %v3590_v37, 0  ;;  %v4144_v37 = vld [vmem:[%s8036_s14 + $0x58] sm:$0xff] }
 0x780   :  { %5364 = vmatpush3.bf16.msra.mxu1 %v3289_v52  ;;  %v7448_v54 = vpop.permute.xlu1 %3694  ;;  %5365 = vmatprep.mubr.msk.bf16.mxu1 %vm6139_vm11, %v7428_v33 }
 0x781   :  { %5157 = vmatprep.subr.msk.bf16.mxu1 %vm126_vm1, %v3386_v53  ;;  %v3589_v60 = vpop.permute.xlu0 %3588  ;;  %v3709_v19 = vsel %vm126_vm1, %v7448_v54, 0 }
 0x782   :  { %v3591_v14 = vsel %vm773_vm6, %v3587_v44, %v3589_v60 }
 0x784   :  { %v7454_v62 = vpop.permute.xlu1 %3799 }
 0x785   :  { %v3693_v0 = vpop.permute.xlu0 %3692 }
 0x786   :  { %v3698_v20 = vsel %vm3696_vm0, %v3693_v0, %v7448_v54  ;;  %v3697_v21 = vsel %vm3696_vm0, %v7440_v49, %v3693_v0 }
 0x787   :  { %5366 = vmatmul.mubr.msk.bf16.vlgmr.msra.gmra.mrb[16].mxu1 %vm122_vm2, %v5152_v50  ;;  %v3703_v25 = vsel %vm126_vm1, %v3697_v21, 0  ;;  %v4146_v21 = vld [vmem:[%s8036_s14 + $0x68] sm:$0xff] }
 0x788   :  { %3401 = vmatpush1.bf16.msra.mxu1 %v3392_v1  ;;  %v3905_v2 = vpop.permute.xlu1 %3904  ;;  %3432 = vmatprep.mubr.bf16.mxu1 %v6128_v6 }
 0x789   :  { %v7459_v3 = vpop.permute.xlu0 %3797  ;;  %5369 = vmatprep.subr.bf16.mxu1 %v7428_v33 }
 0x78a   :  { %v3804_v38 = vsel %vm3803_vm3, %v7459_v3, %v7454_v62 }
 0x78b   :  { %v3810_v45 = vsel %vm126_vm1, %v3804_v38, 0  ;;  %v4147_v38 = vld [vmem:[%s8036_s14 + $0x70] sm:$0xff] }
 0x78c   :  { %v7463_v5 = vpop.permute.xlu1 %3908 }
 0x78d   :  { %v7468_v8 = vpop.permute.xlu0 %3801  ;;  %v3923_v32 = vsel %vm126_vm1, %v7463_v5, 0 }
 0x78e   :  { %v3805_v61 = vsel %vm3803_vm3, %v7454_v62, %v7468_v8  ;;  %v3816_v27 = vsel %vm126_vm1, %v7468_v8, 0  ;;  %v3037_v8 = vld [vmem:[%s8033_s11] sm:$0xf] }
 0x78f   :  { %5158 = vmatmul.mubr.msk.bf16.vlgmr.msra.gmra.mrb[20].mxu1 %vm122_vm2, %v5156_v7 }
 0x790   :  { %5370 = vmatpush3.bf16.msra.mxu1 %v3398_v9  ;;  %v3058_v10 = vpop.permute.xlu1 %3057  ;;  %5371 = vmatprep.mubr.msk.bf16.mxu1 %vm6139_vm11, %v7428_v33  ;;  %v4134_v9 = vld [vmem:[%s8036_s14 + $0x8] sm:$0xff] }
 0x791   :  { %v3065_v11 = vsel %vm3063_vm12, %v3058_v10, %v7410_v24  ;;  %5161 = vmatprep.subr.msk.bf16.mxu1 %vm126_vm1, %v7365_v22  ;;  %v3907_v13 = vpop.permute.xlu0 %3906  ;;  %v3496_v22 = vsel %vm126_vm1, %v7357_v57, 0  ;;  %v5164_v57 = vld [vmem:[%s8032_s10 + $0xa] sm:$0x3]  ;;  %v3602_v24 = vsel %vm126_vm1, %v3589_v60, 0 }
 0x792   :  { %v3911_v15 = vsel %vm3910_vm15, %v3905_v2, %v3907_v13  ;;  %5146 = vmatprep.subr.msk.bf16.mxu0 %vm126_vm1, %v3065_v11  ;;  %v3912_v29 = vsel %vm3910_vm15, %v3907_v13, %v7463_v5  ;;  %v4133_v11 = vld [vmem:[%s8036_s14] sm:$0xff] }
 0x793   :  { %v3917_v30 = vsel %vm126_vm1, %v3911_v15, 0  ;;  %v4135_v15 = vld [vmem:[%s8036_s14 + $0x10] sm:$0xff] }
 0x795   :  { %v3056_v16 = vpop.permute.xlu0 %3055 }
 0x796   :  { %v3064_v12 = vsel %vm3063_vm12, %v3056_v16, %v3058_v10  ;;  %v4136_v10 = vld [vmem:[%s8036_s14 + $0x18] sm:$0xff]  ;;  %v4138_v16 = vld [vmem:[%s8036_s14 + $0x28] sm:$0xff] }
 0x797   :  { %v3071_v18 = vsel %vm126_vm1, %v3064_v12, 0  ;;  %5372 = vmatmul.mubr.msk.bf16.vlgmr.msra.gmra.mrb[16].mxu1 %vm122_vm2, %v5156_v7  ;;  %v3038_v7 = vld [vmem:[%s8034_s12] sm:$0xf]  ;;  %v5685_v13 = vpack.c.bf16 %v4136_v10, %v4134_v9  ;;  %v4140_v12 = vld [vmem:[%s8036_s14 + $0x38] sm:$0xff] }
 0x798   :  { %3499 = vmatpush1.bf16.msra.mxu1 %v3490_v63  ;;  %3080 = vmatpush1.bf16.msra.mxu0 %v3071_v18  ;;  %v5687_v18 = vpack.c.bf16 %v4135_v15, %v4133_v11  ;;  %v5689_v63 = vpack.c.bf16 %v4140_v12, %v4138_v16  ;;  %v4169_v10 = vld [vmem:[%s8036_s14 + $0x120] sm:$0xff]  ;;  %v4171_v11 = vld [vmem:[%s8036_s14 + $0x130] sm:$0xff]  ;;  %v4176_v15 = vld [vmem:[%s8036_s14 + $0x158] sm:$0xff] }
 0x799   :  { %3530 = vmatprep.mubr.bf16.mxu1 %v6128_v6  ;;  %5375 = vmatprep.subr.bf16.mxu1 %v7428_v33  ;;  %v5723_v16 = vpack.c.bf16 %v4171_v11, %v4169_v10  ;;  %v4189_v10 = vld [vmem:[%s8036_s14 + $0x1c0] sm:$0xff]  ;;  %v4191_v11 = vld [vmem:[%s8036_s14 + $0x1d0] sm:$0xff] }
 0x79a   :  { %5686 = vmatprep.subr.bf16.mxu0 %v5685_v13  ;;  %v4174_v13 = vld [vmem:[%s8036_s14 + $0x148] sm:$0xff] }
 0x79b   :  { %5147 = vmatmul.mubr.msk.bf16.vlgmr.msra.gmra.mrb[12].mxu0 %vm122_vm2, %v7418_v26  ;;  %v5168_v26 = vld [vmem:[%s8032_s10 + $0xc] sm:$0x3]  ;;  %v5725_v12 = vpack.c.bf16 %v4176_v15, %v4174_v13 }
 0x79c   :  { %5688 = vmatpush1.bf16.msra.mxu0 %v5687_v18  ;;  %v4173_v18 = vld [vmem:[%s8036_s14 + $0x140] sm:$0xff] }
 0x79d   :  { %5690 = vmatprep.subr.bf16.mxu0 %v5689_v63  ;;  %v4175_v63 = vld [vmem:[%s8036_s14 + $0x150] sm:$0xff] }
 0x79f   :  { %5162 = vmatmul.mubr.msk.bf16.vlgmr.msra.gmra.mrb[20].mxu1 %vm122_vm2, %v5160_v17 }
 0x7a0   :  { %5376 = vmatpush3.bf16.msra.mxu1 %v3496_v22  ;;  %5377 = vmatprep.mubr.msk.bf16.mxu1 %vm6139_vm11, %v7428_v33  ;;  %v4139_v22 = vld [vmem:[%s8036_s14 + $0x30] sm:$0xff] }
 0x7a1   :  { %5165 = vmatprep.subr.msk.bf16.mxu1 %vm126_vm1, %v3591_v14  ;;  %v4142_v14 = vld [vmem:[%s8036_s14 + $0x48] sm:$0xff] }
 0x7a7   :  { %5378 = vmatmul.mubr.msk.bf16.vlgmr.msra.gmra.mrb[16].mxu1 %vm122_vm2, %v5160_v17  ;;  %v4137_v17 = vld [vmem:[%s8036_s14 + $0x20] sm:$0xff] }
 0x7a8   :  { %3605 = vmatpush1.bf16.msra.mxu1 %v3596_v23  ;;  %3636 = vmatprep.mubr.bf16.mxu1 %v6128_v6  ;;  %v5691_v23 = vpack.c.bf16 %v4139_v22, %v4137_v17  ;;  %v5727_v17 = vpack.c.bf16 %v4175_v63, %v4173_v18  ;;  %v4196_v18 = vld [vmem:[%s8036_s14 + $0x1f8] sm:$0xff] }
 0x7a9   :  { %5381 = vmatprep.subr.bf16.mxu1 %v7428_v33 }
 0x7aa   :  { %5692 = vmatpush1.bf16.msra.mxu0 %v5691_v23 }
 0x7af   :  { %5166 = vmatmul.mubr.msk.bf16.vlgmr.msra.gmra.mrb[20].mxu1 %vm122_vm2, %v5164_v57 }
 0x7b0   :  { %5382 = vmatpush3.bf16.msra.mxu1 %v3602_v24  ;;  %5383 = vmatprep.mubr.msk.bf16.mxu1 %vm6139_vm11, %v7428_v33  ;;  %v4141_v24 = vld [vmem:[%s8036_s14 + $0x40] sm:$0xff] }
 0x7b1   :  { %5169 = vmatprep.subr.msk.bf16.mxu1 %vm126_vm1, %v3698_v20  ;;  %v4143_v20 = vld [vmem:[%s8036_s14 + $0x50] sm:$0xff] }
 0x7b7   :  { %5384 = vmatmul.mubr.msk.bf16.vlgmr.msra.gmra.mrb[16].mxu1 %vm122_vm2, %v5164_v57  ;;  %v5693_v57 = vpack.c.bf16 %v4144_v37, %v4142_v14 }
 0x7b8   :  { %3712 = vmatpush1.bf16.msra.mxu1 %v3703_v25  ;;  %3743 = vmatprep.mubr.bf16.mxu1 %v6128_v6  ;;  %v4148_v25 = vld [vmem:[%s8036_s14 + $0x78] sm:$0xff] }
 0x7b9   :  { %5387 = vmatprep.subr.bf16.mxu1 %v7428_v33  ;;  %5694 = vmatprep.subr.bf16.mxu0 %v5693_v57 }
 0x7bf   :  { %5170 = vmatmul.mubr.msk.bf16.vlgmr.msra.gmra.mrb[20].mxu1 %vm122_vm2, %v5168_v26 }
 0x7c0   :  { %5388 = vmatpush3.bf16.msra.mxu1 %v3709_v19  ;;  %5389 = vmatprep.mubr.msk.bf16.mxu1 %vm6139_vm11, %v7428_v33  ;;  %v5697_v19 = vpack.c.bf16 %v4148_v25, %v4146_v21 }
 0x7c1   :  { %5173 = vmatprep.subr.msk.bf16.mxu1 %vm126_vm1, %v3805_v61  ;;  %v4145_v61 = vld [vmem:[%s8036_s14 + $0x60] sm:$0xff] }
 0x7c7   :  { %5390 = vmatmul.mubr.msk.bf16.vlgmr.msra.gmra.mrb[16].mxu1 %vm122_vm2, %v5168_v26  ;;  %v5695_v26 = vpack.c.bf16 %v4143_v20, %v4141_v24 }
 0x7c8   :  { %3819 = vmatpush1.bf16.msra.mxu1 %v3810_v45  ;;  %3850 = vmatprep.mubr.bf16.mxu1 %v6128_v6  ;;  %v4150_v45 = vld [vmem:[%s8036_s14 + $0x88] sm:$0xff] }
 0x7c9   :  { %5393 = vmatprep.subr.bf16.mxu1 %v7428_v33  ;;  %5696 = vmatpush1.bf16.msra.mxu0 %v5695_v26 }
 0x7ca   :  { %5698 = vmatprep.subr.bf16.mxu0 %v5697_v19 }
 0x7cf   :  { %5174 = vmatmul.mubr.msk.bf16.vlgmr.msra.gmra.mrb[20].mxu1 %vm122_vm2, %v5172_v46 }
 0x7d0   :  { %5394 = vmatpush3.bf16.msra.mxu1 %v3816_v27  ;;  %5395 = vmatprep.mubr.msk.bf16.mxu1 %vm6139_vm11, %v7428_v33  ;;  %v5699_v27 = vpack.c.bf16 %v4147_v38, %v4145_v61  ;;  %v3039_v61 = vld [vmem:[%s8035_s13] sm:$0x7] }
 0x7d1   :  { %5177 = vmatprep.subr.msk.bf16.mxu1 %vm126_vm1, %v3912_v29 }
 0x7d2   :  { %5700 = vmatpush1.bf16.msra.mxu0 %v5699_v27 }
 0x7d7   :  { %5396 = vmatmul.mubr.msk.bf16.vlgmr.msra.gmra.mrb[16].mxu1 %vm122_vm2, %v5172_v46  ;;  %v4152_v46 = vld [vmem:[%s8036_s14 + $0x98] sm:$0xff] }
 0x7d8   :  { %3926 = vmatpush1.bf16.msra.mxu1 %v3917_v30  ;;  %3957 = vmatprep.mubr.bf16.mxu1 %v6128_v6  ;;  %v5701_v29 = vpack.c.bf16 %v4152_v46, %v4150_v45  ;;  %v4149_v30 = vld [vmem:[%s8036_s14 + $0x80] sm:$0xff] }
 0x7d9   :  { %5399 = vmatprep.subr.bf16.mxu1 %v7428_v33 }
 0x7da   :  { %5702 = vmatprep.subr.bf16.mxu0 %v5701_v29 }
 0x7df   :  { %5178 = vmatmul.mubr.msk.bf16.vlgmr.msra.gmra.mrb[20].mxu1 %vm122_vm2, %v5176_v31 }
 0x7e0   :  { %5400 = vmatpush3.bf16.msra.mxu1 %v3923_v32  ;;  %5401 = vmatprep.mubr.msk.bf16.mxu1 %vm6139_vm11, %v7428_v33  ;;  %v4154_v32 = vld [vmem:[%s8036_s14 + $0xa8] sm:$0xff] }
 0x7e1   :  { %5769 = vmatprep.subr.bf16.mxu1 %v6136_v28 }
 0x7e7   :  { %5402 = vmatmul.mubr.msk.bf16.vlgmr.msra.gmra.mrb[16].mxu1 %vm122_vm2, %v5176_v31  ;;  %vm4012_vm2 = vcmask 666624   ;;  %v4151_v31 = vld [vmem:[%s8036_s14 + $0x90] sm:$0xff] }
 0x7e8   :  { %5413 = vmatprep.mubr.msk.f32.mxu1 %vm6139_vm11, %v7428_v33 }
 0x86e   :  { %v3113_v6 = vpop.f32.mrb[12].mxu0 }
 0x86f   :  { %v3115_v34 = vpop.f32.mrb[13].mxu0 }
 0x870   :  { %v3117_v35 = vpop.f32.mrb[14].mxu0 }
 0x871   :  { %v3118_v36 = vpop.f32.mrb[15].mxu0 }
 0x872   :  { %v4153_v36 = vld [vmem:[%s8036_s14 + $0xa0] sm:$0xff] }
 0x8b2   :  { %v3959_v39 = vpop.f32.mrb[20].mxu1 }
 0x8b3   :  { %v7564_v40 = vadd.f32 %v3959_v39, %v3113_v6  ;;  %v3961_v41 = vpop.f32.mrb[21].mxu1  ;;  %v4156_v6 = vld [vmem:[%s8036_s14 + $0xb8] sm:$0xff]  ;;  %v4155_v39 = vld [vmem:[%s8036_s14 + $0xb0] sm:$0xff] }
 0x8b4   :  { %v7566_v42 = vadd.f32 %v3961_v41, %v3115_v34  ;;  %v3963_v43 = vpop.f32.mrb[22].mxu1  ;;  %v5703_v34 = vpack.c.bf16 %v4151_v31, %v4149_v30  ;;  %v5705_v35 = vpack.c.bf16 %v4156_v6, %v4154_v32  ;;  %v4158_v41 = vld [vmem:[%s8036_s14 + $0xc8] sm:$0xff]  ;;  %v4062_v6 = vrot.slane %v3039_v61, %v6507_v55  ;;  %v4177_v55 = vld [vmem:[%s8036_s14 + $0x160] sm:$0xff] }
 0x8b5   :  { %v4018_v44 = vmul.f32 %v7564_v40, %v7564_v40  ;;  %v3964_v47 = vpop.f32.mrb[23].mxu1  ;;  %v4009_v49 = vsel %vm126_vm1, %v7564_v40, 0.0  ;;  %v4160_v43 = vld [vmem:[%s8036_s14 + $0xd8] sm:$0xff] }
 0x8b6   :  { %v4019_v48 = vmul.f32 %v7566_v42, %v7566_v42  ;;  %v4010_v50 = vsel %vm126_vm1, %v7566_v42, 0.0  ;;  %5704 = vmatpush1.bf16.msra.mxu0 %v5703_v34  ;;  %v5709_v47 = vpack.c.bf16 %v4160_v43, %v4158_v41  ;;  %v4180_v34 = vld [vmem:[%s8036_s14 + $0x178] sm:$0xff] }
 0x8b7   :  { %v4021_v51 = vsel %vm126_vm1, %v4018_v44, 0.0  ;;  %v4011_v54 = vadd.f32 %v4010_v50, %v4009_v49  ;;  %v5707_v44 = vpack.c.bf16 %v4155_v39, %v4153_v36  ;;  %5706 = vmatprep.subr.bf16.mxu0 %v5705_v35  ;;  %v4159_v49 = vld [vmem:[%s8036_s14 + $0xd0] sm:$0xff]  ;;  %v4162_v50 = vld [vmem:[%s8036_s14 + $0xe8] sm:$0xff] }
 0x8b8   :  { %v4022_v52 = vsel %vm126_vm1, %v4019_v48, 0.0  ;;  %v4157_v48 = vld [vmem:[%s8036_s14 + $0xc0] sm:$0xff]  ;;  %vm4380_vm1 = vcmask 1040384  }
 0x8b9   :  { %v4023_v2 = vadd.f32 %v4022_v52, %v4021_v51  ;;  %v4164_v51 = vld [vmem:[%s8036_s14 + $0xf8] sm:$0xff]  ;;  %v5711_v52 = vpack.c.bf16 %v4159_v49, %v4157_v48  ;;  %v4182_v48 = vld [vmem:[%s8036_s14 + $0x188] sm:$0xff]  ;;  %vm7832_vm5 = vmpackc.low %vm4380_vm1, %vm6145_vm4 }
 0x8ba   :  { %v7578_v53 = vpop.f32.mrb[16].mxu1  ;;  %5708 = vmatpush1.bf16.msra.mxu0 %v5707_v44  ;;  %v4184_v49 = vld [vmem:[%s8036_s14 + $0x198] sm:$0xff] }
 0x8bb   :  { %v4013_v60 = vsel %vm4012_vm2, %v7578_v53, 0.0  ;;  %v4020_v59 = vmul.f32 %v7578_v53, %v7578_v53  ;;  %v5403_v62 = vpop.f32.mrb[17].mxu1  ;;  %5710 = vmatprep.subr.bf16.mxu0 %v5709_v47 }
 0x8bc   :  { %v4003_v0 = vpop.f32.mrb[18].mxu1  ;;  %v4014_v1 = vadd.f32 %v4013_v60, %v4011_v54  ;;  %v5713_v54 = vpack.c.bf16 %v4164_v51, %v4162_v50  ;;  %v4161_v60 = vld [vmem:[%s8036_s14 + $0xe0] sm:$0xff]  ;;  %v4166_v62 = vld [vmem:[%s8036_s14 + $0x108] sm:$0xff] }
 0x8bd   :  { %v5404_v3 = vpop.f32.mrb[19].mxu1  ;;  %v4024_v4 = vsel %vm4012_vm2, %v4020_v59, 0.0  ;;  %v4163_v59 = vld [vmem:[%s8036_s14 + $0xf0] sm:$0xff]  ;;  %v4168_v0 = vld [vmem:[%s8036_s14 + $0x118] sm:$0xff] }
 0x8be   :  { %4015 = vadd.xlane.f32.xlu0 %v4014_v1  ;;  %v4025_v5 = vadd.f32 %v4024_v4, %v4023_v2  ;;  %5712 = vmatpush1.bf16.msra.mxu0 %v5711_v52  ;;  %v5715_v1 = vpack.c.bf16 %v4163_v59, %v4161_v60  ;;  %v5717_v2 = vpack.c.bf16 %v4168_v0, %v4166_v62  ;;  %v4165_v3 = vld [vmem:[%s8036_s14 + $0x100] sm:$0xff]  ;;  %v4167_v4 = vld [vmem:[%s8036_s14 + $0x110] sm:$0xff]  ;;  %v4186_v0 = vld [vmem:[%s8036_s14 + $0x1a8] sm:$0xff] }
 0x8bf   :  { %5714 = vmatprep.subr.bf16.mxu0 %v5713_v54  ;;  %v5733_v54 = vpack.c.bf16 %v4184_v49, %v4182_v48  ;;  %v4181_v60 = vld [vmem:[%s8036_s14 + $0x180] sm:$0xff]  ;;  %v4183_v59 = vld [vmem:[%s8036_s14 + $0x190] sm:$0xff]  ;;  %v4202_v49 = vld [vmem:[%s8036_s14 + $0x228] sm:$0xff] }
 0x8c0   :  { %4026 = vadd.xlane.f32.xlu1 %v4025_v5  ;;  %v4170_v5 = vld [vmem:[%s8036_s14 + $0x128] sm:$0xff]  ;;  %v5735_v62 = vpack.c.bf16 %v4183_v59, %v4181_v60  ;;  %v4201_v59 = vld [vmem:[%s8036_s14 + $0x220] sm:$0xff] }
 0x8c2   :  { %5716 = vmatpush1.bf16.msra.mxu0 %v5715_v1  ;;  %v4188_v1 = vld [vmem:[%s8036_s14 + $0x1b8] sm:$0xff] }
 0x8c3   :  { %5718 = vmatprep.subr.bf16.mxu0 %v5717_v2  ;;  %v5737_v2 = vpack.c.bf16 %v4188_v1, %v4186_v0  ;;  %v4206_v0 = vld [vmem:[%s8036_s14 + $0x248] sm:$0xff]  ;;  %v4208_v1 = vld [vmem:[%s8036_s14 + $0x258] sm:$0xff] }
 0x8d1   :  { %4049 = vperm.xlu1 %6053, %v3038_v7   ;;  %v4172_v7 = vld [vmem:[%s8036_s14 + $0x138] sm:$0xff] }
 0x8d2   :  { %v5721_v9 = vpack.c.bf16 %v4172_v7, %v4170_v5  ;;  %v4190_v7 = vld [vmem:[%s8036_s14 + $0x1c8] sm:$0xff] }
 0x8d4   :  { %4041 = vperm.xlu0 %6054, %v3037_v8   ;;  %v5719_v8 = vpack.c.bf16 %v4167_v4, %v4165_v3  ;;  %v4185_v3 = vld [vmem:[%s8036_s14 + $0x1a0] sm:$0xff]  ;;  %v4187_v4 = vld [vmem:[%s8036_s14 + $0x1b0] sm:$0xff] }
 0x8d5   :  { %v5739_v5 = vpack.c.bf16 %v4187_v4, %v4185_v3  ;;  %v5757_v3 = vpack.c.bf16 %v4208_v1, %v4206_v0  ;;  %v4205_v4 = vld [vmem:[%s8036_s14 + $0x240] sm:$0xff] }
 0x8d6   :  { %5720 = vmatpush1.bf16.msra.mxu0 %v5719_v8  ;;  %v4192_v8 = vld [vmem:[%s8036_s14 + $0x1d8] sm:$0xff] }
 0x8d7   :  { %5722 = vmatprep.subr.bf16.mxu0 %v5721_v9  ;;  %v5741_v9 = vpack.c.bf16 %v4192_v8, %v4190_v7  ;;  %v4210_v7 = vld [vmem:[%s8036_s14 + $0x268] sm:$0xff]  ;;  %v4212_v8 = vld [vmem:[%s8036_s14 + $0x278] sm:$0xff] }
 0x8da   :  { %5724 = vmatpush1.bf16.msra.mxu0 %v5723_v16  ;;  %v5743_v16 = vpack.c.bf16 %v4191_v11, %v4189_v10  ;;  %v5761_v10 = vpack.c.bf16 %v4212_v8, %v4210_v7  ;;  %v4209_v11 = vld [vmem:[%s8036_s14 + $0x260] sm:$0xff] }
 0x8db   :  { %5726 = vmatprep.subr.bf16.mxu0 %v5725_v12  ;;  %v4194_v12 = vld [vmem:[%s8036_s14 + $0x1e8] sm:$0xff] }
 0x8dc   :  { %v5745_v63 = vpack.c.bf16 %v4196_v18, %v4194_v12  ;;  %v4216_v12 = vld [vmem:[%s8036_s14 + $0x298] sm:$0xff] }
 0x8de   :  { %5728 = vmatpush1.bf16.msra.mxu0 %v5727_v17  ;;  %v4193_v17 = vld [vmem:[%s8036_s14 + $0x1e0] sm:$0xff] }
 0x94b   :  { %v4016_v22 = vpop.xlane.xlu0 %4015 }
 0x94c   :  { %v4017_v14 = vmul.f32 0.0061728396, %v4016_v22  ;;  %v4195_v22 = vld [vmem:[%s8036_s14 + $0x1f0] sm:$0xff] }
 0x94d   :  { %v4027_v37 = vpop.xlane.xlu1 %4026 }
 0x94e   :  { %v4028_v23 = vmul.f32 0.0061728396, %v4027_v37  ;;  %v4029_v57 = vmul.f32 %v4017_v14, %v4017_v14  ;;  %v4031_v21 = vsub.f32 %v7564_v40, %v4017_v14  ;;  %v4032_v25 = vsub.f32 %v7566_v42, %v4017_v14 }
 0x94f   :  { %v4033_v26 = vsub.f32 %v7578_v53, %v4017_v14  ;;  %v4066_v40 = vrot.slane %v3039_v61, %v6510_v56  ;;  %v4070_v42 = vrot.slane %v3039_v61, %v6513_v58  ;;  %v4178_v53 = vld [vmem:[%s8036_s14 + $0x168] sm:$0xff]  ;;  %v4179_v56 = vld [vmem:[%s8036_s14 + $0x170] sm:$0xff]  ;;  %v5747_v37 = vpack.c.bf16 %v4195_v22, %v4193_v17  ;;  %v4213_v17 = vld [vmem:[%s8036_s14 + $0x280] sm:$0xff] }
 0x950   :  { %v4030_v24 = vsub.f32 %v4028_v23, %v4029_v57  ;;  %v5729_v41 = vpack.c.bf16 %v4180_v34, %v4178_v53  ;;  %v5731_v58 = vpack.c.bf16 %v4179_v56, %v4177_v55  ;;  %v4198_v23 = vld [vmem:[%s8036_s14 + $0x208] sm:$0xff]  ;;  %v4200_v57 = vld [vmem:[%s8036_s14 + $0x218] sm:$0xff]  ;;  %v4215_v22 = vld [vmem:[%s8036_s14 + $0x290] sm:$0xff] }
 0x951   :  { %v4050_v32 = vpop.permute.xlu1 %4049 }
 0x952   :  { %v4034_v20 = vadd.f32 1e-05, %v4030_v24  ;;  %5730 = vmatprep.subr.bf16.mxu0 %v5729_v41  ;;  %v5749_v24 = vpack.c.bf16 %v4200_v57, %v4198_v23  ;;  %v4218_v57 = vld [vmem:[%s8036_s14 + $0x2a8] sm:$0x3] }
 0x953   :  { %v4042_v27 = vpop.permute.xlu0 %4041  ;;  %5732 = vmatpush1.bf16.msra.mxu0 %v5731_v58 }
 0x954   :  { %6100 = vrsqrt.f32 %v4034_v20  ;;  %5734 = vmatprep.subr.bf16.mxu0 %v5733_v54  ;;  %v4372_v20 = vld [vmem:[%s8037_s15] sm:$0xff] }
 0x957   :  { %5736 = vmatpush1.bf16.msra.mxu0 %v5735_v62  ;;  %v4203_v62 = vld [vmem:[%s8036_s14 + $0x230] sm:$0xff] }
 0x958   :  { %5738 = vmatprep.subr.bf16.mxu0 %v5737_v2  ;;  %v5755_v2 = vpack.c.bf16 %v4203_v62, %v4201_v59 }
 0x95b   :  { %5740 = vmatpush1.bf16.msra.mxu0 %v5739_v5  ;;  %v4207_v5 = vld [vmem:[%s8036_s14 + $0x250] sm:$0xff] }
 0x95c   :  { %5742 = vmatprep.subr.bf16.mxu0 %v5741_v9  ;;  %v5759_v9 = vpack.c.bf16 %v4207_v5, %v4205_v4 }
 0x95e   :  { %v6101_v19 = vpop.eup %6100 }
 0x95f   :  { %v4036_v38 = vmul.f32 %v6101_v19, %v4031_v21  ;;  %v4037_v45 = vmul.f32 %v6101_v19, %v4032_v25  ;;  %v4038_v46 = vmul.f32 %v6101_v19, %v4033_v26  ;;  %5744 = vmatpush1.bf16.msra.mxu0 %v5743_v16  ;;  %v4373_v21 = vld [vmem:[%s8037_s15 + $0x8] sm:$0xff]  ;;  %v7824_v26 = vld [vmem:[%s8037_s15 + $0x10] sm:$0xff]  ;;  %v4375_v19 = vld [vmem:[%s8037_s15 + $0x18] sm:$0x1] }
 0x960   :  { %5746 = vmatprep.subr.bf16.mxu0 %v5745_v63  ;;  %v7819_v25 = vpack.c.bf16 %v4373_v21, %v4372_v20  ;;  %v5773_v61 = vpack.c.bf16 %v4375_v19, %v7824_v26  ;;  %v4214_v16 = vld [vmem:[%s8036_s14 + $0x288] sm:$0xff]  ;;  %v4217_v20 = vld [vmem:[%s8036_s14 + $0x2a0] sm:$0x3] }
 0x961   :  { %v4044_v29 = vmul.f32 %v4042_v27, %v4036_v38  ;;  %v4045_v30 = vmul.f32 %v4042_v27, %v4037_v45  ;;  %v4046_v31 = vmul.f32 %v4042_v27, %v4038_v46  ;;  %v5765_v63 = vpack.c.bf16 %v4216_v12, %v4214_v16 }
 0x962   :  { %5771 = vmatpush3.bf16.msra.mxu1 %v7819_v25 }
 0x963   :  { %v4052_v35 = vadd.f32 %v4050_v32, %v4044_v29  ;;  %v4053_v36 = vadd.f32 %v4050_v32, %v4045_v30  ;;  %v4054_v39 = vadd.f32 %v4050_v32, %v4046_v31  ;;  %5748 = vmatpush1.bf16.msra.mxu0 %v5747_v37  ;;  %5772 = vmatprep.subr.bf16.mxu1 %v6136_v28 }
 0x964   :  { %5750 = vmatprep.subr.bf16.mxu0 %v5749_v24  ;;  %v5767_v37 = vpack.c.bf16 %v4215_v22, %v4213_v17 }
 0x965   :  { %v4055_v43 = vmax.f32 %v4052_v35, 0.0  ;;  %v4056_v44 = vmax.f32 %v4053_v36, 0.0  ;;  %v4057_v47 = vmax.f32 %v4054_v39, 0.0 }
 0x966   :  { %5775 = vmatpush3.bf16.msk.msra.mxu1 %vm7832_vm5, %v5773_v61  ;;  %v5185_v61 = vld [vmem:[%s8037_s15 + $0x20] sm:$0xff] }
 0x967   :  { %v4074_v50 = vmul.f32 %v4062_v6, %v4055_v43  ;;  %v4075_v51 = vmul.f32 %v4066_v40, %v4056_v44  ;;  %v4076_v52 = vmul.f32 %v4070_v42, %v4057_v47  ;;  %5776 = vmatprep.subr.bf16.mxu1 %v6136_v28  ;;  %v4197_v44 = vld [vmem:[%s8036_s14 + $0x200] sm:$0xff]  ;;  %v4199_v47 = vld [vmem:[%s8036_s14 + $0x210] sm:$0xff] }
 0x969   :  { %4077 = vst [vmem:[#allocation3 + $0x8] sm:$0xf] %v4074_v50  ;;  %4078 = vst [vmem:[#allocation3 + $0x10] sm:$0xf] %v4075_v51  ;;  %v4204_v50 = vld [vmem:[%s8036_s14 + $0x238] sm:$0xff] }
 0x96a   :  { %4079 = vst.msk [vmem:[#allocation3 + $0x18] sm:$0xf] %vm4012_vm2, %v4076_v52  ;;  %v5751_v52 = vpack.c.bf16 %v4199_v47, %v4197_v44  ;;  %v5753_v60 = vpack.c.bf16 %v4204_v50, %v4202_v49  ;;  %v5199_v47 = vld [vmem:[%s8037_s15 + $0x70] sm:$0xff]  ;;  %v5220_v50 = vld [vmem:[%s8037_s15 + $0x78] sm:$0x1] }
 0x970   :  { %v4081_v15 = vld [vmem:[#allocation3 + $0x10] sm:$0xf]  ;;  %v4080_v14 = vld [vmem:[#allocation3 + $0x8] sm:$0xf] }
 0x971   :  { %v7781_v13 = vld [vmem:[#allocation3 + $0x18] sm:$0xf]  ;;  %4088 = vrot.lane.b32.xlu0 %v4081_v15, %s6132_s24 }
 0x972   :  { %4090 = vrot.lane.b32.xlu1 %v7781_v13, %s6132_s24 }
 0x975   :  { %4086 = vrot.lane.b32.xlu0 %v4080_v14, %s6132_s24  ;;  %s6103_s24 = scalar_lea.vmem %s5037_s5, 32 }
 0x976   :  { %4102 = vrot.lane.b32.xlu1 %v4081_v15, %s6143_s0  ;;  %p6104_p0 = scmp.ne.s32.totalorder %s5037_s5, %s6103_s24  ;;  %p6109_p2 = scmp.lt.s32.totalorder %s6103_s24, %s6103_s24 }
 0x978   :  { %p6110_p3 = por %p6109_p2, %p6108_p1 }
 0x979   :  { %4104 = vrot.lane.b32.xlu0 %v7781_v13, %s6143_s0 }
 0x97a   :  { %4100 = vrot.lane.b32.xlu1 %v4080_v14, %s6143_s0  ;;  %p6111_p4 = pnand %p6110_p3, %p6104_p0 }
 0x97d   :  { %4117 = vrot.lane.b32.xlu0 %v4081_v15, %s6144_s6 }
 0x97e   :  { %4119 = vrot.lane.b32.xlu1 %v7781_v13, %s6144_s6 }
 0x981   :  { %4115 = vrot.lane.b32.xlu0 %v4080_v14, %s6144_s6 }
 0x9e3   :  { %v4089_v46 = vpop.permute.xlu0 %4088 }
 0x9e4   :  { %v4091_v45 = vpop.permute.xlu1 %4090 }
 0x9e5   :  { %v4093_v30 = vsel %vm773_vm6, %v4089_v46, %v4091_v45 }
 0x9e6   :  { %v4098_v40 = vadd.f32 %v4093_v30, %v4081_v15  ;;  %v4211_v15 = vld [vmem:[%s8036_s14 + $0x270] sm:$0xff] }
 0x9e7   :  { %v4087_v29 = vpop.permute.xlu0 %4086  ;;  %v5763_v18 = vpack.c.bf16 %v4211_v15, %v4209_v11 }
 0x9e8   :  { %v4103_v27 = vpop.permute.xlu1 %4102  ;;  %v4092_v42 = vsel %vm773_vm6, %v4087_v29, %v4089_v46  ;;  %vm4222_vm6 = vcmask 1041408   ;;  %v5188_v46 = vld [vmem:[%s8037_s15 + $0x38] sm:$0x1] }
 0x9e9   :  { %v4097_v41 = vadd.f32 %v4092_v42, %v4080_v14  ;;  %v4099_v14 = vadd.f32 %v4091_v45, %v7781_v13  ;;  %v4707_v13 = vld [vmem:[%s8037_s15 + $0x18] sm:$0x1]  ;;  %v5187_v45 = vld [vmem:[%s8037_s15 + $0x30] sm:$0xff] }
 0x9ea   :  { %v5801_v19 = vpack.c.bf16 %v4707_v13, %v7824_v26  ;;  %v5208_v29 = vld [vmem:[%s8037_s15 + $0x38] sm:$0x1] }
 0x9eb   :  { %v4105_v32 = vpop.permute.xlu0 %4104 }
 0x9ec   :  { %v4101_v31 = vpop.permute.xlu1 %4100  ;;  %v4108_v6 = vsel %vm3803_vm3, %v4103_v27, %v4105_v32  ;;  %v4114_v23 = vadd.f32 %v4105_v32, %v4099_v14  ;;  %v5808_v32 = vpack.c.bf16 %v5208_v29, %v5187_v45 }
 0x9ed   :  { %v4113_v53 = vadd.f32 %v4108_v6, %v4098_v40  ;;  %v4107_v36 = vsel %vm3803_vm3, %v4101_v31, %v4103_v27  ;;  %v5780_v31 = vpack.c.bf16 %v5188_v46, %v5187_v45  ;;  %v5191_v6 = vld [vmem:[%s8037_s15 + $0x40] sm:$0xff]  ;;  %v5192_v40 = vld [vmem:[%s8037_s15 + $0x48] sm:$0xff] }
 0x9ee   :  { %v4112_v56 = vadd.f32 %v4107_v36, %v4097_v41  ;;  %v5784_v42 = vpack.c.bf16 %v5192_v40, %v5191_v6 }
 0x9ef   :  { %v4118_v35 = vpop.permute.xlu0 %4117 }
 0x9f0   :  { %v4120_v34 = vpop.permute.xlu1 %4119 }
 0x9f1   :  { %v4123_v39 = vsel %vm3910_vm15, %v4118_v35, %v4120_v34  ;;  %v4129_v24 = vadd.f32 %v4120_v34, %v4114_v23  ;;  %v5193_v34 = vld [vmem:[%s8037_s15 + $0x50] sm:$0xff] }
 0x9f2   :  { %v4128_v55 = vadd.f32 %v4123_v39, %v4113_v53  ;;  %v5214_v39 = vld [vmem:[%s8037_s15 + $0x58] sm:$0x1] }
 0x9f3   :  { %v4116_v43 = vpop.permute.xlu0 %4115  ;;  %v4132_v21 = vmul.f32 0.25, %v4129_v24 }
 0x9f4   :  { %v4131_v58 = vmul.f32 0.25, %v4128_v55  ;;  %v4122_v48 = vsel %vm3910_vm15, %v4116_v43, %v4118_v35  ;;  %v5194_v35 = vld [vmem:[%s8037_s15 + $0x58] sm:$0x1]  ;;  %v5815_v55 = vpack.c.bf16 %v5214_v39, %v5193_v34 }
 0x9f5   :  { %v4127_v51 = vadd.f32 %v4122_v48, %v4112_v56  ;;  %v5787_v41 = vpack.c.bf16 %v5194_v35, %v5193_v34  ;;  %v5197_v56 = vld [vmem:[%s8037_s15 + $0x60] sm:$0xff]  ;;  %v5200_v48 = vld [vmem:[%s8037_s15 + $0x78] sm:$0x1] }
 0x9f6   :  { %4293 = vmatprep.mubr.f32.mxu0 %v4131_v58  ;;  %v5198_v58 = vld [vmem:[%s8037_s15 + $0x68] sm:$0xff] }
 0x9f7   :  { %v4130_v54 = vmul.f32 0.25, %v4127_v51  ;;  %v5791_v43 = vpack.c.bf16 %v5198_v58, %v5197_v56  ;;  %v5794_v51 = vpack.c.bf16 %v5200_v48, %v5199_v47 }
 0x9f9   :  { %4294 = vmatmul.mubr.f32.vlgmr.msra.gmra.mrb[10].mxu0 %v4130_v54 }
 0x9fa   :  { %5752 = vmatpush1.bf16.msra.mxu0 %v5751_v52  ;;  %4364 = vmatprep.mubr.f32.mxu0 %v7428_v33  ;;  %v5822_v52 = vpack.c.bf16 %v5220_v50, %v5199_v47 }
 0x9fb   :  { %5754 = vmatprep.subr.bf16.mxu0 %v5753_v60 }
 0x9fe   :  { %5756 = vmatpush1.bf16.msra.mxu0 %v5755_v2 }
 0x9ff   :  { %5758 = vmatprep.subr.bf16.mxu0 %v5757_v3 }
 0xa02   :  { %5760 = vmatpush1.bf16.msra.mxu0 %v5759_v9 }
 0xa03   :  { %5762 = vmatprep.subr.bf16.mxu0 %v5761_v10 }
 0xa06   :  { %5764 = vmatpush1.bf16.msra.mxu0 %v5763_v18 }
 0xa07   :  { %5766 = vmatprep.subr.bf16.mxu0 %v5765_v63 }
 0xa0a   :  { %5768 = vmatpush1.bf16.msra.mxu0 %v5767_v37 }
 0xa0b   :  { %5180 = vmatprep.subr.msk.mxu0 %vm4222_vm6, %v4218_v57 }
 0xa0e   :  { %5181 = vmatpush1.msk.msra.mxu0 %vm4222_vm6, %v4217_v20 }
 0xa0f   :  { %5182 = vmatmul.mubr.msk.f32.vlgmr.msra.gmra.mrb[10].mxu0 %vm74_vm10, %v4132_v21  ;;  %5797 = vmatprep.subr.bf16.mxu0 %v6136_v28 }
 0xa10   :  { %5799 = vmatpush3.bf16.msra.mxu0 %v7819_v25  ;;  %5457 = vmatprep.mubr.msk.f32.mxu0 %vm6139_vm11, %v7428_v33  ;;  %v5186_v25 = vld [vmem:[%s8037_s15 + $0x28] sm:$0xff] }
 0xa11   :  { %5800 = vmatprep.subr.bf16.mxu0 %v6136_v28  ;;  %v5777_v26 = vpack.c.bf16 %v5186_v25, %v5185_v61 }
 0xa14   :  { %5803 = vmatpush3.bf16.msk.msra.mxu0 %vm7832_vm5, %v5801_v19 }
 0xa15   :  { %5804 = vmatprep.subr.bf16.mxu0 %v6136_v28 }
 0xae2   :  { %v4366_v27 = vpop.f32.mrb[10].mxu0 }
 0xae3   :  { %v4368_v30 = vpop.f32.mrb[11].mxu0  ;;  %5414 = vmatmul.mubr.msk.f32.vlgmr.msra.gmra.mrb[24].mxu1 %vm4376_vm7, %v4366_v27  ;;  %v4460_v53 = vrot.slane %v4366_v27, 1  ;;  %v4542_v44 = vrot.slane %v4366_v27, 2  ;;  %v4624_v54 = vrot.slane %v4366_v27, 3 }
 0xae4   :  { %5778 = vmatpush3.bf16.msra.mxu1 %v5777_v26  ;;  %5458 = vmatmul.mubr.msk.f32.vlgmr.msra.gmra.mrb[16].mxu0 %vm4376_vm7, %v4368_v30  ;;  %v4789_v36 = vrot.slane %v4368_v30, 1  ;;  %v4870_v49 = vrot.slane %v4368_v30, 2  ;;  %v4951_v60 = vrot.slane %v4368_v30, 3 }
 0xae5   :  { %5806 = vmatpush3.bf16.msra.mxu0 %v5777_v26  ;;  %5779 = vmatprep.subr.bf16.mxu1 %v6136_v28 }
 0xae6   :  { %5807 = vmatprep.subr.bf16.mxu0 %v6136_v28  ;;  %5424 = vmatprep.mubr.msk.f32.mxu1 %vm6139_vm11, %v7428_v33 }
 0xae7   :  { %5468 = vmatprep.mubr.msk.f32.mxu0 %vm6139_vm11, %v7428_v33 }
 0xae8   :  { %5782 = vmatpush3.bf16.msk.msra.mxu1 %vm7832_vm5, %v5780_v31 }
 0xae9   :  { %5810 = vmatpush3.bf16.msk.msra.mxu0 %vm7832_vm5, %v5808_v32  ;;  %5783 = vmatprep.subr.bf16.mxu1 %v6136_v28 }
 0xaea   :  { %5811 = vmatprep.subr.bf16.mxu0 %v6136_v28 }
 0xaeb   :  { %5425 = vmatmul.mubr.msk.f32.vlgmr.msra.gmra.mrb[24].mxu1 %vm4376_vm7, %v4460_v53 }
 0xaec   :  { %5785 = vmatpush3.bf16.msra.mxu1 %v5784_v42  ;;  %5469 = vmatmul.mubr.msk.f32.vlgmr.msra.gmra.mrb[16].mxu0 %vm4376_vm7, %v4789_v36 }
 0xaed   :  { %5813 = vmatpush3.bf16.msra.mxu0 %v5784_v42  ;;  %5786 = vmatprep.subr.bf16.mxu1 %v6136_v28 }
 0xaee   :  { %5814 = vmatprep.subr.bf16.mxu0 %v6136_v28  ;;  %5435 = vmatprep.mubr.msk.f32.mxu1 %vm6139_vm11, %v7428_v33 }
 0xaef   :  { %5479 = vmatprep.mubr.msk.f32.mxu0 %vm6139_vm11, %v7428_v33 }
 0xaf0   :  { %5789 = vmatpush3.bf16.msk.msra.mxu1 %vm7832_vm5, %v5787_v41 }
 0xaf1   :  { %5817 = vmatpush3.bf16.msk.msra.mxu0 %vm7832_vm5, %v5815_v55  ;;  %5790 = vmatprep.subr.bf16.mxu1 %v6136_v28 }
 0xaf2   :  { %5818 = vmatprep.subr.bf16.mxu0 %v6136_v28 }
 0xaf3   :  { %5436 = vmatmul.mubr.msk.f32.vlgmr.msra.gmra.mrb[24].mxu1 %vm4376_vm7, %v4542_v44 }
 0xaf4   :  { %5792 = vmatpush3.bf16.msra.mxu1 %v5791_v43  ;;  %5480 = vmatmul.mubr.msk.f32.vlgmr.msra.gmra.mrb[16].mxu0 %vm4376_vm7, %v4870_v49 }
 0xaf5   :  { %5820 = vmatpush3.bf16.msra.mxu0 %v5791_v43  ;;  %5793 = vmatprep.subr.bf16.mxu1 %v6136_v28 }
 0xaf6   :  { %5821 = vmatprep.subr.bf16.mxu0 %v6136_v28  ;;  %5446 = vmatprep.mubr.msk.f32.mxu1 %vm6139_vm11, %v7428_v33  ;;  %v4371_v28 = vld [vmem:[%s8038_s16] sm:$0x1] }
 0xaf7   :  { %5490 = vmatprep.mubr.msk.f32.mxu0 %vm6139_vm11, %v7428_v33 }
 0xaf8   :  { %5796 = vmatpush3.bf16.msk.msra.mxu1 %vm7832_vm5, %v5794_v51 }
 0xaf9   :  { %5824 = vmatpush3.bf16.msk.msra.mxu0 %vm7832_vm5, %v5822_v52 }
 0xafb   :  { %5447 = vmatmul.mubr.msk.f32.vlgmr.msra.gmra.mrb[24].mxu1 %vm4376_vm7, %v4624_v54 }
 0xafc   :  { %5491 = vmatmul.mubr.msk.f32.vlgmr.msra.gmra.mrb[16].mxu0 %vm4376_vm7, %v4951_v60 }
 0xbce   :  { %v4696_v59 = vpop.f32.mrb[24].mxu1 }
 0xbcf   :  { %v5831_v62 = vadd.f32 %v4696_v59, %v4371_v28  ;;  %v5448_v0 = vpop.f32.mrb[25].mxu1  ;;  %v5023_v33 = vpop.f32.mrb[16].mxu0 }
 0xbd0   :  { %v5832_v1 = vadd.f32 %v5023_v33, %v4371_v28  ;;  %v5492_v2 = vpop.f32.mrb[17].mxu0 }
 0xbd1   :  { %v4701_v38 = vmax.f32 %v5831_v62, 0.0 }
 0xbd2   :  { %v5028_v3 = vmax.f32 %v5832_v1, 0.0 }
 0xbd3   :  { %4703 = vst.msk [vmem:[#allocation4] sm:$0x1] %vm4702_vm8, %v4701_v38 }
 0xbd4   :  { %5029 = vst.msk [vmem:[#allocation4 + $0x1] sm:$0x1] %vm4702_vm8, %v5028_v3 }
 0xbd5   :  { %6114 = shalt.err (!%p6111_p4)
}
 0xbd6   :  { %s6115_s19 = scalar_lea.hbm %s8039_s17, 32 }
 0xbd7   :  { %p6116_p5 = scmp.ne.s32.totalorder %s8039_s17, %s6115_s19  ;;  %p6119_p6 = scmp.lt.u32.totalorder %s6115_s19, %s8039_s17 }
 0xbd9   :  { %p6121_p7 = pnand %p6119_p6, %p6116_p5 }
 0xbdb   :  { %6124 = shalt.err (!%p6121_p7)
}
 0xbdc   :  { %5039 = dma.vmem_to_hbm [thread:$0]  %s5037_s5, 32, %s8039_s17, [#allocation5]  }
 0xbdd   :  { %6125 = dma.done.wait [#allocation5], 32  }
 0xbde   :  { %6126 = vsyncadd [#allocation5], 4294967264 }
 0xbdf   :  { %5043 = vsyncpa [#allocation5], 1 }

</bundles_post_ra>
